<compile_context>
chip_gen: v7x
topology: tpu7x:2x2x1
jax: 0.10.0
libtpu: 0.0.40
codegen_flags: <defaults>
</compile_context>

<pallas_src>
import math
import jax
import jax.numpy as jnp
from jax.experimental import pallas as pl
from jax.experimental.pallas import tpu as pltpu  # noqa: F401


# ------------------------------ fused kernel --------------------------------
def _lenet_fused_kernel(q1_ref, w1_ref, b1_ref, w2_ref, b2_ref,
                        wf1_ref, bf1_ref, wf2_ref, bf2_ref, wf3_ref, bf3_ref,
                        o_ref):
    # q1_ref : (4, 25, N) pool-tap im2col of the input, N = B*196,
    #          lane index = b*196 + r*14 + c over the pooled 14x14 conv1 grid.
    # All math is f32; everything below stays in vregs/VMEM.
    N = q1_ref.shape[-1]
    B = N // 196
    WA = N - 60          # width after conv2 shift slack  (max shift ky*14+kx = 60)
    WP = WA - 15         # width after pool  shift slack  (max shift dy*14+dx = 15)
    WF = WP - 120        # width after fc gather slack    (max offset 28*4+2*4 = 120)
    # For every valid sample b: (B-1)*196 + 120 + 15 + 60 < B*196, so all slices
    # below are in bounds and sample b's result sits at lane b*196 throughout.

    # ---- conv1 + bias + ReLU + 2x2 max-pool (pool folded into 4 taps) -------
    w1 = w1_ref[...]                                   # (8, 25), rows 6,7 are zero
    acc = jnp.dot(w1, q1_ref[0], preferred_element_type=jnp.float32)
    for t in range(1, 4):
        acc = jnp.maximum(
            acc, jnp.dot(w1, q1_ref[t], preferred_element_type=jnp.float32))
    a1 = jnp.maximum(acc + b1_ref[...], 0.0)           # (8, N); rows 6,7 == 0

    # ---- conv2 im2col: 25 shifted copies, 8-row aligned sublane stack -------
    pieces = []
    for ky in range(5):
        for kx in range(5):
            s = ky * 14 + kx
            pieces.append(a1[:, s:s + WA])             # (8, WA)
    q2 = jnp.concatenate(pieces, axis=0)               # (200, WA)
    y2 = jnp.dot(w2_ref[...], q2, preferred_element_type=jnp.float32)  # (16, WA)
    r2 = jnp.maximum(y2 + b2_ref[...], 0.0)

    # ---- 2x2 max-pool via 4 shifted copies -----------------------------------
    p = r2[:, 0:WP]
    for off in (1, 14, 15):
        p = jnp.maximum(p, r2[:, off:off + WP])        # (16, WP)
    # pooled value for (b, hp, wp) now lives at lane b*196 + 28*hp + 2*wp

    # ---- flatten for fc1: stack the 25 pooled-pixel row blocks --------------
    fpieces = []
    for hp in range(5):
        for wp in range(5):
            g = 28 * hp + 2 * wp
            fpieces.append(p[:, g:g + WF])             # (16, WF)
    xf = jnp.concatenate(fpieces, axis=0)              # (400, WF); sample b at lane b*196

    # ---- fc1 / fc2 / fc3 (transposed: features on rows, samples on lanes) ---
    h = jnp.maximum(
        jnp.dot(wf1_ref[...], xf, preferred_element_type=jnp.float32) + bf1_ref[...], 0.0)
    h = jnp.maximum(
        jnp.dot(wf2_ref[...], h, preferred_element_type=jnp.float32) + bf2_ref[...], 0.0)
    logits = jnp.dot(wf3_ref[...], h, preferred_element_type=jnp.float32) + bf3_ref[...]

    # ---- softmax over the 10 classes (rows), exact divide --------------------
    m = logits[0:1, :]
    for i in range(1, 10):
        m = jnp.maximum(m, logits[i:i + 1, :])
    e = jnp.exp(logits - m)
    s = e[0:1, :]
    for i in range(1, 10):
        s = s + e[i:i + 1, :]
    probs = e / s                                      # (10, WF)

    for b in range(B):
        o_ref[:, b:b + 1] = probs[:, b * 196:b * 196 + 1]


# ------------------------- host-side (XLA) glue ------------------------------
def _build_q1(x):
    """Pool-tap im2col of the raw input: (4, 25, B*196), f32.

    q1[t, ky*5+kx, b*196 + r*14 + c] = x[b, 0, 2r + dy + ky, 2c + dx + kx],
    t = 2*dy + dx.  Pure strided slices / stack / reshape -- cheap XLA glue that
    runs once before the single fused kernel.
    """
    B = x.shape[0]
    taps = []
    for dy in range(2):
        for dx in range(2):
            rows = []
            for ky in range(5):
                for kx in range(5):
                    r0, c0 = dy + ky, dx + kx
                    v = x[:, 0, r0:r0 + 27:2, c0:c0 + 27:2]   # (B, 14, 14)
                    rows.append(v.reshape(B, 196))
            taps.append(jnp.stack(rows, axis=0).reshape(25, B * 196))
    return jnp.stack(taps, axis=0)


def _prep_weights(p):
    # conv1: pad 6 -> 8 output rows (zero rows) so later sublane concats are 8-aligned.
    w1m = jnp.zeros((8, 25), jnp.float32).at[:6].set(p["conv1_w"].reshape(6, 25))
    b1c = jnp.zeros((8, 1), jnp.float32).at[:6, 0].set(p["conv1_b"])
    # conv2: columns ordered (ky, kx, ci) with ci padded 6 -> 8 (zeros).
    w2r = jnp.pad(p["conv2_w"].transpose(0, 2, 3, 1), ((0, 0), (0, 0), (0, 0), (0, 2)))
    w2m = w2r.reshape(16, 200)
    b2c = p["conv2_b"].reshape(16, 1)
    # fc1: permute input rows from torch order (co*25 + m) to kernel order (m*16 + co),
    # then transpose for the feature-on-rows fc stack.
    wf1 = p["fc1_w"].reshape(16, 25, 120).transpose(1, 0, 2).reshape(400, 120)
    wf1T = wf1.T                                   # (120, 400)
    bf1c = p["fc1_b"].reshape(120, 1)
    wf2T = p["fc2_w"].T                            # (84, 120)
    bf2c = p["fc2_b"].reshape(84, 1)
    wf3T = p["fc3_w"].T                            # (10, 84)
    bf3c = p["fc3_b"].reshape(10, 1)
    return (w1m, b1c, w2m, b2c, wf1T, bf1c, wf2T, bf2c, wf3T, bf3c)


def segment_selector_forward(params, x):
    """x: (B, 1, 32, 32) -> (B, 10) softmax probabilities. Single fused kernel."""
    B = x.shape[0]
    q1 = _build_q1(x)
    args = _prep_weights(params)
    # NOTE: at B=2 everything fits comfortably in VMEM on v5e/v6e/v7x, so one
    # grid-less invocation is fastest; for large B, add a "parallel" grid axis
    # over the batch lane blocks to feed both v7x TensorCores.
    out_T = pl.pallas_call(
        _lenet_fused_kernel,
        out_shape=jax.ShapeDtypeStruct((10, B), jnp.float32),
    )(q1, *args)
    return out_T.T                                   # tiny (10,B) -> (B,10)


# ------------------------------ reference -----------------------------------
def _reference_forward(params, x):
    def conv(x, w, b):
        y = jax.lax.conv_general_dilated(
            x, w, (1, 1), "VALID", dimension_numbers=("NCHW", "OIHW", "NCHW"))
        return y + b.reshape(1, -1, 1, 1)

    def pool(x):
        return jax.lax.reduce_window(
            x, -jnp.inf, jax.lax.max, (1, 1, 2, 2), (1, 1, 2, 2), "VALID")

    a = pool(jax.nn.relu(conv(x, params["conv1_w"], params["conv1_b"])))
    a = pool(jax.nn.relu(conv(a, params["conv2_w"], params["conv2_b"])))
    a = a.reshape(a.shape[0], -1)
    a = jax.nn.relu(a @ params["fc1_w"] + params["fc1_b"])
    a = jax.nn.relu(a @ params["fc2_w"] + params["fc2_b"])
    return jax.nn.softmax(a @ params["fc3_w"] + params["fc3_b"], axis=1)


# --------------------------- deterministic params ---------------------------
def _uniform(key, shape, bound):
    return jax.random.uniform(key, shape, jnp.float32, -bound, bound)


def init_params(key):
    ks = jax.random.split(key, 10)
    p = {}
    b = 1.0 / math.sqrt(1 * 5 * 5)
    p["conv1_w"] = _uniform(ks[0], (6, 1, 5, 5), b)
    p["conv1_b"] = _uniform(ks[1], (6,), b)
    b = 1.0 / math.sqrt(6 * 5 * 5)
    p["conv2_w"] = _uniform(ks[2], (16, 6, 5, 5), b)
    p["conv2_b"] = _uniform(ks[3], (16,), b)
    b = 1.0 / math.sqrt(400)
    p["fc1_w"] = _uniform(ks[4], (400, 120), b)    # stored (in, out)
    p["fc1_b"] = _uniform(ks[5], (120,), b)
    b = 1.0 / math.sqrt(120)
    p["fc2_w"] = _uniform(ks[6], (120, 84), b)
    p["fc2_b"] = _uniform(ks[7], (84,), b)
    b = 1.0 / math.sqrt(84)
    p["fc3_w"] = _uniform(ks[8], (84, 10), b)
    p["fc3_b"] = _uniform(ks[9], (10,), b)
    return p


if __name__ == "__main__":
    key = jax.random.PRNGKey(0)
    pkey, xkey = jax.random.split(key)
    params = init_params(pkey)
    x = jax.random.normal(xkey, (2, 1, 32, 32), jnp.float32)

    out = jax.block_until_ready(jax.jit(segment_selector_forward)(params, x))

    assert out.shape == (2, 10), out.shape
    assert bool(jnp.all(jnp.isfinite(out)))
    # exact softmax divide -> rows sum to 1 to f32 accuracy
    assert bool(jnp.allclose(jnp.sum(out, axis=1), 1.0, atol=1e-3))
    # check against a pure-JAX reference of the PyTorch module
    ref = jax.block_until_ready(jax.jit(_reference_forward)(params, x))
    assert bool(jnp.allclose(out, ref, atol=3e-2)), float(jnp.max(jnp.abs(out - ref)))
    print("KERNEL_OK")
</pallas_src>

<mosaic_0001>
module attributes {stable_mosaic.version = 11 : i64} {
  func.func @_lenet_fused_kernel(%arg0: memref<4x25x392xf32, #tpu.memory_space<vmem>>, %arg1: memref<8x25xf32, #tpu.memory_space<vmem>>, %arg2: memref<8x1xf32, #tpu.memory_space<vmem>>, %arg3: memref<16x200xf32, #tpu.memory_space<vmem>>, %arg4: memref<16x1xf32, #tpu.memory_space<vmem>>, %arg5: memref<120x400xf32, #tpu.memory_space<vmem>>, %arg6: memref<120x1xf32, #tpu.memory_space<vmem>>, %arg7: memref<84x120xf32, #tpu.memory_space<vmem>>, %arg8: memref<84x1xf32, #tpu.memory_space<vmem>>, %arg9: memref<10x84xf32, #tpu.memory_space<vmem>>, %arg10: memref<10x1xf32, #tpu.memory_space<vmem>>, %arg11: memref<10x2xf32, #tpu.memory_space<vmem>>) attributes {dimension_semantics = [], scalar_prefetch = 0 : i64, scratch_operands = 0 : i64, tpu.core_type = #tpu.core_type<tc>} {
    %c0 = arith.constant 0 : index
    %c0_0 = arith.constant 0 : index
    %0 = vector.load %arg1[%c0, %c0_0] : memref<8x25xf32, #tpu.memory_space<vmem>>, vector<8x25xf32>
    %c0_1 = arith.constant 0 : index
    %c0_2 = arith.constant 0 : index
    %c0_3 = arith.constant 0 : index
    %1 = vector.load %arg0[%c0_1, %c0_2, %c0_3] : memref<4x25x392xf32, #tpu.memory_space<vmem>>, vector<1x25x392xf32>
    %2 = vector.shape_cast %1 : vector<1x25x392xf32> to vector<25x392xf32>
    %cst = arith.constant dense<0.000000e+00> : vector<8x392xf32>
    %3 = tpu.matmul %0, %2, %cst {dimension_numbers = #tpu.dot_dimension_numbers<[1], [0], [0], [1], [0, 0, 1, 1], [], []>} : vector<8x25xf32>, vector<25x392xf32>, vector<8x392xf32> -> vector<8x392xf32>
    %c1 = arith.constant 1 : index
    %c0_4 = arith.constant 0 : index
    %c0_5 = arith.constant 0 : index
    %4 = vector.load %arg0[%c1, %c0_4, %c0_5] : memref<4x25x392xf32, #tpu.memory_space<vmem>>, vector<1x25x392xf32>
    %5 = vector.shape_cast %4 : vector<1x25x392xf32> to vector<25x392xf32>
    %cst_6 = arith.constant dense<0.000000e+00> : vector<8x392xf32>
    %6 = tpu.matmul %0, %5, %cst_6 {dimension_numbers = #tpu.dot_dimension_numbers<[1], [0], [0], [1], [0, 0, 1, 1], [], []>} : vector<8x25xf32>, vector<25x392xf32>, vector<8x392xf32> -> vector<8x392xf32>
    %7 = arith.maximumf %3, %6 : vector<8x392xf32>
    %c2 = arith.constant 2 : index
    %c0_7 = arith.constant 0 : index
    %c0_8 = arith.constant 0 : index
    %8 = vector.load %arg0[%c2, %c0_7, %c0_8] : memref<4x25x392xf32, #tpu.memory_space<vmem>>, vector<1x25x392xf32>
    %9 = vector.shape_cast %8 : vector<1x25x392xf32> to vector<25x392xf32>
    %cst_9 = arith.constant dense<0.000000e+00> : vector<8x392xf32>
    %10 = tpu.matmul %0, %9, %cst_9 {dimension_numbers = #tpu.dot_dimension_numbers<[1], [0], [0], [1], [0, 0, 1, 1], [], []>} : vector<8x25xf32>, vector<25x392xf32>, vector<8x392xf32> -> vector<8x392xf32>
    %11 = arith.maximumf %7, %10 : vector<8x392xf32>
    %c3 = arith.constant 3 : index
    %c0_10 = arith.constant 0 : index
    %c0_11 = arith.constant 0 : index
    %12 = vector.load %arg0[%c3, %c0_10, %c0_11] : memref<4x25x392xf32, #tpu.memory_space<vmem>>, vector<1x25x392xf32>
    %13 = vector.shape_cast %12 : vector<1x25x392xf32> to vector<25x392xf32>
    %cst_12 = arith.constant dense<0.000000e+00> : vector<8x392xf32>
    %14 = tpu.matmul %0, %13, %cst_12 {dimension_numbers = #tpu.dot_dimension_numbers<[1], [0], [0], [1], [0, 0, 1, 1], [], []>} : vector<8x25xf32>, vector<25x392xf32>, vector<8x392xf32> -> vector<8x392xf32>
    %15 = arith.maximumf %11, %14 : vector<8x392xf32>
    %c0_13 = arith.constant 0 : index
    %c0_14 = arith.constant 0 : index
    %16 = vector.load %arg2[%c0_13, %c0_14] : memref<8x1xf32, #tpu.memory_space<vmem>>, vector<8x1xf32>
    %17 = vector.broadcast %16 : vector<8x1xf32> to vector<8x392xf32>
    %18 = arith.addf %15, %17 : vector<8x392xf32>
    %cst_15 = arith.constant 0.000000e+00 : f32
    %19 = vector.broadcast %cst_15 : f32 to vector<8x392xf32>
    %20 = arith.maximumf %18, %19 : vector<8x392xf32>
    %21 = vector.extract_strided_slice %20 {offsets = [0, 0], sizes = [8, 332], strides = [1, 1]} : vector<8x392xf32> to vector<8x332xf32>
    %22 = vector.extract_strided_slice %20 {offsets = [0, 1], sizes = [8, 332], strides = [1, 1]} : vector<8x392xf32> to vector<8x332xf32>
    %23 = vector.extract_strided_slice %20 {offsets = [0, 2], sizes = [8, 332], strides = [1, 1]} : vector<8x392xf32> to vector<8x332xf32>
    %24 = vector.extract_strided_slice %20 {offsets = [0, 3], sizes = [8, 332], strides = [1, 1]} : vector<8x392xf32> to vector<8x332xf32>
    %25 = vector.extract_strided_slice %20 {offsets = [0, 4], sizes = [8, 332], strides = [1, 1]} : vector<8x392xf32> to vector<8x332xf32>
    %26 = vector.extract_strided_slice %20 {offsets = [0, 14], sizes = [8, 332], strides = [1, 1]} : vector<8x392xf32> to vector<8x332xf32>
    %27 = vector.extract_strided_slice %20 {offsets = [0, 15], sizes = [8, 332], strides = [1, 1]} : vector<8x392xf32> to vector<8x332xf32>
    %28 = vector.extract_strided_slice %20 {offsets = [0, 16], sizes = [8, 332], strides = [1, 1]} : vector<8x392xf32> to vector<8x332xf32>
    %29 = vector.extract_strided_slice %20 {offsets = [0, 17], sizes = [8, 332], strides = [1, 1]} : vector<8x392xf32> to vector<8x332xf32>
    %30 = vector.extract_strided_slice %20 {offsets = [0, 18], sizes = [8, 332], strides = [1, 1]} : vector<8x392xf32> to vector<8x332xf32>
    %31 = vector.extract_strided_slice %20 {offsets = [0, 28], sizes = [8, 332], strides = [1, 1]} : vector<8x392xf32> to vector<8x332xf32>
    %32 = vector.extract_strided_slice %20 {offsets = [0, 29], sizes = [8, 332], strides = [1, 1]} : vector<8x392xf32> to vector<8x332xf32>
    %33 = vector.extract_strided_slice %20 {offsets = [0, 30], sizes = [8, 332], strides = [1, 1]} : vector<8x392xf32> to vector<8x332xf32>
    %34 = vector.extract_strided_slice %20 {offsets = [0, 31], sizes = [8, 332], strides = [1, 1]} : vector<8x392xf32> to vector<8x332xf32>
    %35 = vector.extract_strided_slice %20 {offsets = [0, 32], sizes = [8, 332], strides = [1, 1]} : vector<8x392xf32> to vector<8x332xf32>
    %36 = vector.extract_strided_slice %20 {offsets = [0, 42], sizes = [8, 332], strides = [1, 1]} : vector<8x392xf32> to vector<8x332xf32>
    %37 = vector.extract_strided_slice %20 {offsets = [0, 43], sizes = [8, 332], strides = [1, 1]} : vector<8x392xf32> to vector<8x332xf32>
    %38 = vector.extract_strided_slice %20 {offsets = [0, 44], sizes = [8, 332], strides = [1, 1]} : vector<8x392xf32> to vector<8x332xf32>
    %39 = vector.extract_strided_slice %20 {offsets = [0, 45], sizes = [8, 332], strides = [1, 1]} : vector<8x392xf32> to vector<8x332xf32>
    %40 = vector.extract_strided_slice %20 {offsets = [0, 46], sizes = [8, 332], strides = [1, 1]} : vector<8x392xf32> to vector<8x332xf32>
    %41 = vector.extract_strided_slice %20 {offsets = [0, 56], sizes = [8, 332], strides = [1, 1]} : vector<8x392xf32> to vector<8x332xf32>
    %42 = vector.extract_strided_slice %20 {offsets = [0, 57], sizes = [8, 332], strides = [1, 1]} : vector<8x392xf32> to vector<8x332xf32>
    %43 = vector.extract_strided_slice %20 {offsets = [0, 58], sizes = [8, 332], strides = [1, 1]} : vector<8x392xf32> to vector<8x332xf32>
    %44 = vector.extract_strided_slice %20 {offsets = [0, 59], sizes = [8, 332], strides = [1, 1]} : vector<8x392xf32> to vector<8x332xf32>
    %45 = vector.extract_strided_slice %20 {offsets = [0, 60], sizes = [8, 332], strides = [1, 1]} : vector<8x392xf32> to vector<8x332xf32>
    %46 = tpu.concatenate %21, %22, %23, %24, %25, %26, %27, %28, %29, %30, %31, %32, %33, %34, %35, %36 in 0 : vector<8x332xf32>, vector<8x332xf32>, vector<8x332xf32>, vector<8x332xf32>, vector<8x332xf32>, vector<8x332xf32>, vector<8x332xf32>, vector<8x332xf32>, vector<8x332xf32>, vector<8x332xf32>, vector<8x332xf32>, vector<8x332xf32>, vector<8x332xf32>, vector<8x332xf32>, vector<8x332xf32>, vector<8x332xf32> -> vector<128x332xf32>
    %47 = tpu.concatenate %37, %38, %39, %40, %41, %42, %43, %44, %45 in 0 : vector<8x332xf32>, vector<8x332xf32>, vector<8x332xf32>, vector<8x332xf32>, vector<8x332xf32>, vector<8x332xf32>, vector<8x332xf32>, vector<8x332xf32>, vector<8x332xf32> -> vector<72x332xf32>
    %48 = tpu.concatenate %46, %47 in 0 : vector<128x332xf32>, vector<72x332xf32> -> vector<200x332xf32>
    %c0_16 = arith.constant 0 : index
    %c0_17 = arith.constant 0 : index
    %49 = vector.load %arg3[%c0_16, %c0_17] : memref<16x200xf32, #tpu.memory_space<vmem>>, vector<16x200xf32>
    %cst_18 = arith.constant dense<0.000000e+00> : vector<16x332xf32>
    %50 = tpu.matmul %49, %48, %cst_18 {dimension_numbers = #tpu.dot_dimension_numbers<[1], [0], [0], [1], [0, 0, 1, 1], [], []>} : vector<16x200xf32>, vector<200x332xf32>, vector<16x332xf32> -> vector<16x332xf32>
    %c0_19 = arith.constant 0 : index
    %c0_20 = arith.constant 0 : index
    %51 = vector.load %arg4[%c0_19, %c0_20] : memref<16x1xf32, #tpu.memory_space<vmem>>, vector<16x1xf32>
    %52 = vector.broadcast %51 : vector<16x1xf32> to vector<16x332xf32>
    %53 = arith.addf %50, %52 : vector<16x332xf32>
    %cst_21 = arith.constant 0.000000e+00 : f32
    %54 = vector.broadcast %cst_21 : f32 to vector<16x332xf32>
    %55 = arith.maximumf %53, %54 : vector<16x332xf32>
    %56 = vector.extract_strided_slice %55 {offsets = [0, 0], sizes = [16, 317], strides = [1, 1]} : vector<16x332xf32> to vector<16x317xf32>
    %57 = vector.extract_strided_slice %55 {offsets = [0, 1], sizes = [16, 317], strides = [1, 1]} : vector<16x332xf32> to vector<16x317xf32>
    %58 = arith.maximumf %56, %57 : vector<16x317xf32>
    %59 = vector.extract_strided_slice %55 {offsets = [0, 14], sizes = [16, 317], strides = [1, 1]} : vector<16x332xf32> to vector<16x317xf32>
    %60 = arith.maximumf %58, %59 : vector<16x317xf32>
    %61 = vector.extract_strided_slice %55 {offsets = [0, 15], sizes = [16, 317], strides = [1, 1]} : vector<16x332xf32> to vector<16x317xf32>
    %62 = arith.maximumf %60, %61 : vector<16x317xf32>
    %63 = vector.extract_strided_slice %62 {offsets = [0, 0], sizes = [16, 197], strides = [1, 1]} : vector<16x317xf32> to vector<16x197xf32>
    %64 = vector.extract_strided_slice %62 {offsets = [0, 2], sizes = [16, 197], strides = [1, 1]} : vector<16x317xf32> to vector<16x197xf32>
    %65 = vector.extract_strided_slice %62 {offsets = [0, 4], sizes = [16, 197], strides = [1, 1]} : vector<16x317xf32> to vector<16x197xf32>
    %66 = vector.extract_strided_slice %62 {offsets = [0, 6], sizes = [16, 197], strides = [1, 1]} : vector<16x317xf32> to vector<16x197xf32>
    %67 = vector.extract_strided_slice %62 {offsets = [0, 8], sizes = [16, 197], strides = [1, 1]} : vector<16x317xf32> to vector<16x197xf32>
    %68 = vector.extract_strided_slice %62 {offsets = [0, 28], sizes = [16, 197], strides = [1, 1]} : vector<16x317xf32> to vector<16x197xf32>
    %69 = vector.extract_strided_slice %62 {offsets = [0, 30], sizes = [16, 197], strides = [1, 1]} : vector<16x317xf32> to vector<16x197xf32>
    %70 = vector.extract_strided_slice %62 {offsets = [0, 32], sizes = [16, 197], strides = [1, 1]} : vector<16x317xf32> to vector<16x197xf32>
    %71 = vector.extract_strided_slice %62 {offsets = [0, 34], sizes = [16, 197], strides = [1, 1]} : vector<16x317xf32> to vector<16x197xf32>
    %72 = vector.extract_strided_slice %62 {offsets = [0, 36], sizes = [16, 197], strides = [1, 1]} : vector<16x317xf32> to vector<16x197xf32>
    %73 = vector.extract_strided_slice %62 {offsets = [0, 56], sizes = [16, 197], strides = [1, 1]} : vector<16x317xf32> to vector<16x197xf32>
    %74 = vector.extract_strided_slice %62 {offsets = [0, 58], sizes = [16, 197], strides = [1, 1]} : vector<16x317xf32> to vector<16x197xf32>
    %75 = vector.extract_strided_slice %62 {offsets = [0, 60], sizes = [16, 197], strides = [1, 1]} : vector<16x317xf32> to vector<16x197xf32>
    %76 = vector.extract_strided_slice %62 {offsets = [0, 62], sizes = [16, 197], strides = [1, 1]} : vector<16x317xf32> to vector<16x197xf32>
    %77 = vector.extract_strided_slice %62 {offsets = [0, 64], sizes = [16, 197], strides = [1, 1]} : vector<16x317xf32> to vector<16x197xf32>
    %78 = vector.extract_strided_slice %62 {offsets = [0, 84], sizes = [16, 197], strides = [1, 1]} : vector<16x317xf32> to vector<16x197xf32>
    %79 = vector.extract_strided_slice %62 {offsets = [0, 86], sizes = [16, 197], strides = [1, 1]} : vector<16x317xf32> to vector<16x197xf32>
    %80 = vector.extract_strided_slice %62 {offsets = [0, 88], sizes = [16, 197], strides = [1, 1]} : vector<16x317xf32> to vector<16x197xf32>
    %81 = vector.extract_strided_slice %62 {offsets = [0, 90], sizes = [16, 197], strides = [1, 1]} : vector<16x317xf32> to vector<16x197xf32>
    %82 = vector.extract_strided_slice %62 {offsets = [0, 92], sizes = [16, 197], strides = [1, 1]} : vector<16x317xf32> to vector<16x197xf32>
    %83 = vector.extract_strided_slice %62 {offsets = [0, 112], sizes = [16, 197], strides = [1, 1]} : vector<16x317xf32> to vector<16x197xf32>
    %84 = vector.extract_strided_slice %62 {offsets = [0, 114], sizes = [16, 197], strides = [1, 1]} : vector<16x317xf32> to vector<16x197xf32>
    %85 = vector.extract_strided_slice %62 {offsets = [0, 116], sizes = [16, 197], strides = [1, 1]} : vector<16x317xf32> to vector<16x197xf32>
    %86 = vector.extract_strided_slice %62 {offsets = [0, 118], sizes = [16, 197], strides = [1, 1]} : vector<16x317xf32> to vector<16x197xf32>
    %87 = vector.extract_strided_slice %62 {offsets = [0, 120], sizes = [16, 197], strides = [1, 1]} : vector<16x317xf32> to vector<16x197xf32>
    %88 = tpu.concatenate %63, %64, %65, %66, %67, %68, %69, %70, %71, %72, %73, %74, %75, %76, %77, %78 in 0 : vector<16x197xf32>, vector<16x197xf32>, vector<16x197xf32>, vector<16x197xf32>, vector<16x197xf32>, vector<16x197xf32>, vector<16x197xf32>, vector<16x197xf32>, vector<16x197xf32>, vector<16x197xf32>, vector<16x197xf32>, vector<16x197xf32>, vector<16x197xf32>, vector<16x197xf32>, vector<16x197xf32>, vector<16x197xf32> -> vector<256x197xf32>
    %89 = tpu.concatenate %79, %80, %81, %82, %83, %84, %85, %86, %87 in 0 : vector<16x197xf32>, vector<16x197xf32>, vector<16x197xf32>, vector<16x197xf32>, vector<16x197xf32>, vector<16x197xf32>, vector<16x197xf32>, vector<16x197xf32>, vector<16x197xf32> -> vector<144x197xf32>
    %90 = tpu.concatenate %88, %89 in 0 : vector<256x197xf32>, vector<144x197xf32> -> vector<400x197xf32>
    %c0_22 = arith.constant 0 : index
    %c0_23 = arith.constant 0 : index
    %91 = vector.load %arg5[%c0_22, %c0_23] : memref<120x400xf32, #tpu.memory_space<vmem>>, vector<120x400xf32>
    %cst_24 = arith.constant dense<0.000000e+00> : vector<120x197xf32>
    %92 = tpu.matmul %91, %90, %cst_24 {dimension_numbers = #tpu.dot_dimension_numbers<[1], [0], [0], [1], [0, 0, 1, 1], [], []>} : vector<120x400xf32>, vector<400x197xf32>, vector<120x197xf32> -> vector<120x197xf32>
    %c0_25 = arith.constant 0 : index
    %c0_26 = arith.constant 0 : index
    %93 = vector.load %arg6[%c0_25, %c0_26] : memref<120x1xf32, #tpu.memory_space<vmem>>, vector<120x1xf32>
    %94 = vector.broadcast %93 : vector<120x1xf32> to vector<120x197xf32>
    %95 = arith.addf %92, %94 : vector<120x197xf32>
    %cst_27 = arith.constant 0.000000e+00 : f32
    %96 = vector.broadcast %cst_27 : f32 to vector<120x197xf32>
    %97 = arith.maximumf %95, %96 : vector<120x197xf32>
    %c0_28 = arith.constant 0 : index
    %c0_29 = arith.constant 0 : index
    %98 = vector.load %arg7[%c0_28, %c0_29] : memref<84x120xf32, #tpu.memory_space<vmem>>, vector<84x120xf32>
    %cst_30 = arith.constant dense<0.000000e+00> : vector<84x197xf32>
    %99 = tpu.matmul %98, %97, %cst_30 {dimension_numbers = #tpu.dot_dimension_numbers<[1], [0], [0], [1], [0, 0, 1, 1], [], []>} : vector<84x120xf32>, vector<120x197xf32>, vector<84x197xf32> -> vector<84x197xf32>
    %c0_31 = arith.constant 0 : index
    %c0_32 = arith.constant 0 : index
    %100 = vector.load %arg8[%c0_31, %c0_32] : memref<84x1xf32, #tpu.memory_space<vmem>>, vector<84x1xf32>
    %101 = vector.broadcast %100 : vector<84x1xf32> to vector<84x197xf32>
    %102 = arith.addf %99, %101 : vector<84x197xf32>
    %cst_33 = arith.constant 0.000000e+00 : f32
    %103 = vector.broadcast %cst_33 : f32 to vector<84x197xf32>
    %104 = arith.maximumf %102, %103 : vector<84x197xf32>
    %c0_34 = arith.constant 0 : index
    %c0_35 = arith.constant 0 : index
    %105 = vector.load %arg9[%c0_34, %c0_35] : memref<10x84xf32, #tpu.memory_space<vmem>>, vector<10x84xf32>
    %cst_36 = arith.constant dense<0.000000e+00> : vector<10x197xf32>
    %106 = tpu.matmul %105, %104, %cst_36 {dimension_numbers = #tpu.dot_dimension_numbers<[1], [0], [0], [1], [0, 0, 1, 1], [], []>} : vector<10x84xf32>, vector<84x197xf32>, vector<10x197xf32> -> vector<10x197xf32>
    %c0_37 = arith.constant 0 : index
    %c0_38 = arith.constant 0 : index
    %107 = vector.load %arg10[%c0_37, %c0_38] : memref<10x1xf32, #tpu.memory_space<vmem>>, vector<10x1xf32>
    %108 = vector.broadcast %107 : vector<10x1xf32> to vector<10x197xf32>
    %109 = arith.addf %106, %108 : vector<10x197xf32>
    %110 = vector.extract_strided_slice %109 {offsets = [0, 0], sizes = [1, 197], strides = [1, 1]} : vector<10x197xf32> to vector<1x197xf32>
    %111 = vector.extract_strided_slice %109 {offsets = [1, 0], sizes = [1, 197], strides = [1, 1]} : vector<10x197xf32> to vector<1x197xf32>
    %112 = arith.maximumf %110, %111 : vector<1x197xf32>
    %113 = vector.extract_strided_slice %109 {offsets = [2, 0], sizes = [1, 197], strides = [1, 1]} : vector<10x197xf32> to vector<1x197xf32>
    %114 = arith.maximumf %112, %113 : vector<1x197xf32>
    %115 = vector.extract_strided_slice %109 {offsets = [3, 0], sizes = [1, 197], strides = [1, 1]} : vector<10x197xf32> to vector<1x197xf32>
    %116 = arith.maximumf %114, %115 : vector<1x197xf32>
    %117 = vector.extract_strided_slice %109 {offsets = [4, 0], sizes = [1, 197], strides = [1, 1]} : vector<10x197xf32> to vector<1x197xf32>
    %118 = arith.maximumf %116, %117 : vector<1x197xf32>
    %119 = vector.extract_strided_slice %109 {offsets = [5, 0], sizes = [1, 197], strides = [1, 1]} : vector<10x197xf32> to vector<1x197xf32>
    %120 = arith.maximumf %118, %119 : vector<1x197xf32>
    %121 = vector.extract_strided_slice %109 {offsets = [6, 0], sizes = [1, 197], strides = [1, 1]} : vector<10x197xf32> to vector<1x197xf32>
    %122 = arith.maximumf %120, %121 : vector<1x197xf32>
    %123 = vector.extract_strided_slice %109 {offsets = [7, 0], sizes = [1, 197], strides = [1, 1]} : vector<10x197xf32> to vector<1x197xf32>
    %124 = arith.maximumf %122, %123 : vector<1x197xf32>
    %125 = vector.extract_strided_slice %109 {offsets = [8, 0], sizes = [1, 197], strides = [1, 1]} : vector<10x197xf32> to vector<1x197xf32>
    %126 = arith.maximumf %124, %125 : vector<1x197xf32>
    %127 = vector.extract_strided_slice %109 {offsets = [9, 0], sizes = [1, 197], strides = [1, 1]} : vector<10x197xf32> to vector<1x197xf32>
    %128 = arith.maximumf %126, %127 : vector<1x197xf32>
    %129 = vector.broadcast %128 : vector<1x197xf32> to vector<10x197xf32>
    %130 = arith.subf %109, %129 : vector<10x197xf32>
    %131 = math.exp %130 : vector<10x197xf32>
    %132 = vector.extract_strided_slice %131 {offsets = [0, 0], sizes = [1, 197], strides = [1, 1]} : vector<10x197xf32> to vector<1x197xf32>
    %133 = vector.extract_strided_slice %131 {offsets = [1, 0], sizes = [1, 197], strides = [1, 1]} : vector<10x197xf32> to vector<1x197xf32>
    %134 = arith.addf %132, %133 : vector<1x197xf32>
    %135 = vector.extract_strided_slice %131 {offsets = [2, 0], sizes = [1, 197], strides = [1, 1]} : vector<10x197xf32> to vector<1x197xf32>
    %136 = arith.addf %134, %135 : vector<1x197xf32>
    %137 = vector.extract_strided_slice %131 {offsets = [3, 0], sizes = [1, 197], strides = [1, 1]} : vector<10x197xf32> to vector<1x197xf32>
    %138 = arith.addf %136, %137 : vector<1x197xf32>
    %139 = vector.extract_strided_slice %131 {offsets = [4, 0], sizes = [1, 197], strides = [1, 1]} : vector<10x197xf32> to vector<1x197xf32>
    %140 = arith.addf %138, %139 : vector<1x197xf32>
    %141 = vector.extract_strided_slice %131 {offsets = [5, 0], sizes = [1, 197], strides = [1, 1]} : vector<10x197xf32> to vector<1x197xf32>
    %142 = arith.addf %140, %141 : vector<1x197xf32>
    %143 = vector.extract_strided_slice %131 {offsets = [6, 0], sizes = [1, 197], strides = [1, 1]} : vector<10x197xf32> to vector<1x197xf32>
    %144 = arith.addf %142, %143 : vector<1x197xf32>
    %145 = vector.extract_strided_slice %131 {offsets = [7, 0], sizes = [1, 197], strides = [1, 1]} : vector<10x197xf32> to vector<1x197xf32>
    %146 = arith.addf %144, %145 : vector<1x197xf32>
    %147 = vector.extract_strided_slice %131 {offsets = [8, 0], sizes = [1, 197], strides = [1, 1]} : vector<10x197xf32> to vector<1x197xf32>
    %148 = arith.addf %146, %147 : vector<1x197xf32>
    %149 = vector.extract_strided_slice %131 {offsets = [9, 0], sizes = [1, 197], strides = [1, 1]} : vector<10x197xf32> to vector<1x197xf32>
    %150 = arith.addf %148, %149 : vector<1x197xf32>
    %151 = vector.broadcast %150 : vector<1x197xf32> to vector<10x197xf32>
    %152 = arith.divf %131, %151 : vector<10x197xf32>
    %153 = vector.extract_strided_slice %152 {offsets = [0, 0], sizes = [10, 1], strides = [1, 1]} : vector<10x197xf32> to vector<10x1xf32>
    %c0_39 = arith.constant 0 : index
    %c0_40 = arith.constant 0 : index
    %154 = vector.load %arg11[%c0_39, %c0_40] : memref<10x2xf32, #tpu.memory_space<vmem>>, vector<10x1xf32>
    tpu.vector_store %arg11[%c0_39, %c0_40], %153 {strides = array<i32>} : memref<10x2xf32, #tpu.memory_space<vmem>>, vector<10x1xf32>,
    %155 = vector.extract_strided_slice %152 {offsets = [0, 196], sizes = [10, 1], strides = [1, 1]} : vector<10x197xf32> to vector<10x1xf32>
    %c0_41 = arith.constant 0 : index
    %c1_42 = arith.constant 1 : index
    %156 = vector.load %arg11[%c0_41, %c1_42] : memref<10x2xf32, #tpu.memory_space<vmem>>, vector<10x1xf32>
    tpu.vector_store %arg11[%c0_41, %c1_42], %155 {strides = array<i32>} : memref<10x2xf32, #tpu.memory_space<vmem>>, vector<10x1xf32>,
    return
  }
}

</mosaic_0001>

<bundles_post_ra>
// kernel: segment_selector_forward.1
= control target key start
LH: loop header
LB: loop body
LE: loop exit
PB: predicated region body
PF: predicated region fallthrough
CT: control target
= control target key end

     0   :  { %vm59_vm0 = vcmask 1040384   ;;  %v3968_v3 = vmov 0.0   ;;  %v3969_v8 = vmov 0   ;;  %vm3970_vm1 = vmmov 1   ;;  %s3972_s29 = smov 127   ;;  %s3973_s30 = smov 111   ;;  %s5360_s0 = inlined_call_operand.vmem [shape: f32[4,25,392], index: 0, kind: input, shape index: {}]   ;;  %s5361_s1 = inlined_call_operand.vmem [shape: f32[8,25], index: 1, kind: input, shape index: {}]   ;;  %s5362_s2 = inlined_call_operand.vmem [shape: f32[8,1], index: 2, kind: input, shape index: {}]   ;;  %s5363_s3 = inlined_call_operand.vmem [shape: f32[16,200], index: 3, kind: input, shape index: {}]   ;;  %s5364_s4 = inlined_call_operand.vmem [shape: f32[16,1], index: 4, kind: input, shape index: {}]   ;;  %s5365_s5 = inlined_call_operand.vmem [shape: f32[120,400], index: 5, kind: input, shape index: {}]   ;;  %s5366_s6 = inlined_call_operand.vmem [shape: f32[120,1], index: 6, kind: input, shape index: {}]   ;;  %s5367_s8 = inlined_call_operand.vmem [shape: f32[84,1], index: 8, kind: input, shape index: {}]   ;;  %s5368_s10 = inlined_call_operand.vmem [shape: f32[10,1], index: 10, kind: input, shape index: {}]   ;;  %s5369_s7 = inlined_call_operand.vmem [shape: f32[84,120], index: 7, kind: input, shape index: {}]   ;;  %s5370_s9 = inlined_call_operand.vmem [shape: f32[10,84], index: 9, kind: input, shape index: {}]   ;;  %s5371_s11 = inlined_call_operand.vmem [shape: f32[10,2], index: 11, kind: output, shape index: {}]  }
   0x1   :  { %v40_v0 = vld [vmem:[%s5360_s0 + $0x8] sm:$0xff]  ;;  %v42_v2 = vld [vmem:[%s5360_s0 + $0x18] sm:$0xff]  ;;  %136 = vmatprep.mubr.f32.mxu0 %v3968_v3  ;;  %207 = vmatprep.mubr.f32.mxu1 %v3968_v3  ;;  %v39_v6 = vld [vmem:[%s5360_s0] sm:$0xff]  ;;  %vm55_vm3 = vcmask 203776   ;;  %s3974_s12 = smov 126   ;;  %s3975_s13 = smov 114  }
   0x2   :  { %v44_v1 = vld [vmem:[%s5360_s0 + $0x28] sm:$0xff]  ;;  %v46_v5 = vld [vmem:[%s5360_s0 + $0x38] sm:$0xff]  ;;  %v43_v7 = vld [vmem:[%s5360_s0 + $0x20] sm:$0xff]  ;;  %3399 = vset.pattern.permute.xlu0 %v3969_v8  ;;  %3555 = vset.pattern.permute.xlu1 %v3969_v8  ;;  %s3976_s14 = smov 115   ;;  %s3977_s15 = smov 113   ;;  %vm762_vm4 = vcmask 1039360  }
   0x3   :  { %v2993_v4 = vpack.c.bf16 %v44_v1, %v40_v0  ;;  %v3003_v9 = vpack.c.bf16 %v46_v5, %v42_v2  ;;  %v2995_v10 = vpack.c.bf16 %v43_v7, %v39_v6  ;;  %v41_v11 = vld [vmem:[%s5360_s0 + $0x10] sm:$0xff]  ;;  %v48_v13 = vld [vmem:[%s5360_s0 + $0x48] sm:$0xff]  ;;  %vm4095_vm2 = vmpackc.low %vm59_vm0, %vm3970_vm1  ;;  %s3978_s16 = smov 112   ;;  %s3979_s17 = smov 100   ;;  %vm774_vm5 = vcmask 1031168  }
   0x4   :  { %v45_v12 = vld [vmem:[%s5360_s0 + $0x30] sm:$0xff]  ;;  %v52_v15 = vld [vmem:[%s5360_s0 + $0x68] sm:$0x1]  ;;  %v50_v17 = vld [vmem:[%s5360_s0 + $0x58] sm:$0xff]  ;;  %s3980_s18 = smov 124   ;;  %s3981_s19 = smov 98  }
   0x5   :  { %2994 = vmatprep.subr.bf16.mxu0 %v2993_v4  ;;  %v3005_v14 = vpack.c.bf16 %v45_v12, %v41_v11  ;;  %3004 = vmatprep.subr.bf16.mxu1 %v3003_v9  ;;  %v2997_v18 = vpack.c.bf16 %v52_v15, %v48_v13  ;;  %v54_v19 = vld [vmem:[%s5360_s0 + $0x78] sm:$0x1]  ;;  %v47_v20 = vld [vmem:[%s5360_s0 + $0x40] sm:$0xff]  ;;  %v49_v24 = vld [vmem:[%s5360_s0 + $0x50] sm:$0xff]  ;;  %s3982_s20 = smov 110   ;;  %s3984_s21 = smov 99  }
   0x6   :  { %2996 = vmatpush1.bf16.msra.mxu0 %v2995_v10  ;;  %v51_v21 = vld [vmem:[%s5360_s0 + $0x60] sm:$0x1]  ;;  %v3007_v22 = vpack.c.bf16 %v54_v19, %v50_v17  ;;  %v53_v25 = vld [vmem:[%s5360_s0 + $0x70] sm:$0x1]  ;;  %v2894_v28 = vld [vmem:[%s5360_s0 + $0x88] sm:$0xff]  ;;  %s3986_s22 = smov 86  }
   0x7   :  { %3006 = vmatpush1.bf16.msra.mxu1 %v3005_v14  ;;  %v3000_v23 = vpack.c.bf16 %v51_v21, %v47_v20  ;;  %2999 = vmatprep.subr.msk.bf16.mxu0 %vm4095_vm2, %v2997_v18  ;;  %v3010_v26 = vpack.c.bf16 %v53_v25, %v49_v24  ;;  %v4122_v27 = vld [vmem:[%s5361_s1] sm:$0xff]  ;;  %v2898_v29 = vld [vmem:[%s5360_s0 + $0xa8] sm:$0xff]  ;;  %v2896_v30 = vld [vmem:[%s5360_s0 + $0x98] sm:$0xff]  ;;  %s3983_s1 = smov 96   ;;  %s3987_s23 = smov 85   ;;  %vm786_vm6 = vcmask 1022976  }
   0x8   :  { %3009 = vmatprep.subr.msk.bf16.mxu1 %vm4095_vm2, %v3007_v22  ;;  %v3013_v31 = vpack.c.bf16 %v2898_v29, %v2894_v28  ;;  %v2900_v32 = vld [vmem:[%s5360_s0 + $0xb8] sm:$0xff]  ;;  %v2893_v33 = vld [vmem:[%s5360_s0 + $0x80] sm:$0xff]  ;;  %v2895_v37 = vld [vmem:[%s5360_s0 + $0x90] sm:$0xff]  ;;  %vm945_vm7 = vcmask 941056   ;;  %vm810_vm8 = vcmask 932864   ;;  %vm822_vm9 = vcmask 924672  }
   0x9   :  { %v2897_v34 = vld [vmem:[%s5360_s0 + $0xa0] sm:$0xff]  ;;  %v3023_v35 = vpack.c.bf16 %v2900_v32, %v2896_v30  ;;  %v2899_v38 = vld [vmem:[%s5360_s0 + $0xb0] sm:$0xff]  ;;  %v2902_v39 = vld [vmem:[%s5360_s0 + $0xc8] sm:$0xff]  ;;  %vm834_vm10 = vcmask 916480   ;;  %vm1077_vm11 = vcmask 588800   ;;  %vm846_vm12 = vcmask 908288  }
   0xa   :  { %3002 = vmatpush1.bf16.msk.msra.mxu0 %vm4095_vm2, %v3000_v23  ;;  %v3015_v36 = vpack.c.bf16 %v2897_v34, %v2893_v33  ;;  %v3025_v40 = vpack.c.bf16 %v2899_v38, %v2895_v37  ;;  %v2906_v41 = vld [vmem:[%s5360_s0 + $0xe8] sm:$0x1]  ;;  %v2904_v42 = vld [vmem:[%s5360_s0 + $0xd8] sm:$0xff]  ;;  %v2901_v46 = vld [vmem:[%s5360_s0 + $0xc0] sm:$0xff]  ;;  %vm798_vm13 = vcmask 1014784   ;;  %vm858_vm14 = vcmask 900096  }
   0xb   :  { %3012 = vmatpush1.bf16.msk.msra.mxu1 %vm4095_vm2, %v3010_v26  ;;  %3014 = vmatprep.subr.bf16.mxu0 %v3013_v31  ;;  %v2908_v43 = vld [vmem:[%s5360_s0 + $0xf8] sm:$0x1]  ;;  %v3017_v44 = vpack.c.bf16 %v2906_v41, %v2902_v39  ;;  %v2905_v47 = vld [vmem:[%s5360_s0 + $0xe0] sm:$0x1]  ;;  %v2903_v48 = vld [vmem:[%s5360_s0 + $0xd0] sm:$0xff]  ;;  %vm870_vm15 = vcmask 818176  }
   0xc   :  { %3024 = vmatprep.subr.bf16.mxu1 %v3023_v35  ;;  %v3027_v45 = vpack.c.bf16 %v2908_v43, %v2904_v42  ;;  %v2907_v49 = vld [vmem:[%s5360_s0 + $0xf0] sm:$0x1]  ;;  %v2916_v50 = vld [vmem:[%s5360_s0 + $0x108] sm:$0xff]  ;;  %v3020_v52 = vpack.c.bf16 %v2905_v47, %v2901_v46  ;;  %v2918_v53 = vld [vmem:[%s5360_s0 + $0x118] sm:$0xff]  ;;  %vm882_vm0 = vcmask 809984   ;;  %vm894_vm1 = vcmask 801792  }
   0xd   :  { %2889 = vmatmul.mubr.msk.f32.vlgmr.msra.gmra.mrb[0].mxu0 %vm55_vm3, %v4122_v27  ;;  %v2920_v51 = vld [vmem:[%s5360_s0 + $0x128] sm:$0xff]  ;;  %v2922_v54 = vld [vmem:[%s5360_s0 + $0x138] sm:$0xff]  ;;  %v3030_v55 = vpack.c.bf16 %v2907_v49, %v2903_v48  ;;  %v2915_v57 = vld [vmem:[%s5360_s0 + $0x100] sm:$0xff]  ;;  %s3996_s24 = smov 94   ;;  %s3997_s25 = smov 72  }
   0xe   :  { %2892 = vmatmul.mubr.msk.f32.vlgmr.msra.gmra.mrb[0].mxu1 %vm55_vm3, %v4122_v27  ;;  %3016 = vmatpush1.bf16.msra.mxu0 %v3015_v36  ;;  %v3033_v56 = vpack.c.bf16 %v2920_v51, %v2916_v50  ;;  %v2919_v58 = vld [vmem:[%s5360_s0 + $0x120] sm:$0xff]  ;;  %v2917_v59 = vld [vmem:[%s5360_s0 + $0x110] sm:$0xff]  ;;  %v3043_v60 = vpack.c.bf16 %v2922_v54, %v2918_v53  ;;  %v2924_v62 = vld [vmem:[%s5360_s0 + $0x148] sm:$0xff] }
   0xf   :  { %3026 = vmatpush1.bf16.msra.mxu1 %v3025_v40  ;;  %3019 = vmatprep.subr.msk.bf16.mxu0 %vm4095_vm2, %v3017_v44  ;;  %v2921_v61 = vld [vmem:[%s5360_s0 + $0x130] sm:$0xff]  ;;  %v2928_v63 = vld [vmem:[%s5360_s0 + $0x168] sm:$0x1]  ;;  %v2926_v0 = vld [vmem:[%s5360_s0 + $0x158] sm:$0xff]  ;;  %v3035_v2 = vpack.c.bf16 %v2919_v58, %v2915_v57 }
  0x10   :  { %3029 = vmatprep.subr.msk.bf16.mxu1 %vm4095_vm2, %v3027_v45  ;;  %307 = vmatprep.mubr.f32.mxu0 %v3968_v3  ;;  %v2930_v1 = vld [vmem:[%s5360_s0 + $0x178] sm:$0x1]  ;;  %v3045_v4 = vpack.c.bf16 %v2921_v61, %v2917_v59  ;;  %v3037_v5 = vpack.c.bf16 %v2928_v63, %v2924_v62  ;;  %v2923_v6 = vld [vmem:[%s5360_s0 + $0x140] sm:$0xff]  ;;  %v2925_v8 = vld [vmem:[%s5360_s0 + $0x150] sm:$0xff] }
  0x11   :  { %378 = vmatprep.mubr.f32.mxu1 %v3968_v3  ;;  %v2927_v7 = vld [vmem:[%s5360_s0 + $0x160] sm:$0x1]  ;;  %v3047_v9 = vpack.c.bf16 %v2930_v1, %v2926_v0  ;;  %v2929_v10 = vld [vmem:[%s5360_s0 + $0x170] sm:$0x1]  ;;  %v2938_v11 = vld [vmem:[%s5360_s0 + $0x188] sm:$0xff] }
  0x12   :  { %3022 = vmatpush1.bf16.msk.msra.mxu0 %vm4095_vm2, %v3020_v52  ;;  %v2942_v12 = vld [vmem:[%s5360_s0 + $0x1a8] sm:$0xff]  ;;  %v2940_v13 = vld [vmem:[%s5360_s0 + $0x198] sm:$0xff]  ;;  %v3040_v15 = vpack.c.bf16 %v2927_v7, %v2923_v6  ;;  %v2937_v17 = vld [vmem:[%s5360_s0 + $0x180] sm:$0xff]  ;;  %v3050_v18 = vpack.c.bf16 %v2929_v10, %v2925_v8 }
  0x13   :  { %3032 = vmatpush1.bf16.msk.msra.mxu1 %vm4095_vm2, %v3030_v55  ;;  %3034 = vmatprep.subr.bf16.mxu0 %v3033_v56  ;;  %v2944_v14 = vld [vmem:[%s5360_s0 + $0x1b8] sm:$0xff]  ;;  %v3053_v19 = vpack.c.bf16 %v2942_v12, %v2938_v11  ;;  %v2941_v20 = vld [vmem:[%s5360_s0 + $0x1a0] sm:$0xff]  ;;  %v2939_v21 = vld [vmem:[%s5360_s0 + $0x190] sm:$0xff] }
  0x14   :  { %3044 = vmatprep.subr.bf16.mxu1 %v3043_v60  ;;  %v2943_v22 = vld [vmem:[%s5360_s0 + $0x1b0] sm:$0xff]  ;;  %v3063_v23 = vpack.c.bf16 %v2944_v14, %v2940_v13  ;;  %v2946_v24 = vld [vmem:[%s5360_s0 + $0x1c8] sm:$0xff]  ;;  %v739_v26 = vld [vmem:[%s5362_s2] sm:$0xff]  ;;  %v3055_v30 = vpack.c.bf16 %v2941_v20, %v2937_v17  ;;  %s3985_s2 = smov 97  }
  0x15   :  { %2911 = vmatmul.mubr.msk.f32.vlgmr.msra.gmra.mrb[2].mxu0 %vm55_vm3, %v4122_v27  ;;  %v2950_v25 = vld [vmem:[%s5360_s0 + $0x1e8] sm:$0x1]  ;;  %v2948_v28 = vld [vmem:[%s5360_s0 + $0x1d8] sm:$0xff]  ;;  %742 = vperm.xlu0 %3399, %v739_v26   ;;  %v3065_v31 = vpack.c.bf16 %v2943_v22, %v2939_v21  ;;  %v2945_v33 = vld [vmem:[%s5360_s0 + $0x1c0] sm:$0xff] }
  0x16   :  { %2914 = vmatmul.mubr.msk.f32.vlgmr.msra.gmra.mrb[2].mxu1 %vm55_vm3, %v4122_v27  ;;  %3036 = vmatpush1.bf16.msra.mxu0 %v3035_v2  ;;  %v2952_v29 = vld [vmem:[%s5360_s0 + $0x1f8] sm:$0x1]  ;;  %v3057_v32 = vpack.c.bf16 %v2950_v25, %v2946_v24  ;;  %v2949_v34 = vld [vmem:[%s5360_s0 + $0x1e0] sm:$0x1]  ;;  %v2947_v36 = vld [vmem:[%s5360_s0 + $0x1d0] sm:$0xff] }
  0x17   :  { %3046 = vmatpush1.bf16.msra.mxu1 %v3045_v4  ;;  %3039 = vmatprep.subr.msk.bf16.mxu0 %vm4095_vm2, %v3037_v5  ;;  %v3067_v35 = vpack.c.bf16 %v2952_v29, %v2948_v28  ;;  %v2951_v37 = vld [vmem:[%s5360_s0 + $0x1f0] sm:$0x1]  ;;  %v3060_v38 = vpack.c.bf16 %v2949_v34, %v2945_v33  ;;  %s3971_s0 = smov 125  }
  0x18   :  { %3049 = vmatprep.subr.msk.bf16.mxu1 %vm4095_vm2, %v3047_v9  ;;  %482 = vmatprep.mubr.f32.mxu0 %v3968_v3  ;;  %v3070_v39 = vpack.c.bf16 %v2951_v37, %v2947_v36 }
  0x19   :  { %553 = vmatprep.mubr.f32.mxu1 %v3968_v3 }
  0x1a   :  { %3042 = vmatpush1.bf16.msk.msra.mxu0 %vm4095_vm2, %v3040_v15 }
  0x1b   :  { %3052 = vmatpush1.bf16.msk.msra.mxu1 %vm4095_vm2, %v3050_v18  ;;  %3054 = vmatprep.subr.bf16.mxu0 %v3053_v19 }
  0x1c   :  { %3064 = vmatprep.subr.bf16.mxu1 %v3063_v23 }
  0x1d   :  { %2933 = vmatmul.mubr.msk.f32.vlgmr.msra.gmra.mrb[4].mxu0 %vm55_vm3, %v4122_v27 }
  0x1e   :  { %2936 = vmatmul.mubr.msk.f32.vlgmr.msra.gmra.mrb[4].mxu1 %vm55_vm3, %v4122_v27  ;;  %3056 = vmatpush1.bf16.msra.mxu0 %v3055_v30 }
  0x1f   :  { %3066 = vmatpush1.bf16.msra.mxu1 %v3065_v31  ;;  %3059 = vmatprep.subr.msk.bf16.mxu0 %vm4095_vm2, %v3057_v32 }
  0x20   :  { %3069 = vmatprep.subr.msk.bf16.mxu1 %vm4095_vm2, %v3067_v35  ;;  %657 = vmatprep.mubr.f32.mxu0 %v3968_v3 }
  0x21   :  { %728 = vmatprep.mubr.f32.mxu1 %v3968_v3 }
  0x22   :  { %3062 = vmatpush1.bf16.msk.msra.mxu0 %vm4095_vm2, %v3060_v38 }
  0x23   :  { %3072 = vmatpush1.bf16.msk.msra.mxu1 %vm4095_vm2, %v3070_v39  ;;  %vm906_vm2 = vcmask 793600  }
  0x25   :  { %2955 = vmatmul.mubr.msk.f32.vlgmr.msra.gmra.mrb[6].mxu0 %vm55_vm3, %v4122_v27 }
  0x26   :  { %2958 = vmatmul.mubr.msk.f32.vlgmr.msra.gmra.mrb[6].mxu1 %vm55_vm3, %v4122_v27  ;;  %vm918_vm3 = vcmask 785408  }
  0x94   :  { %v743_v59 = vpop.permute.xlu0 %742 }
  0xe0   :  { %v138_v40 = vpop.f32.mrb[0].mxu0 }
  0xe1   :  { %v140_v41 = vpop.f32.mrb[1].mxu0  ;;  %v209_v42 = vpop.f32.mrb[0].mxu1 }
  0xe2   :  { %v211_v43 = vpop.f32.mrb[1].mxu1 }
  0xe8   :  { %v309_v44 = vpop.f32.mrb[2].mxu0 }
  0xe9   :  { %v385_v45 = vmax.f32 %v138_v40, %v309_v44  ;;  %v380_v46 = vpop.f32.mrb[2].mxu1  ;;  %v311_v47 = vpop.f32.mrb[3].mxu0 }
  0xea   :  { %v387_v48 = vmax.f32 %v209_v42, %v380_v46  ;;  %v386_v49 = vmax.f32 %v140_v41, %v311_v47  ;;  %v382_v50 = vpop.f32.mrb[3].mxu1 }
  0xeb   :  { %v388_v51 = vmax.f32 %v211_v43, %v382_v50 }
  0xf0   :  { %v484_v16 = vpop.f32.mrb[4].mxu0 }
  0xf1   :  { %v560_v52 = vmax.f32 %v385_v45, %v484_v16  ;;  %v555_v53 = vpop.f32.mrb[4].mxu1  ;;  %v486_v54 = vpop.f32.mrb[5].mxu0 }
  0xf2   :  { %v562_v55 = vmax.f32 %v387_v48, %v555_v53  ;;  %v561_v56 = vmax.f32 %v386_v49, %v486_v54  ;;  %v557_v57 = vpop.f32.mrb[5].mxu1 }
  0xf3   :  { %v563_v27 = vmax.f32 %v388_v51, %v557_v57 }
  0xf8   :  { %v659_v58 = vpop.f32.mrb[6].mxu0 }
  0xf9   :  { %v735_v60 = vmax.f32 %v560_v52, %v659_v58  ;;  %v730_v61 = vpop.f32.mrb[6].mxu1  ;;  %v661_v62 = vpop.f32.mrb[7].mxu0 }
  0xfa   :  { %v737_v63 = vmax.f32 %v562_v55, %v730_v61  ;;  %v736_v0 = vmax.f32 %v561_v56, %v661_v62  ;;  %v732_v1 = vpop.f32.mrb[7].mxu1 }
  0xfb   :  { %v738_v2 = vmax.f32 %v563_v27, %v732_v1  ;;  %v745_v4 = vadd.f32 %v743_v59, %v735_v60 }
  0xfc   :  { %v746_v5 = vadd.f32 %v743_v59, %v736_v0  ;;  %v747_v6 = vadd.f32 %v743_v59, %v737_v63 }
  0xfd   :  { %v4323_v7 = vmax.f32 %v745_v4, 0.0  ;;  %v748_v10 = vadd.f32 %v743_v59, %v738_v2 }
  0xfe   :  { %v4328_v8 = vmax.f32 %v746_v5, 0.0  ;;  %v4330_v9 = vmax.f32 %v747_v6, 0.0 }
  0xff   :  { %780 = vrot.lane.b32.xlu0 %v4323_v7, %s3971_s0  ;;  %756 = vrot.lane.b32.xlu1 %v4323_v7, %s3972_s29  ;;  %v752_v12 = vmax.f32 %v748_v10, 0.0 }
 0x100   :  { %v3405_v11 = vpack.i.bf16 %v4330_v9, %v4328_v8 }
 0x101   :  { %v3425_v13 = vpack.i.bf16 %v4323_v7, %v752_v12 }
 0x103   :  { %844 = vrot.lane.b32.xlu0 %v4330_v9, %s3973_s30  ;;  %768 = vrot.lane.b32.xlu1 %v4323_v7, %s3974_s12 }
 0x107   :  { %3406 = vrot.lane.b32.xlu1 %v3405_v11, %s3974_s12  ;;  %3401 = vrot.lane.b32.xlu0 %v3405_v11, %s3972_s29 }
 0x10b   :  { %3416 = vrot.lane.b32.xlu1 %v3405_v11, %s3975_s13  ;;  %3411 = vrot.lane.b32.xlu0 %v3405_v11, %s3971_s0 }
 0x10f   :  { %3426 = vrot.lane.b32.xlu1 %v3425_v13, %s3976_s14  ;;  %3421 = vrot.lane.b32.xlu0 %v3405_v11, %s3976_s14 }
 0x113   :  { %3436 = vrot.lane.b32.xlu1 %v3405_v11, %s3977_s15  ;;  %3431 = vrot.lane.b32.xlu0 %v3425_v13, %s3975_s13 }
 0x117   :  { %3446 = vrot.lane.b32.xlu1 %v3425_v13, %s3977_s15  ;;  %3441 = vrot.lane.b32.xlu0 %v3405_v11, %s3978_s16 }
 0x11b   :  { %864 = vrot.lane.b32.xlu1 %v4323_v7, %s3979_s17  ;;  %3451 = vrot.lane.b32.xlu0 %v3425_v13, %s3978_s16 }
 0x11f   :  { %842 = vrot.lane.b32.xlu1 %v4328_v8, %s3973_s30  ;;  %840 = vrot.lane.b32.xlu0 %v4323_v7, %s3973_s30 }
 0x123   :  { %958 = vrot.lane.b32.xlu1 %v752_v12, %s3973_s30  ;;  %792 = vrot.lane.b32.xlu0 %v4323_v7, %s3980_s18 }
 0x127   :  { %888 = vrot.lane.b32.xlu1 %v4323_v7, %s3981_s19  ;;  %852 = vrot.lane.b32.xlu0 %v4323_v7, %s3982_s20 }
 0x12b   :  { %912 = vrot.lane.b32.xlu1 %v4323_v7, %s3983_s1  ;;  %876 = vrot.lane.b32.xlu0 %v4323_v7, %s3984_s21 }
 0x12f   :  { %3456 = vrot.lane.b32.xlu1 %v3405_v11, %s3980_s18  ;;  %900 = vrot.lane.b32.xlu0 %v4323_v7, %s3985_s2 }
 0x133   :  { %3461 = vrot.lane.b32.xlu1 %v3405_v11, %s3982_s20  ;;  %924 = vrot.lane.b32.xlu0 %v4323_v7, %s3986_s22 }
 0x137   :  { %3466 = vrot.lane.b32.xlu1 %v3405_v11, %s3979_s17  ;;  %3471 = vrot.lane.b32.xlu0 %v3405_v11, %s3984_s21 }
 0x13b   :  { %3476 = vrot.lane.b32.xlu1 %v3405_v11, %s3981_s19  ;;  %3481 = vrot.lane.b32.xlu0 %v3405_v11, %s3985_s2  ;;  %s3993_s2 = smov 70  }
 0x13f   :  { %3486 = vrot.lane.b32.xlu1 %v3405_v11, %s3983_s1  ;;  %3491 = vrot.lane.b32.xlu0 %v3405_v11, %s3986_s22  ;;  %s3994_s22 = smov 122  }
 0x143   :  { %3496 = vrot.lane.b32.xlu1 %v3405_v11, %s3987_s23 }
 0x171   :  { %v781_v14 = vpop.permute.xlu0 %780  ;;  %v757_v15 = vpop.permute.xlu1 %756 }
 0x175   :  { %v4363_v17 = vpop.permute.xlu0 %844  ;;  %v769_v18 = vpop.permute.xlu1 %768 }
 0x179   :  { %v3407_v19 = vpop.permute.xlu1 %3406  ;;  %v3402_v20 = vpop.permute.xlu0 %3401 }
 0x17a   :  { %v4365_v21 = vunpack.i.h.bf16 %v3407_v19  ;;  %v3408_v22 = vunpack.i.l.bf16 %v3407_v19  ;;  %v4367_v23 = vunpack.i.h.bf16 %v3402_v20  ;;  %v3403_v24 = vunpack.i.l.bf16 %v3402_v20 }
 0x17c   :  { %v764_v25 = vsel %vm762_vm4, %v3403_v24, %v4367_v23  ;;  %v763_v26 = vsel %vm762_vm4, %v757_v15, %v3403_v24  ;;  %v776_v36 = vsel %vm774_vm5, %v3408_v22, %v4365_v21  ;;  %v775_v37 = vsel %vm774_vm5, %v769_v18, %v3408_v22 }
 0x17d   :  { %v3417_v28 = vpop.permute.xlu1 %3416  ;;  %v3412_v29 = vpop.permute.xlu0 %3411  ;;  %v3500_v30 = vpack.i.bf16 %v4367_v23, %v764_v25  ;;  %v3073_v31 = vpack.c.bf16 %v764_v25, %v4328_v8  ;;  %v3505_v32 = vpack.i.bf16 %v763_v26, %v4323_v7  ;;  %v3075_v33 = vpack.c.bf16 %v763_v26, %v4323_v7 }
 0x17e   :  { %v4376_v34 = vunpack.i.h.bf16 %v3412_v29  ;;  %v3413_v35 = vunpack.i.l.bf16 %v3412_v29  ;;  %v3510_v42 = vpack.i.bf16 %v4365_v21, %v776_v36  ;;  %v4388_v49 = vunpack.i.h.bf16 %v3417_v28 }
 0x17f   :  { %3501 = vrot.lane.b32.xlu0 %v3500_v30, %s3987_s23  ;;  %3074 = vmatprep.subr.bf16.mxu1 %v3073_v31  ;;  %v3418_v50 = vunpack.i.l.bf16 %v3417_v28 }
 0x180   :  { %3506 = vrot.lane.b32.xlu1 %v3505_v32, %s3987_s23  ;;  %3076 = vmatpush1.bf16.msra.mxu1 %v3075_v33  ;;  %v788_v38 = vsel %vm786_vm6, %v3413_v35, %v4376_v34  ;;  %v787_v39 = vsel %vm786_vm6, %v781_v14, %v3413_v35  ;;  %v3125_v16 = vpack.c.bf16 %v4376_v34, %v4365_v21  ;;  %v4434_v32 = vld [vmem:[%s5363_s3 + $0x8] sm:$0xff]  ;;  %vm930_vm6 = vcmask 703488  }
 0x181   :  { %v3427_v40 = vpop.permute.xlu1 %3426  ;;  %v3422_v41 = vpop.permute.xlu0 %3421  ;;  %v3515_v43 = vpack.i.bf16 %v4376_v34, %v788_v38  ;;  %v3077_v44 = vpack.c.bf16 %v788_v38, %v776_v36  ;;  %v3079_v45 = vpack.c.bf16 %v787_v39, %v775_v37  ;;  %v3520_v56 = vpack.i.bf16 %v787_v39, %v775_v37  ;;  %2959 = vmatprep.mubr.msk.f32.mxu1 %vm1077_vm11, %v4434_v32  ;;  %v1065_v38 = vld [vmem:[%s5364_s4] sm:$0xff] }
 0x182   :  { %v3428_v46 = vunpack.i.l.bf16 %v3427_v40  ;;  %v3424_v47 = vunpack.i.h.bf16 %v3422_v41  ;;  %v3423_v48 = vunpack.i.l.bf16 %v3422_v41  ;;  %v3429_v51 = vunpack.i.h.bf16 %v3427_v40 }
 0x183   :  { %3511 = vrot.lane.b32.xlu0 %v3510_v42, %s3987_s23  ;;  %3078 = vmatprep.subr.bf16.mxu1 %v3077_v44  ;;  %v4399_v59 = vsel %vm810_vm8, %v3418_v50, %v4388_v49 }
 0x184   :  { %3516 = vrot.lane.b32.xlu1 %v3515_v43, %s3987_s23  ;;  %3080 = vmatpush1.bf16.msra.mxu1 %v3079_v45  ;;  %v947_v52 = vsel %vm945_vm7, %v3423_v48, %v3424_v47  ;;  %v948_v53 = vsel %vm945_vm7, %v3424_v47, %v3428_v46  ;;  %v946_v60 = vsel %vm945_vm7, %v3429_v51, %v3423_v48  ;;  %vm1015_vm7 = vcmask 695296  }
 0x185   :  { %v3437_v54 = vpop.permute.xlu1 %3436  ;;  %v3432_v55 = vpop.permute.xlu0 %3431  ;;  %v3525_v57 = vpack.i.bf16 %v948_v53, %v947_v52 }
 0x186   :  { %v3434_v27 = vunpack.i.h.bf16 %v3432_v55  ;;  %v3433_v58 = vunpack.i.l.bf16 %v3432_v55  ;;  %v4402_v61 = vunpack.i.h.bf16 %v3437_v54  ;;  %v3438_v62 = vunpack.i.l.bf16 %v3437_v54 }
 0x187   :  { %3521 = vrot.lane.b32.xlu0 %v3520_v56, %s3987_s23 }
 0x188   :  { %3526 = vrot.lane.b32.xlu1 %v3525_v57, %s3987_s23  ;;  %v951_v63 = vsel %vm810_vm8, %v4388_v49, %v3433_v58  ;;  %v4408_v0 = vsel %vm810_vm8, %v3434_v27, %v3418_v50  ;;  %v4418_v11 = vsel %vm822_vm9, %v3438_v62, %v4402_v61 }
 0x189   :  { %v3447_v1 = vpop.permute.xlu1 %3446  ;;  %v3442_v2 = vpop.permute.xlu0 %3441  ;;  %v3530_v4 = vpack.i.bf16 %v951_v63, %v4399_v59  ;;  %v3535_v5 = vpack.i.bf16 %v4408_v0, %v946_v60 }
 0x18a   :  { %v3448_v6 = vunpack.i.l.bf16 %v3447_v1  ;;  %v4412_v7 = vunpack.i.h.bf16 %v3442_v2  ;;  %v3449_v8 = vunpack.i.h.bf16 %v3447_v1  ;;  %v3443_v10 = vunpack.i.l.bf16 %v3442_v2 }
 0x18b   :  { %3531 = vrot.lane.b32.xlu0 %v3530_v4, %s3987_s23 }
 0x18c   :  { %3536 = vrot.lane.b32.xlu1 %v3535_v5, %s3987_s23  ;;  %v954_v12 = vsel %vm822_vm9, %v4402_v61, %v3448_v6  ;;  %v3131_v13 = vpack.c.bf16 %v4412_v7, %v4402_v61  ;;  %v823_v22 = vsel %vm822_vm9, %v3449_v8, %v3438_v62  ;;  %v836_v25 = vsel %vm834_vm10, %v3443_v10, %v4412_v7 }
 0x18d   :  { %v4424_v14 = vpop.permute.xlu1 %864  ;;  %v3452_v15 = vpop.permute.xlu0 %3451  ;;  %v3540_v18 = vpack.i.bf16 %v954_v12, %v4418_v11  ;;  %v3085_v27 = vpack.c.bf16 %v836_v25, %v4418_v11 }
 0x18e   :  { %v3454_v19 = vunpack.i.h.bf16 %v3452_v15  ;;  %v3453_v20 = vunpack.i.l.bf16 %v3452_v15 }
 0x18f   :  { %3541 = vrot.lane.b32.xlu0 %v3540_v18, %s3987_s23 }
 0x190   :  { %v835_v24 = vsel %vm834_vm10, %v3454_v19, %v3443_v10  ;;  %v957_v26 = vsel %vm834_vm10, %v4412_v7, %v3453_v20  ;;  %vm1459_vm10 = vcmask 752640  }
 0x191   :  { %v843_v28 = vpop.permute.xlu1 %842  ;;  %v841_v29 = vpop.permute.xlu0 %840  ;;  %v3550_v30 = vpack.i.bf16 %v835_v24, %v823_v22  ;;  %v3545_v31 = vpack.i.bf16 %v957_v26, %v836_v25  ;;  %v3087_v58 = vpack.c.bf16 %v835_v24, %v823_v22 }
 0x192   :  { %v848_v37 = vsel %vm846_vm12, %v843_v28, %v4363_v17  ;;  %v847_v41 = vsel %vm846_vm12, %v841_v29, %v843_v28 }
 0x193   :  { %3551 = vrot.lane.b32.xlu0 %v3550_v30, %s3987_s23  ;;  %3546 = vrot.lane.b32.xlu1 %v3545_v31, %s3987_s23 }
 0x195   :  { %v959_v33 = vpop.permute.xlu1 %958  ;;  %v793_v35 = vpop.permute.xlu0 %792 }
 0x196   :  { %v960_v36 = vsel %vm846_vm12, %v4363_v17, %v959_v33  ;;  %vm1444_vm12 = vcmask 769024  }
 0x197   :  { %1013 = vrot.lane.b32.xlu0 %v960_v36, %s3987_s23  ;;  %1011 = vrot.lane.b32.xlu1 %v848_v37, %s3987_s23 }
 0x199   :  { %v4447_v39 = vpop.permute.xlu1 %888  ;;  %v853_v40 = vpop.permute.xlu0 %852 }
 0x19b   :  { %1069 = vperm.xlu0 %3399, %v1065_v38   ;;  %1009 = vrot.lane.b32.xlu1 %v847_v41, %s3987_s23  ;;  %s3995_s23 = smov 120  }
 0x19d   :  { %v4450_v42 = vpop.permute.xlu1 %912  ;;  %v877_v43 = vpop.permute.xlu0 %876 }
 0x1a1   :  { %v3457_v44 = vpop.permute.xlu1 %3456  ;;  %v4452_v45 = vpop.permute.xlu0 %900 }
 0x1a2   :  { %v3459_v46 = vunpack.i.h.bf16 %v3457_v44  ;;  %v3458_v47 = vunpack.i.l.bf16 %v3457_v44 }
 0x1a4   :  { %v799_v48 = vsel %vm798_vm13, %v793_v35, %v3458_v47  ;;  %v4456_v50 = vpack.c.bf16 %v4388_v49, %v3459_v46  ;;  %v800_v51 = vsel %vm798_vm13, %v3458_v47, %v3459_v46 }
 0x1a5   :  { %v4459_v52 = vpop.permute.xlu1 %3461  ;;  %v4461_v53 = vpop.permute.xlu0 %924  ;;  %v3081_v54 = vpack.c.bf16 %v4399_v59, %v800_v51  ;;  %v3083_v55 = vpack.c.bf16 %v4408_v0, %v799_v48 }
 0x1a6   :  { %v3464_v56 = vunpack.i.h.bf16 %v4459_v52  ;;  %v3463_v57 = vunpack.i.l.bf16 %v4459_v52 }
 0x1a7   :  { %3082 = vmatprep.subr.bf16.mxu1 %v3081_v54 }
 0x1a8   :  { %3084 = vmatpush1.bf16.msra.mxu1 %v3083_v55  ;;  %v860_v49 = vsel %vm858_vm14, %v3463_v57, %v3464_v56  ;;  %v859_v59 = vsel %vm858_vm14, %v853_v40, %v3463_v57  ;;  %vm1488_vm14 = vcmask 572416  }
 0x1a9   :  { %v3467_v60 = vpop.permute.xlu1 %3466  ;;  %v3472_v62 = vpop.permute.xlu0 %3471  ;;  %3086 = vmatprep.subr.bf16.mxu1 %v3085_v27  ;;  %v3089_v4 = vpack.c.bf16 %v860_v49, %v848_v37  ;;  %v3091_v15 = vpack.c.bf16 %v859_v59, %v847_v41 }
 0x1aa   :  { %v3469_v63 = vunpack.i.h.bf16 %v3467_v60  ;;  %v3468_v0 = vunpack.i.l.bf16 %v3467_v60  ;;  %v3474_v1 = vunpack.i.h.bf16 %v3472_v62  ;;  %v3473_v2 = vunpack.i.l.bf16 %v3472_v62 }
 0x1ac   :  { %v4470_v5 = vpack.c.bf16 %v3474_v1, %v3469_v63  ;;  %3088 = vmatpush1.bf16.msra.mxu1 %v3087_v58  ;;  %v872_v6 = vsel %vm870_vm15, %v3468_v0, %v3469_v63  ;;  %v884_v8 = vsel %vm882_vm0, %v3473_v2, %v3474_v1  ;;  %v871_v10 = vsel %vm870_vm15, %v4424_v14, %v3468_v0 }
 0x1ad   :  { %v3477_v11 = vpop.permute.xlu1 %3476  ;;  %v3482_v12 = vpop.permute.xlu0 %3481  ;;  %3090 = vmatprep.subr.bf16.mxu1 %v3089_v4  ;;  %v883_v18 = vsel %vm882_vm0, %v877_v43, %v3473_v2  ;;  %v3093_v25 = vpack.c.bf16 %v884_v8, %v872_v6  ;;  %vm1530_vm0 = vcmask 539648  }
 0x1ae   :  { %v3479_v19 = vunpack.i.h.bf16 %v3477_v11  ;;  %v3478_v20 = vunpack.i.l.bf16 %v3477_v11  ;;  %v3484_v22 = vunpack.i.h.bf16 %v3482_v12  ;;  %v3483_v24 = vunpack.i.l.bf16 %v3482_v12 }
 0x1af   :  { %v3095_v31 = vpack.c.bf16 %v883_v18, %v871_v10 }
 0x1b0   :  { %v4477_v26 = vpack.c.bf16 %v3484_v22, %v3479_v19  ;;  %3092 = vmatpush1.bf16.msra.mxu1 %v3091_v15  ;;  %v896_v28 = vsel %vm894_vm1, %v3478_v20, %v3479_v19  ;;  %v908_v29 = vsel %vm906_vm2, %v3483_v24, %v3484_v22  ;;  %v895_v38 = vsel %vm894_vm1, %v4447_v39, %v3478_v20 }
 0x1b1   :  { %v3487_v14 = vpop.permute.xlu1 %3486  ;;  %v3492_v30 = vpop.permute.xlu0 %3491  ;;  %3094 = vmatprep.subr.bf16.mxu1 %v3093_v25  ;;  %v3097_v40 = vpack.c.bf16 %v908_v29, %v896_v28  ;;  %v907_v41 = vsel %vm906_vm2, %v4452_v45, %v3483_v24  ;;  %v1066_v45 = vld [vmem:[%s5364_s4 + $0x8] sm:$0xff]  ;;  %vm1551_vm2 = vcmask 523264  }
 0x1b2   :  { %v3489_v33 = vunpack.i.h.bf16 %v3487_v14  ;;  %v3488_v35 = vunpack.i.l.bf16 %v3487_v14  ;;  %v3494_v36 = vunpack.i.h.bf16 %v3492_v30  ;;  %v3493_v37 = vunpack.i.l.bf16 %v3492_v30  ;;  %1074 = vperm.xlu1 %3555, %v1066_v45  }
 0x1b3   :  { %v3099_v47 = vpack.c.bf16 %v907_v41, %v895_v38 }
 0x1b4   :  { %v4485_v43 = vpack.c.bf16 %v3494_v36, %v3489_v33  ;;  %3096 = vmatpush1.bf16.msra.mxu1 %v3095_v31  ;;  %v920_v44 = vsel %vm918_vm3, %v3488_v35, %v3489_v33  ;;  %v932_v46 = vsel %vm930_vm6, %v3493_v37, %v3494_v36  ;;  %v919_v48 = vsel %vm918_vm3, %v4450_v42, %v3488_v35 }
 0x1b5   :  { %3098 = vmatprep.subr.bf16.mxu1 %v3097_v40  ;;  %v3101_v51 = vpack.c.bf16 %v932_v46, %v920_v44  ;;  %v931_v39 = vsel %vm930_vm6, %v4461_v53, %v3493_v37  ;;  %v4496_v55 = vpop.permute.xlu1 %3496  ;;  %vm2869_vm6 = vcmask 1024  }
 0x1b6   :  { %v3103_v54 = vpack.c.bf16 %v931_v39, %v919_v48  ;;  %v3499_v57 = vunpack.i.h.bf16 %v4496_v55  ;;  %v3498_v27 = vunpack.i.l.bf16 %v4496_v55 }
 0x1b8   :  { %3100 = vmatpush1.bf16.msra.mxu1 %v3099_v47  ;;  %v1017_v59 = vsel %vm1015_vm7, %v3498_v27, %v3499_v57 }
 0x1b9   :  { %3102 = vmatprep.subr.bf16.mxu1 %v3101_v51 }
 0x1bc   :  { %3104 = vmatpush1.bf16.msra.mxu1 %v3103_v54 }
 0x1f1   :  { %v4500_v42 = vpop.permute.xlu0 %3501 }
 0x1f2   :  { %v3504_v53 = vunpack.i.h.bf16 %v4500_v42  ;;  %v3503_v49 = vunpack.i.l.bf16 %v4500_v42  ;;  %v3507_v58 = vpop.permute.xlu1 %3506 }
 0x1f3   :  { %v3509_v60 = vunpack.i.h.bf16 %v3507_v58  ;;  %v3508_v62 = vunpack.i.l.bf16 %v3507_v58 }
 0x1f4   :  { %v1019_v63 = vsel %vm1015_vm7, %v3503_v49, %v3504_v53  ;;  %v3146_v21 = vpack.c.bf16 %v3504_v53, %v3499_v57 }
 0x1f5   :  { %v1018_v0 = vsel %vm1015_vm7, %v3509_v60, %v3503_v49  ;;  %v1016_v1 = vsel %vm1015_vm7, %v3508_v62, %v3498_v27  ;;  %v4512_v2 = vpop.permute.xlu0 %3511  ;;  %v3105_v4 = vpack.c.bf16 %v1019_v63, %v1017_v59 }
 0x1f6   :  { %v3514_v6 = vunpack.i.h.bf16 %v4512_v2  ;;  %v3513_v8 = vunpack.i.l.bf16 %v4512_v2  ;;  %v4516_v10 = vpop.permute.xlu1 %3516  ;;  %v3107_v11 = vpack.c.bf16 %v1018_v0, %v1016_v1 }
 0x1f7   :  { %v3519_v12 = vunpack.i.h.bf16 %v4516_v10  ;;  %v3518_v15 = vunpack.i.l.bf16 %v4516_v10  ;;  %3106 = vmatprep.subr.bf16.mxu1 %v3105_v4 }
 0x1f8   :  { %3108 = vmatpush1.bf16.msra.mxu1 %v3107_v11  ;;  %v1021_v18 = vsel %vm1015_vm7, %v3513_v8, %v3514_v6 }
 0x1f9   :  { %v3522_v19 = vpop.permute.xlu0 %3521  ;;  %v1023_v20 = vsel %vm1015_vm7, %v3518_v15, %v3519_v12 }
 0x1fa   :  { %v3524_v22 = vunpack.i.h.bf16 %v3522_v19  ;;  %v3523_v24 = vunpack.i.l.bf16 %v3522_v19  ;;  %v4526_v25 = vpop.permute.xlu1 %3526  ;;  %v3109_v28 = vpack.c.bf16 %v1023_v20, %v1021_v18 }
 0x1fb   :  { %v3529_v30 = vunpack.i.h.bf16 %v4526_v25  ;;  %v3528_v31 = vunpack.i.l.bf16 %v4526_v25 }
 0x1fc   :  { %v1020_v29 = vsel %vm1015_vm7, %v3523_v24, %v3513_v8  ;;  %v1022_v14 = vsel %vm1015_vm7, %v3524_v22, %v3518_v15  ;;  %3110 = vmatprep.subr.bf16.mxu1 %v3109_v28  ;;  %v1061_v28 = vld [vmem:[%s5363_s3] sm:$0xff] }
 0x1fd   :  { %v4532_v33 = vpop.permute.xlu0 %3531  ;;  %v3111_v35 = vpack.c.bf16 %v1022_v14, %v1020_v29  ;;  %v1025_v44 = vsel %vm1015_vm7, %v3528_v31, %v3529_v30  ;;  %v1064_v29 = vld [vmem:[%s5363_s3 + $0x18] sm:$0xff]  ;;  %v3122_v14 = vpack.c.bf16 %v4367_v23, %v4330_v9  ;;  %v3134_v9 = vpack.c.bf16 %v3464_v56, %v4363_v17 }
 0x1fe   :  { %v3534_v36 = vunpack.i.h.bf16 %v4532_v33  ;;  %v3533_v37 = vunpack.i.l.bf16 %v4532_v33  ;;  %v3537_v38 = vpop.permute.xlu1 %3536  ;;  %v3149_v17 = vpack.c.bf16 %v3519_v12, %v3514_v6 }
 0x1ff   :  { %v3539_v40 = vunpack.i.h.bf16 %v3537_v38  ;;  %v3538_v41 = vunpack.i.l.bf16 %v3537_v38  ;;  %3112 = vmatpush1.bf16.msra.mxu1 %v3111_v35  ;;  %v1063_v35 = vld [vmem:[%s5363_s3 + $0x10] sm:$0xff]  ;;  %s3989_s3 = smov 68  }
 0x200   :  { %v1027_v46 = vsel %vm1015_vm7, %v3533_v37, %v3534_v36  ;;  %v3152_v23 = vpack.c.bf16 %v3534_v36, %v3529_v30 }
 0x201   :  { %v1026_v47 = vsel %vm1015_vm7, %v3539_v40, %v3533_v37  ;;  %v1024_v48 = vsel %vm1015_vm7, %v3538_v41, %v3528_v31  ;;  %v4544_v51 = vpop.permute.xlu0 %3541  ;;  %v3113_v39 = vpack.c.bf16 %v1027_v46, %v1025_v44  ;;  %v3988_v31 = vmov 0.0|0.0  }
 0x202   :  { %v3115_v54 = vpack.c.bf16 %v1026_v47, %v1024_v48  ;;  %v3544_v45 = vunpack.i.h.bf16 %v4544_v51  ;;  %v3543_v27 = vunpack.i.l.bf16 %v4544_v51 }
 0x203   :  { %3114 = vmatprep.subr.bf16.mxu1 %v3113_v39 }
 0x204   :  { %3116 = vmatpush1.bf16.msra.mxu1 %v3115_v54  ;;  %v1029_v4 = vsel %vm1015_vm7, %v3543_v27, %v3544_v45 }
 0x205   :  { %v3552_v49 = vpop.permute.xlu0 %3551  ;;  %v3547_v58 = vpop.permute.xlu1 %3546 }
 0x206   :  { %v3554_v60 = vunpack.i.h.bf16 %v3552_v49  ;;  %v3553_v62 = vunpack.i.l.bf16 %v3552_v49  ;;  %v3549_v59 = vunpack.i.h.bf16 %v3547_v58  ;;  %v3548_v63 = vunpack.i.l.bf16 %v3547_v58 }
 0x208   :  { %v1028_v0 = vsel %vm1015_vm7, %v3553_v62, %v3543_v27  ;;  %v1030_v1 = vsel %vm1015_vm7, %v3554_v60, %v3548_v63  ;;  %v1031_v8 = vsel %vm1015_vm7, %v3548_v63, %v3549_v59  ;;  %v3155_v34 = vpack.c.bf16 %v3549_v59, %v3544_v45 }
 0x209   :  { %v1014_v11 = vpop.permute.xlu0 %1013  ;;  %v1012_v15 = vpop.permute.xlu1 %1011  ;;  %v3117_v18 = vpack.c.bf16 %v1031_v8, %v1029_v4  ;;  %v3119_v19 = vpack.c.bf16 %v1030_v1, %v1028_v0 }
 0x20a   :  { %v1033_v20 = vsel %vm1015_vm7, %v1012_v15, %v1014_v11 }
 0x20b   :  { %3118 = vmatprep.subr.bf16.mxu1 %v3117_v18 }
 0x20c   :  { %3120 = vmatpush1.bf16.msra.mxu1 %v3119_v19 }
 0x20d   :  { %v1010_v22 = vpop.permute.xlu1 %1009  ;;  %1132 = vmatprep.subr.mxu1 %v1033_v20 }
 0x20e   :  { %v1032_v24 = vsel %vm1015_vm7, %v1010_v22, %v1012_v15  ;;  %vm2867_vm7 = vcmask 7168  }
 0x210   :  { %1133 = vmatpush1.msra.mxu1 %v1032_v24 }
 0x211   :  { %1149 = vmatmul.mubr.f32.vlgmr.msra.gmra.mrb[8].mxu1 %v1061_v28  ;;  %3121 = vmatprep.subr.bf16.mxu1 %v3988_v31 }
 0x212   :  { %3123 = vmatpush1.bf16.msra.mxu1 %v3122_v14  ;;  %2960 = vmatprep.mubr.msk.f32.mxu1 %vm1077_vm11, %v1064_v29 }
 0x213   :  { %3124 = vmatprep.subr.bf16.mxu1 %v3988_v31 }
 0x215   :  { %1155 = vmatmul.mubr.f32.gmra.mrb[10].mxu1 %v1063_v35 }
 0x216   :  { %3126 = vmatpush1.bf16.msra.mxu1 %v3125_v16  ;;  %2961 = vmatprep.mubr.msk.f32.mxu1 %vm1077_vm11, %v4434_v32 }
 0x217   :  { %3127 = vmatprep.subr.bf16.mxu1 %v3988_v31 }
 0x21a   :  { %3129 = vmatpush1.bf16.msra.mxu1 %v4456_v50  ;;  %v1070_v16 = vpop.permute.xlu0 %1069 }
 0x21b   :  { %3130 = vmatprep.subr.bf16.mxu1 %v3988_v31 }
 0x21e   :  { %3132 = vmatpush1.bf16.msra.mxu1 %v3131_v13 }
 0x21f   :  { %3133 = vmatprep.subr.bf16.mxu1 %v3988_v31 }
 0x222   :  { %3135 = vmatpush1.bf16.msra.mxu1 %v3134_v9 }
 0x223   :  { %3136 = vmatprep.subr.bf16.mxu1 %v3988_v31 }
 0x226   :  { %3138 = vmatpush1.bf16.msra.mxu1 %v4470_v5 }
 0x227   :  { %3139 = vmatprep.subr.bf16.mxu1 %v3988_v31 }
 0x22a   :  { %3141 = vmatpush1.bf16.msra.mxu1 %v4477_v26 }
 0x22b   :  { %3142 = vmatprep.subr.bf16.mxu1 %v3988_v31 }
 0x22e   :  { %3144 = vmatpush1.bf16.msra.mxu1 %v4485_v43 }
 0x22f   :  { %3145 = vmatprep.subr.bf16.mxu1 %v3988_v31 }
 0x231   :  { %v1075_v43 = vpop.permute.xlu1 %1074 }
 0x232   :  { %3147 = vmatpush1.bf16.msra.mxu1 %v3146_v21 }
 0x233   :  { %3148 = vmatprep.subr.bf16.mxu1 %v3988_v31 }
 0x236   :  { %3150 = vmatpush1.bf16.msra.mxu1 %v3149_v17 }
 0x237   :  { %3151 = vmatprep.subr.bf16.mxu1 %v3988_v31 }
 0x23a   :  { %3153 = vmatpush1.bf16.msra.mxu1 %v3152_v23 }
 0x23b   :  { %3154 = vmatprep.subr.bf16.mxu1 %v3988_v31 }
 0x23e   :  { %3156 = vmatpush1.bf16.msra.mxu1 %v3155_v34 }
 0x23f   :  { %1209 = vmatprep.subr.mxu1 %v3968_v3 }
 0x242   :  { %1210 = vmatpush1.msra.mxu1 %v1014_v11 }
 0x243   :  { %1226 = vmatmul.mubr.f32.vlgmr.msra.gmra.mrb[12].mxu1 %v1061_v28 }
 0x244   :  { %2962 = vmatprep.mubr.msk.f32.mxu1 %vm1077_vm11, %v1064_v29 }
 0x247   :  { %1231 = vmatmul.mubr.f32.gmra.mrb[14].mxu1 %v1063_v35 }
 0x248   :  { %2531 = vmatprep.mubr.f32.mxu1 %v3968_v3 }
 0x2e4   :  { %v1150_v61 = vpop.f32.mrb[8].mxu1 }
 0x2e5   :  { %v1151_v7 = vadd.f32 %v1150_v61, %v1070_v16  ;;  %v1152_v13 = vpop.f32.mrb[9].mxu1 }
 0x2e6   :  { %v1153_v32 = vadd.f32 %v1152_v13, %v1070_v16 }
 0x2e7   :  { %v1236_v50 = vmax.f32 %v1151_v7, 0.0 }
 0x2e8   :  { %v1237_v52 = vmax.f32 %v1153_v32, 0.0  ;;  %v1156_v56 = vpop.f32.mrb[10].mxu1 }
 0x2e9   :  { %v1158_v5 = vpop.f32.mrb[11].mxu1  ;;  %v1157_v55 = vadd.f32 %v1156_v56, %v1075_v43 }
 0x2ea   :  { %v3561_v26 = vpack.i.bf16 %v1237_v52, %v1236_v50  ;;  %v1159_v6 = vadd.f32 %v1158_v5, %v1075_v43 }
 0x2eb   :  { %v1239_v2 = vmax.f32 %v1157_v55, 0.0 }
 0x2ec   :  { %3562 = vrot.lane.b32.xlu1 %v3561_v26, %s3975_s13  ;;  %3557 = vrot.lane.b32.xlu0 %v3561_v26, %s3972_s29  ;;  %v1240_v36 = vmax.f32 %v1159_v6, 0.0 }
 0x2f0   :  { %3567 = vrot.lane.b32.xlu0 %v3561_v26, %s3977_s15 }
 0x316   :  { %v1227_v57 = vpop.f32.mrb[12].mxu1 }
 0x317   :  { %v4599_v42 = vadd.f32 %v1227_v57, %v1070_v16  ;;  %v1229_v53 = vpop.f32.mrb[13].mxu1 }
 0x319   :  { %v1238_v10 = vmax.f32 %v4599_v42, 0.0 }
 0x31a   :  { %v1232_v12 = vpop.f32.mrb[14].mxu1 }
 0x31b   :  { %v1233_v25 = vadd.f32 %v1232_v12, %v1075_v43  ;;  %v1234_v30 = vpop.f32.mrb[15].mxu1  ;;  %v3571_v33 = vpack.i.bf16 %v1239_v2, %v1238_v10 }
 0x31d   :  { %v1241_v37 = vmax.f32 %v1233_v25, 0.0  ;;  %3572 = vrot.lane.b32.xlu1 %v3571_v33, %s3972_s29  ;;  %3577 = vrot.lane.b32.xlu0 %v3571_v33, %s3975_s13 }
 0x31f   :  { %v3586_v38 = vpack.i.bf16 %v1241_v37, %v1240_v36 }
 0x321   :  { %3587 = vrot.lane.b32.xlu1 %v3586_v38, %s3975_s13  ;;  %3582 = vrot.lane.b32.xlu0 %v3586_v38, %s3972_s29  ;;  %s3990_s29 = smov 102   ;;  %s3991_s13 = smov 66  }
 0x325   :  { %3592 = vrot.lane.b32.xlu1 %v3571_v33, %s3977_s15  ;;  %3597 = vrot.lane.b32.xlu0 %v3586_v38, %s3977_s15  ;;  %s3992_s15 = smov 92  }
 0x35e   :  { %v3558_v40 = vpop.permute.xlu0 %3557  ;;  %v3563_v46 = vpop.permute.xlu1 %3562 }
 0x35f   :  { %v3560_v41 = vunpack.i.h.bf16 %v3558_v40  ;;  %v3559_v44 = vunpack.i.l.bf16 %v3558_v40  ;;  %v3565_v54 = vunpack.i.h.bf16 %v3563_v46  ;;  %v3564_v45 = vunpack.i.l.bf16 %v3563_v46 }
 0x361   :  { %v1260_v48 = vsel %vm762_vm4, %v3559_v44, %v3560_v41  ;;  %v1288_v4 = vsel %vm810_vm8, %v3564_v45, %v3565_v54  ;;  %v1822_v44 = vld [vmem:[%s5365_s5 + $0x8] sm:$0xff] }
 0x362   :  { %v3568_v47 = vpop.permute.xlu0 %3567  ;;  %v1270_v49 = vmax.f32 %v1236_v50, %v1260_v48  ;;  %2081 = vmatprep.mubr.f32.mxu0 %v1822_v44 }
 0x363   :  { %v3570_v58 = vunpack.i.h.bf16 %v3568_v47  ;;  %v3569_v60 = vunpack.i.l.bf16 %v3568_v47 }
 0x364   :  { %v1298_v20 = vmax.f32 %v1270_v49, %v1288_v4 }
 0x365   :  { %v1316_v22 = vsel %vm822_vm9, %v3569_v60, %v3570_v58 }
 0x366   :  { %v1326_v43 = vmax.f32 %v1298_v20, %v1316_v22 }
 0x38f   :  { %v3573_v51 = vpop.permute.xlu1 %3572  ;;  %v3578_v39 = vpop.permute.xlu0 %3577 }
 0x390   :  { %v3574_v27 = vunpack.i.l.bf16 %v3573_v51  ;;  %v3579_v59 = vunpack.i.l.bf16 %v3578_v39  ;;  %v3575_v11 = vunpack.i.h.bf16 %v3573_v51  ;;  %v3580_v28 = vunpack.i.h.bf16 %v3578_v39 }
 0x392   :  { %v1261_v62 = vsel %vm762_vm4, %v3560_v41, %v3574_v27  ;;  %v1289_v24 = vsel %vm810_vm8, %v3565_v54, %v3579_v59 }
 0x393   :  { %v1271_v63 = vmax.f32 %v1237_v52, %v1261_v62  ;;  %v3588_v0 = vpop.permute.xlu1 %3587  ;;  %v3583_v1 = vpop.permute.xlu0 %3582 }
 0x394   :  { %v3585_v8 = vunpack.i.h.bf16 %v3583_v1  ;;  %v3590_v15 = vunpack.i.h.bf16 %v3588_v0  ;;  %v3589_v18 = vunpack.i.l.bf16 %v3588_v0  ;;  %v3584_v19 = vunpack.i.l.bf16 %v3583_v1 }
 0x395   :  { %v1299_v29 = vmax.f32 %v1271_v63, %v1289_v24 }
 0x396   :  { %v1262_v14 = vsel %vm762_vm4, %v3575_v11, %v3584_v19  ;;  %v1263_v31 = vsel %vm762_vm4, %v3584_v19, %v3585_v8  ;;  %v1290_v16 = vsel %vm810_vm8, %v3580_v28, %v3589_v18  ;;  %v1291_v61 = vsel %vm810_vm8, %v3589_v18, %v3590_v15 }
 0x397   :  { %v3593_v35 = vpop.permute.xlu1 %3592  ;;  %v3598_v9 = vpop.permute.xlu0 %3597  ;;  %v1273_v21 = vmax.f32 %v1239_v2, %v1262_v14  ;;  %v1274_v17 = vmax.f32 %v1240_v36, %v1263_v31  ;;  %v1275_v55 = vmax.f32 %v1241_v37, %v3585_v8  ;;  %v1272_v2 = vmax.f32 %v1238_v10, %v3574_v27 }
 0x398   :  { %v3595_v23 = vunpack.i.h.bf16 %v3593_v35  ;;  %v3594_v34 = vunpack.i.l.bf16 %v3593_v35  ;;  %v3600_v7 = vunpack.i.h.bf16 %v3598_v9  ;;  %v3599_v13 = vunpack.i.l.bf16 %v3598_v9 }
 0x399   :  { %v1301_v50 = vmax.f32 %v1273_v21, %v1290_v16  ;;  %v1302_v52 = vmax.f32 %v1274_v17, %v1291_v61  ;;  %v1303_v30 = vmax.f32 %v1275_v55, %v3590_v15  ;;  %v1300_v33 = vmax.f32 %v1272_v2, %v3579_v59 }
 0x39a   :  { %v1317_v32 = vsel %vm822_vm9, %v3570_v58, %v3594_v34  ;;  %v1318_v5 = vsel %vm822_vm9, %v3595_v23, %v3599_v13  ;;  %v1319_v26 = vsel %vm822_vm9, %v3599_v13, %v3600_v7  ;;  %vm1611_vm4 = vcmask 834560  }
 0x39b   :  { %v1327_v56 = vmax.f32 %v1299_v29, %v1317_v32  ;;  %v1329_v57 = vmax.f32 %v1301_v50, %v1318_v5  ;;  %v1330_v53 = vmax.f32 %v1302_v52, %v1319_v26  ;;  %v1328_v37 = vmax.f32 %v1300_v33, %v3594_v34 }
 0x39c   :  { %v1331_v42 = vmax.f32 %v1303_v30, %v3600_v7  ;;  %vm1372_vm8 = vcmask 998400   ;;  %vm1387_vm9 = vcmask 982016  }
 0x39d   :  { %v3157_v6 = vpack.c.bf16 %v1330_v53, %v1327_v56  ;;  %v4624_v12 = vpack.i.bf16 %v1329_v57, %v1326_v43  ;;  %v3159_v25 = vpack.c.bf16 %v1329_v57, %v1326_v43  ;;  %v3656_v36 = vpack.i.bf16 %v1327_v56, %v1326_v43 }
 0x39e   :  { %v3761_v10 = vpack.i.bf16 %v1330_v53, %v1329_v57  ;;  %v3786_v38 = vpack.i.bf16 %v1328_v37, %v1327_v56  ;;  %v3811_v40 = vpack.i.bf16 %v1331_v42, %v1330_v53  ;;  %v3816_v41 = vpack.i.bf16 %v1331_v42, %v1328_v37 }
 0x39f   :  { %3158 = vmatprep.subr.bf16.mxu0 %v3157_v6  ;;  %3607 = vrot.lane.b32.xlu1 %v4624_v12, %s3989_s3 }
 0x3a0   :  { %3602 = vrot.lane.b32.xlu0 %v4624_v12, %s3990_s29  ;;  %3160 = vmatpush1.bf16.msra.mxu0 %v3159_v25 }
 0x3a3   :  { %3612 = vrot.lane.b32.xlu1 %v4624_v12, %s3991_s13 }
 0x3a4   :  { %3657 = vrot.lane.b32.xlu0 %v3656_v36, %s3992_s15 }
 0x3a7   :  { %3617 = vrot.lane.b32.xlu1 %v3656_v36, %s3974_s12 }
 0x3a8   :  { %3667 = vrot.lane.b32.xlu0 %v3656_v36, %s3993_s2 }
 0x3ab   :  { %3622 = vrot.lane.b32.xlu1 %v3656_v36, %s3980_s18 }
 0x3ac   :  { %3672 = vrot.lane.b32.xlu0 %v3786_v38, %s3990_s29 }
 0x3af   :  { %3627 = vrot.lane.b32.xlu1 %v3656_v36, %s3994_s22 }
 0x3b0   :  { %3692 = vrot.lane.b32.xlu0 %v3816_v41, %s3980_s18 }
 0x3b3   :  { %3632 = vrot.lane.b32.xlu1 %v3656_v36, %s3995_s23 }
 0x3b4   :  { %3702 = vrot.lane.b32.xlu0 %v3816_v41, %s3979_s17 }
 0x3b7   :  { %3637 = vrot.lane.b32.xlu1 %v3656_v36, %s3979_s17 }
 0x3b8   :  { %3707 = vrot.lane.b32.xlu0 %v3816_v41, %s3981_s19 }
 0x3bb   :  { %3642 = vrot.lane.b32.xlu1 %v3656_v36, %s3981_s19 }
 0x3bc   :  { %3712 = vrot.lane.b32.xlu0 %v3761_v10, %s3974_s12 }
 0x3bf   :  { %3647 = vrot.lane.b32.xlu1 %v3656_v36, %s3983_s1 }
 0x3c0   :  { %3717 = vrot.lane.b32.xlu0 %v3761_v10, %s3980_s18 }
 0x3c3   :  { %3652 = vrot.lane.b32.xlu1 %v3656_v36, %s3996_s24 }
 0x3c4   :  { %3722 = vrot.lane.b32.xlu0 %v3761_v10, %s3994_s22 }
 0x3c7   :  { %3662 = vrot.lane.b32.xlu1 %v3656_v36, %s3997_s25 }
 0x3c8   :  { %3727 = vrot.lane.b32.xlu0 %v3761_v10, %s3995_s23 }
 0x3cb   :  { %3677 = vrot.lane.b32.xlu1 %v3786_v38, %s3989_s3 }
 0x3cc   :  { %3732 = vrot.lane.b32.xlu0 %v3761_v10, %s3979_s17  ;;  %s3998_s17 = smov 64  }
 0x3cf   :  { %3682 = vrot.lane.b32.xlu1 %v3786_v38, %s3991_s13 }
 0x3d0   :  { %3737 = vrot.lane.b32.xlu0 %v3761_v10, %s3981_s19 }
 0x3d3   :  { %3687 = vrot.lane.b32.xlu1 %v3816_v41, %s3974_s12  ;;  %s3999_s12 = smov 44  }
 0x3d4   :  { %3742 = vrot.lane.b32.xlu0 %v3761_v10, %s3983_s1 }
 0x3d7   :  { %3697 = vrot.lane.b32.xlu1 %v3816_v41, %s3994_s22 }
 0x3d8   :  { %3747 = vrot.lane.b32.xlu0 %v3761_v10, %s3996_s24 }
 0x3db   :  { %3752 = vrot.lane.b32.xlu1 %v3761_v10, %s3992_s15 }
 0x3dc   :  { %3757 = vrot.lane.b32.xlu0 %v3761_v10, %s3997_s25 }
 0x3df   :  { %3762 = vrot.lane.b32.xlu1 %v3761_v10, %s3993_s2 }
 0x3e0   :  { %3782 = vrot.lane.b32.xlu0 %v3816_v41, %s3983_s1  ;;  %s4000_s1 = smov 42  }
 0x3e3   :  { %3767 = vrot.lane.b32.xlu1 %v3811_v40, %s3990_s29 }
 0x3e4   :  { %3797 = vrot.lane.b32.xlu0 %v3811_v40, %s3989_s3 }
 0x3e7   :  { %3772 = vrot.lane.b32.xlu1 %v3786_v38, %s3998_s17 }
 0x3e8   :  { %3802 = vrot.lane.b32.xlu0 %v3811_v40, %s3991_s13 }
 0x3eb   :  { %3777 = vrot.lane.b32.xlu1 %v4624_v12, %s3998_s17 }
 0x3ec   :  { %3807 = vrot.lane.b32.xlu0 %v3811_v40, %s3998_s17 }
 0x3ef   :  { %3787 = vrot.lane.b32.xlu1 %v3786_v38, %s3999_s12 }
 0x3f0   :  { %3812 = vrot.lane.b32.xlu0 %v3811_v40, %s3999_s12 }
 0x3f3   :  { %3792 = vrot.lane.b32.xlu1 %v4624_v12, %s3999_s12 }
 0x3f4   :  { %3817 = vrot.lane.b32.xlu0 %v3816_v41, %s3996_s24 }
 0x3f7   :  { %3822 = vrot.lane.b32.xlu1 %v3786_v38, %s4000_s1 }
 0x3f8   :  { %3832 = vrot.lane.b32.xlu0 %v3811_v40, %s4000_s1 }
 0x3fb   :  { %3827 = vrot.lane.b32.xlu1 %v4624_v12, %s4000_s1 }
 0x411   :  { %v4669_v46 = vpop.permute.xlu1 %3607 }
 0x412   :  { %v4671_v47 = vpop.permute.xlu0 %3602 }
 0x415   :  { %v4673_v48 = vpop.permute.xlu1 %3612 }
 0x416   :  { %v4675_v51 = vpop.permute.xlu0 %3657 }
 0x419   :  { %v3618_v39 = vpop.permute.xlu1 %3617 }
 0x41a   :  { %v4677_v54 = vpop.permute.xlu0 %3667  ;;  %v4698_v20 = vunpack.i.h.bf16 %v3618_v39  ;;  %v3619_v22 = vunpack.i.l.bf16 %v3618_v39 }
 0x41c   :  { %v4712_v17 = vsel %vm774_vm5, %v3619_v22, %v4698_v20 }
 0x41d   :  { %v3623_v45 = vpop.permute.xlu1 %3622 }
 0x41e   :  { %v4679_v27 = vpop.permute.xlu0 %3672  ;;  %v3625_v60 = vunpack.i.h.bf16 %v3623_v45  ;;  %v3624_v9 = vunpack.i.l.bf16 %v3623_v45 }
 0x41f   :  { %v3675_v62 = vunpack.i.h.bf16 %v4679_v27  ;;  %v3674_v59 = vunpack.i.l.bf16 %v4679_v27 }
 0x420   :  { %v4728_v52 = vsel %vm798_vm13, %v3624_v9, %v3625_v60 }
 0x421   :  { %v3628_v49 = vpop.permute.xlu1 %3627  ;;  %v1613_v11 = vsel %vm1611_vm4, %v3674_v59, %v3675_v62 }
 0x422   :  { %v4681_v58 = vpop.permute.xlu0 %3692  ;;  %v3851_v18 = vpack.i.bf16 %v3675_v62, %v1613_v11  ;;  %v4730_v56 = vunpack.i.h.bf16 %v3628_v49  ;;  %v3629_v5 = vunpack.i.l.bf16 %v3628_v49 }
 0x423   :  { %v3694_v63 = vunpack.i.l.bf16 %v4681_v58 }
 0x424   :  { %v4745_v30 = vsel %vm1372_vm8, %v3629_v5, %v4730_v56 }
 0x425   :  { %v1591_v0 = vsel %vm798_vm13, %v3625_v60, %v3694_v63  ;;  %v3633_v1 = vpop.permute.xlu1 %3632 }
 0x426   :  { %v3841_v4 = vpack.i.bf16 %v3694_v63, %v1591_v0  ;;  %v4687_v8 = vpop.permute.xlu0 %3702  ;;  %v3635_v12 = vunpack.i.h.bf16 %v3633_v1  ;;  %v3634_v25 = vunpack.i.l.bf16 %v3633_v1 }
 0x428   :  { %3842 = vrot.lane.b32.xlu1 %v3841_v4, %s4000_s1  ;;  %v1388_v41 = vsel %vm1387_vm9, %v3634_v25, %v3635_v12 }
 0x429   :  { %v4693_v15 = vpop.permute.xlu1 %3637 }
 0x42a   :  { %v4695_v19 = vpop.permute.xlu0 %3707  ;;  %v4759_v44 = vunpack.i.h.bf16 %v4693_v15  ;;  %v3639_v39 = vunpack.i.l.bf16 %v4693_v15 }
 0x42b   :  { %v3709_v28 = vunpack.i.l.bf16 %v4695_v19 }
 0x42c   :  { %3852 = vrot.lane.b32.xlu1 %v3851_v18, %s4000_s1  ;;  %v4769_v4 = vsel %vm870_vm15, %v3639_v39, %v4759_v44 }
 0x42d   :  { %v4700_v24 = vpop.permute.xlu1 %3642 }
 0x42e   :  { %v4704_v29 = vunpack.i.h.bf16 %v4700_v24  ;;  %v3713_v14 = vpop.permute.xlu0 %3712  ;;  %v3644_v11 = vunpack.i.l.bf16 %v4700_v24 }
 0x42f   :  { %v4706_v31 = vunpack.i.h.bf16 %v3713_v14  ;;  %v3714_v35 = vunpack.i.l.bf16 %v3713_v14 }
 0x430   :  { %v1626_v21 = vsel %vm894_vm1, %v4704_v29, %v3709_v28 }
 0x431   :  { %v3861_v23 = vpack.i.bf16 %v3709_v28, %v1626_v21  ;;  %v4716_v34 = vsel %vm774_vm5, %v3714_v35, %v4706_v31  ;;  %v4718_v16 = vpop.permute.xlu1 %3647  ;;  %v3161_v61 = vpack.c.bf16 %v4706_v31, %v4698_v20 }
 0x432   :  { %v3163_v7 = vpack.c.bf16 %v4716_v34, %v4712_v17  ;;  %v3718_v13 = vpop.permute.xlu0 %3717  ;;  %v4785_v21 = vunpack.i.h.bf16 %v4718_v16  ;;  %v3649_v24 = vunpack.i.l.bf16 %v4718_v16 }
 0x433   :  { %v4724_v32 = vunpack.i.h.bf16 %v3718_v13  ;;  %v3719_v50 = vunpack.i.l.bf16 %v3718_v13  ;;  %3162 = vmatprep.subr.bf16.mxu0 %v3161_v61  ;;  %3862 = vrot.lane.b32.xlu1 %v3861_v23, %s4000_s1  ;;  %v4790_v23 = vsel %vm894_vm1, %v3644_v11, %v4704_v29  ;;  %v3659_v11 = vunpack.i.l.bf16 %v4675_v51 }
 0x434   :  { %3164 = vmatpush1.bf16.msra.mxu0 %v3163_v7 }
 0x435   :  { %v4734_v26 = vsel %vm798_vm13, %v3719_v50, %v4724_v32  ;;  %v4736_v43 = vpop.permute.xlu1 %3652  ;;  %v3165_v55 = vpack.c.bf16 %v4724_v32, %v3625_v60 }
 0x436   :  { %v3167_v57 = vpack.c.bf16 %v4734_v26, %v4728_v52  ;;  %v3723_v53 = vpop.permute.xlu0 %3722 }
 0x437   :  { %v4741_v2 = vunpack.i.h.bf16 %v3723_v53  ;;  %v3724_v6 = vunpack.i.l.bf16 %v3723_v53  ;;  %3166 = vmatprep.subr.bf16.mxu0 %v3165_v55 }
 0x438   :  { %3168 = vmatpush1.bf16.msra.mxu0 %v3167_v57 }
 0x439   :  { %v4749_v33 = vsel %vm1372_vm8, %v3724_v6, %v4741_v2  ;;  %v4751_v36 = vpop.permute.xlu1 %3662  ;;  %v3169_v37 = vpack.c.bf16 %v4741_v2, %v4730_v56  ;;  %v4804_v6 = vsel %vm918_vm3, %v3649_v24, %v4785_v21 }
 0x43a   :  { %v3171_v42 = vpack.c.bf16 %v4749_v33, %v4745_v30  ;;  %v3728_v10 = vpop.permute.xlu0 %3727 }
 0x43b   :  { %v3730_v38 = vunpack.i.h.bf16 %v3728_v10  ;;  %v3729_v40 = vunpack.i.l.bf16 %v3728_v10  ;;  %3170 = vmatprep.subr.bf16.mxu0 %v3169_v37 }
 0x43c   :  { %3172 = vmatpush1.bf16.msra.mxu0 %v3171_v42 }
 0x43d   :  { %v3173_v45 = vpack.c.bf16 %v3730_v38, %v3635_v12  ;;  %v1389_v49 = vsel %vm1387_vm9, %v3729_v40, %v3730_v38  ;;  %v4763_v60 = vpop.permute.xlu1 %3677  ;;  %v4807_v12 = vunpack.i.h.bf16 %v4736_v43 }
 0x43e   :  { %v3175_v62 = vpack.c.bf16 %v1389_v49, %v1388_v41  ;;  %v3733_v63 = vpop.permute.xlu0 %3732  ;;  %v3610_v41 = vunpack.i.h.bf16 %v4669_v46  ;;  %v3609_v49 = vunpack.i.l.bf16 %v4669_v46 }
 0x43f   :  { %v4765_v0 = vunpack.i.h.bf16 %v3733_v63  ;;  %v3734_v1 = vunpack.i.l.bf16 %v3733_v63  ;;  %3174 = vmatprep.subr.bf16.mxu0 %v3173_v45 }
 0x440   :  { %3176 = vmatpush1.bf16.msra.mxu0 %v3175_v62 }
 0x441   :  { %v4774_v15 = vsel %vm870_vm15, %v3734_v1, %v4765_v0  ;;  %v4776_v18 = vpop.permute.xlu1 %3682  ;;  %v3177_v22 = vpack.c.bf16 %v4765_v0, %v4759_v44  ;;  %v3660_v1 = vunpack.i.h.bf16 %v4675_v51 }
 0x442   :  { %v3179_v28 = vpack.c.bf16 %v4774_v15, %v4769_v4  ;;  %v3738_v14 = vpop.permute.xlu0 %3737 }
 0x443   :  { %v4782_v35 = vunpack.i.h.bf16 %v3738_v14  ;;  %v3739_v9 = vunpack.i.l.bf16 %v3738_v14  ;;  %3178 = vmatprep.subr.bf16.mxu0 %v3177_v22  ;;  %v3704_v22 = vunpack.i.l.bf16 %v4687_v8 }
 0x444   :  { %3180 = vmatpush1.bf16.msra.mxu0 %v3179_v28  ;;  %v3886_v28 = vpack.i.bf16 %v4734_v26, %v4728_v52 }
 0x445   :  { %v4794_v61 = vsel %vm894_vm1, %v3739_v9, %v4782_v35  ;;  %v3688_v7 = vpop.permute.xlu1 %3687  ;;  %v3181_v13 = vpack.c.bf16 %v4782_v35, %v4704_v29  ;;  %v3654_v29 = vunpack.i.l.bf16 %v4736_v43 }
 0x446   :  { %v3183_v50 = vpack.c.bf16 %v4794_v61, %v4790_v23  ;;  %v3690_v5 = vunpack.i.h.bf16 %v3688_v7  ;;  %v3743_v55 = vpop.permute.xlu0 %3742  ;;  %v3689_v16 = vunpack.i.l.bf16 %v3688_v7 }
 0x447   :  { %v4800_v57 = vunpack.i.h.bf16 %v3743_v55  ;;  %v3744_v53 = vunpack.i.l.bf16 %v3743_v55  ;;  %3182 = vmatprep.subr.bf16.mxu0 %v3181_v13  ;;  %v4835_v14 = vsel %vm1444_vm12, %v3654_v29, %v4807_v12  ;;  %v3670_v29 = vunpack.i.h.bf16 %v4677_v54 }
 0x448   :  { %v1586_v25 = vsel %vm774_vm5, %v4706_v31, %v3690_v5  ;;  %3184 = vmatpush1.bf16.msra.mxu0 %v3183_v50  ;;  %v1585_v37 = vsel %vm774_vm5, %v4698_v20, %v3689_v16  ;;  %vm1509_vm5 = vcmask 556032  }
 0x449   :  { %v3871_v42 = vpack.i.bf16 %v3690_v5, %v1586_v25  ;;  %v4816_v10 = vsel %vm918_vm3, %v3744_v53, %v4800_v57  ;;  %v3698_v38 = vpop.permute.xlu1 %3697  ;;  %v3185_v40 = vpack.c.bf16 %v4800_v57, %v4785_v21  ;;  %v3836_v43 = vpack.i.bf16 %v3689_v16, %v1585_v37 }
 0x44a   :  { %v3187_v31 = vpack.c.bf16 %v4816_v10, %v4804_v6  ;;  %v3700_v39 = vunpack.i.h.bf16 %v3698_v38  ;;  %v3748_v45 = vpop.permute.xlu0 %3747  ;;  %v3699_v20 = vunpack.i.l.bf16 %v3698_v38  ;;  %v3669_v25 = vunpack.i.l.bf16 %v4677_v54 }
 0x44b   :  { %v4824_v62 = vunpack.i.h.bf16 %v3748_v45  ;;  %v3749_v63 = vunpack.i.l.bf16 %v3748_v45  ;;  %3186 = vmatprep.subr.bf16.mxu0 %v3185_v40  ;;  %3872 = vrot.lane.b32.xlu1 %v3871_v42, %s4000_s1  ;;  %v1460_v42 = vsel %vm1459_vm10, %v3659_v11, %v3660_v1 }
 0x44c   :  { %3837 = vrot.lane.b32.xlu0 %v3836_v43, %s4000_s1  ;;  %3188 = vmatpush1.bf16.msra.mxu0 %v3187_v31  ;;  %v1597_v9 = vsel %vm1372_vm8, %v4730_v56, %v3699_v20  ;;  %v1598_v26 = vsel %vm1372_vm8, %v4741_v2, %v3700_v39  ;;  %v1620_v56 = vsel %vm870_vm15, %v4759_v44, %v3704_v22  ;;  %v3665_v2 = vunpack.i.h.bf16 %v4751_v36 }
 0x44d   :  { %v4841_v24 = vsel %vm1444_vm12, %v3749_v63, %v4824_v62  ;;  %v3753_v51 = vpop.permute.xlu1 %3752  ;;  %v3189_v7 = vpack.c.bf16 %v4824_v62, %v4807_v12  ;;  %v3846_v52 = vpack.i.bf16 %v3699_v20, %v1597_v9  ;;  %v3664_v44 = vunpack.i.l.bf16 %v4751_v36 }
 0x44e   :  { %v3191_v13 = vpack.c.bf16 %v4841_v24, %v4835_v14  ;;  %v3755_v50 = vunpack.i.h.bf16 %v3753_v51  ;;  %v3758_v5 = vpop.permute.xlu0 %3757  ;;  %v3754_v55 = vunpack.i.l.bf16 %v3753_v51  ;;  %v3891_v38 = vpack.i.bf16 %v3700_v39, %v1598_v26 }
 0x44f   :  { %v3760_v16 = vunpack.i.h.bf16 %v3758_v5  ;;  %v3759_v53 = vunpack.i.l.bf16 %v3758_v5  ;;  %3190 = vmatprep.subr.bf16.mxu0 %v3189_v7  ;;  %3887 = vrot.lane.b32.xlu1 %v3886_v28, %s4000_s1  ;;  %v3604_v31 = vunpack.i.l.bf16 %v4671_v47  ;;  %v3856_v45 = vpack.i.bf16 %v3704_v22, %v1620_v56 }
 0x450   :  { %v3193_v37 = vpack.c.bf16 %v3755_v50, %v3660_v1  ;;  %3847 = vrot.lane.b32.xlu0 %v3846_v52, %s4000_s1  ;;  %3192 = vmatpush1.bf16.msra.mxu0 %v3191_v13  ;;  %v1461_v40 = vsel %vm1459_vm10, %v3754_v55, %v3755_v50  ;;  %v3605_v36 = vunpack.i.h.bf16 %v4671_v47  ;;  %v3615_v39 = vunpack.i.h.bf16 %v4673_v48 }
 0x451   :  { %v3763_v43 = vpop.permute.xlu1 %3762  ;;  %v3195_v20 = vpack.c.bf16 %v1461_v40, %v1460_v42  ;;  %v3197_v54 = vpack.c.bf16 %v3760_v16, %v3665_v2  ;;  %v1475_v28 = vsel %vm1077_vm11, %v3759_v53, %v3760_v16  ;;  %v1489_v11 = vsel %vm1488_vm14, %v3669_v25, %v3670_v29 }
 0x452   :  { %v4860_v63 = vpop.permute.xlu0 %3782  ;;  %3194 = vmatprep.subr.bf16.mxu0 %v3193_v37  ;;  %v3765_v9 = vunpack.i.h.bf16 %v3763_v43  ;;  %v3764_v51 = vunpack.i.l.bf16 %v3763_v43  ;;  %v1612_v22 = vsel %vm1611_vm4, %v3604_v31, %v3674_v59  ;;  %v1474_v7 = vsel %vm1077_vm11, %v3664_v44, %v3665_v2 }
 0x453   :  { %v3784_v1 = vunpack.i.l.bf16 %v4860_v63  ;;  %3892 = vrot.lane.b32.xlu1 %v3891_v38, %s4000_s1  ;;  %v3680_v52 = vunpack.i.h.bf16 %v4763_v60  ;;  %v3679_v26 = vunpack.i.l.bf16 %v4763_v60  ;;  %v3705_v50 = vunpack.i.h.bf16 %v4687_v8 }
 0x454   :  { %3857 = vrot.lane.b32.xlu0 %v3856_v45, %s4000_s1  ;;  %3196 = vmatpush1.bf16.msra.mxu0 %v3195_v20  ;;  %v3199_v27 = vpack.c.bf16 %v1475_v28, %v1474_v7  ;;  %v1490_v55 = vsel %vm1488_vm14, %v3764_v51, %v3765_v9  ;;  %v3201_v16 = vpack.c.bf16 %v3765_v9, %v3670_v29  ;;  %v3695_v60 = vunpack.i.h.bf16 %v4681_v58 }
 0x455   :  { %v1632_v47 = vsel %vm918_vm3, %v4785_v21, %v3784_v1  ;;  %3198 = vmatprep.subr.bf16.mxu0 %v3197_v54  ;;  %v4877_v13 = vpop.permute.xlu1 %3767  ;;  %v3685_v21 = vunpack.i.h.bf16 %v4776_v18  ;;  %v3684_v2 = vunpack.i.l.bf16 %v4776_v18  ;;  %v1621_v8 = vsel %vm870_vm15, %v4765_v0, %v3705_v50 }
 0x456   :  { %v3866_v5 = vpack.i.bf16 %v3784_v1, %v1632_v47  ;;  %v3769_v59 = vunpack.i.l.bf16 %v4877_v13  ;;  %v3798_v56 = vpop.permute.xlu0 %3797  ;;  %v1511_v29 = vsel %vm1509_vm5, %v3679_v26, %v3680_v52  ;;  %v3614_v58 = vunpack.i.l.bf16 %v4673_v48 }
 0x457   :  { %v3800_v53 = vunpack.i.h.bf16 %v3798_v56  ;;  %v3799_v25 = vunpack.i.l.bf16 %v3798_v56  ;;  %v3876_v18 = vpack.i.bf16 %v4716_v34, %v4712_v17  ;;  %v3203_v40 = vpack.c.bf16 %v1490_v55, %v1489_v11 }
 0x458   :  { %v1614_v37 = vsel %vm1611_vm4, %v3605_v36, %v3769_v59  ;;  %3867 = vrot.lane.b32.xlu0 %v3866_v5, %s4000_s1  ;;  %3200 = vmatpush1.bf16.msra.mxu0 %v3199_v27  ;;  %v1592_v45 = vsel %vm798_vm13, %v4724_v32, %v3695_v60  ;;  %v1510_v48 = vsel %vm1509_vm5, %v3609_v49, %v3679_v26  ;;  %v3785_v17 = vunpack.i.h.bf16 %v4860_v63 }
 0x459   :  { %v3906_v42 = vpack.i.bf16 %v1614_v37, %v1612_v22  ;;  %3202 = vmatprep.subr.bf16.mxu0 %v3201_v16  ;;  %v3773_v44 = vpop.permute.xlu1 %3772  ;;  %v1513_v38 = vsel %vm1509_vm5, %v3799_v25, %v3800_v53  ;;  %v1512_v0 = vsel %vm1509_vm5, %v3610_v41, %v3799_v25  ;;  %v3911_v28 = vpack.i.bf16 %v3705_v50, %v1621_v8 }
 0x45a   :  { %v3803_v43 = vpop.permute.xlu0 %3802  ;;  %v3205_v31 = vpack.c.bf16 %v1513_v38, %v1511_v29  ;;  %v1532_v34 = vsel %vm1530_vm0, %v3684_v2, %v3685_v21  ;;  %v3770_v32 = vunpack.i.h.bf16 %v4877_v13  ;;  %v3775_v9 = vunpack.i.h.bf16 %v3773_v44 }
 0x45b   :  { %v3805_v20 = vunpack.i.h.bf16 %v3803_v43  ;;  %v3804_v54 = vunpack.i.l.bf16 %v3803_v43  ;;  %3907 = vrot.lane.b32.xlu1 %v3906_v42, %s4000_s1  ;;  %v3774_v41 = vunpack.i.l.bf16 %v3773_v44  ;;  %v3881_v36 = vpack.i.bf16 %v3695_v60, %v1592_v45 }
 0x45c   :  { %3877 = vrot.lane.b32.xlu0 %v3876_v18, %s4000_s1  ;;  %3204 = vmatpush1.bf16.msra.mxu0 %v3203_v40  ;;  %v3207_v46 = vpack.c.bf16 %v1512_v0, %v1510_v48  ;;  %v3896_v47 = vpack.i.bf16 %v4749_v33, %v4745_v30  ;;  %v1531_v13 = vsel %vm1530_vm0, %v3614_v58, %v3684_v2  ;;  %vm1572_vm11 = vcmask 359424  }
 0x45d   :  { %3206 = vmatprep.subr.bf16.mxu0 %v3205_v31  ;;  %v3778_v51 = vpop.permute.xlu1 %3777  ;;  %v1534_v1 = vsel %vm1530_vm0, %v3804_v54, %v3805_v20  ;;  %v1533_v49 = vsel %vm1530_vm0, %v3615_v39, %v3804_v54  ;;  %v3926_v50 = vpack.i.bf16 %v4794_v61, %v4790_v23  ;;  %v1633_v39 = vsel %vm918_vm3, %v4800_v57, %v3785_v17 }
 0x45e   :  { %v3808_v11 = vpop.permute.xlu0 %3807  ;;  %v3209_v22 = vpack.c.bf16 %v1534_v1, %v1532_v34  ;;  %v3780_v63 = vunpack.i.h.bf16 %v3778_v51  ;;  %v3779_v7 = vunpack.i.l.bf16 %v3778_v51  ;;  %v1615_v27 = vsel %vm1611_vm4, %v3769_v59, %v3770_v32 }
 0x45f   :  { %v3810_v52 = vunpack.i.h.bf16 %v3808_v11  ;;  %v3809_v26 = vunpack.i.l.bf16 %v3808_v11  ;;  %3912 = vrot.lane.b32.xlu1 %v3911_v28, %s4000_s1  ;;  %v1553_v56 = vsel %vm1551_vm2, %v3774_v41, %v3775_v9  ;;  %v3211_v33 = vpack.c.bf16 %v1533_v49, %v1531_v13  ;;  %v1826_v11 = vld [vmem:[%s5365_s5 + $0x28] sm:$0xff]  ;;  %v1829_v13 = vld [vmem:[%s5365_s5 + $0x40] sm:$0xff] }
 0x460   :  { %3882 = vrot.lane.b32.xlu0 %v3881_v36, %s4000_s1  ;;  %3208 = vmatpush1.bf16.msra.mxu0 %v3207_v46  ;;  %v1552_v61 = vsel %vm1551_vm2, %v3779_v7, %v3774_v41  ;;  %v3931_v59 = vpack.i.bf16 %v3785_v17, %v1633_v39  ;;  %v3901_v2 = vpack.i.bf16 %v3770_v32, %v1615_v27  ;;  %v3710_v40 = vunpack.i.h.bf16 %v4695_v19  ;;  %v1821_v46 = vld [vmem:[%s5365_s5] sm:$0xff]  ;;  %v1886_v39 = vld [vmem:[%s5366_s6 + $0x28] sm:$0xff] }
 0x461   :  { %3210 = vmatprep.subr.bf16.mxu0 %v3209_v22  ;;  %v3788_v5 = vpop.permute.xlu1 %3787  ;;  %v1555_v30 = vsel %vm1551_vm2, %v3809_v26, %v3810_v52  ;;  %v1554_v25 = vsel %vm1551_vm2, %v3780_v63, %v3809_v26  ;;  %v3916_v45 = vpack.i.bf16 %v4774_v15, %v4769_v4  ;;  %vm1748_vm13 = vcmask 343040   ;;  %v1825_v52 = vld [vmem:[%s5365_s5 + $0x20] sm:$0xff] }
 0x462   :  { %v3790_v55 = vunpack.i.h.bf16 %v3788_v5  ;;  %v3789_v16 = vunpack.i.l.bf16 %v3788_v5  ;;  %v3813_v53 = vpop.permute.xlu0 %3812  ;;  %v3213_v23 = vpack.c.bf16 %v1555_v30, %v1553_v56  ;;  %v3215_v42 = vpack.c.bf16 %v1554_v25, %v1552_v61  ;;  %v1833_v27 = vld [vmem:[%s5365_s5 + $0x60] sm:$0xff]  ;;  %v1838_v5 = vld [vmem:[%s5365_s5 + $0x88] sm:$0xff]  ;;  %v1883_v56 = vld [vmem:[%s5366_s6 + $0x10] sm:$0xff] }
 0x463   :  { %v3815_v60 = vunpack.i.h.bf16 %v3813_v53  ;;  %v3814_v21 = vunpack.i.l.bf16 %v3813_v53  ;;  %3927 = vrot.lane.b32.xlu1 %v3926_v50, %s4000_s1  ;;  %v1627_v19 = vsel %vm894_vm1, %v4782_v35, %v3710_v40  ;;  %v3951_v35 = vpack.i.bf16 %v4841_v24, %v4835_v14  ;;  %v1882_v24 = vld [vmem:[%s5366_s6 + $0x8] sm:$0xff]  ;;  %v1881_v50 = vld [vmem:[%s5366_s6] sm:$0xff]  ;;  %v1888_v30 = vld [vmem:[%s5366_s6 + $0x38] sm:$0xff] }
 0x464   :  { %3897 = vrot.lane.b32.xlu0 %v3896_v47, %s4000_s1  ;;  %3212 = vmatpush1.bf16.msra.mxu0 %v3211_v33  ;;  %v1574_v57 = vsel %vm1572_vm11, %v3789_v16, %v3790_v55  ;;  %v3921_v15 = vpack.i.bf16 %v3710_v40, %v1627_v19  ;;  %v3941_v7 = vpack.i.bf16 %v4816_v10, %v4804_v6  ;;  %v1830_v47 = vld [vmem:[%s5365_s5 + $0x48] sm:$0xff]  ;;  %v1884_v6 = vld [vmem:[%s5366_s6 + $0x18] sm:$0xff]  ;;  %v1837_v33 = vld [vmem:[%s5365_s5 + $0x80] sm:$0xff]  ;;  %vm1971_vm15 = vcmask 130048  }
 0x465   :  { %3214 = vmatprep.subr.bf16.mxu0 %v3213_v23  ;;  %v3793_v37 = vpop.permute.xlu1 %3792  ;;  %v1576_v8 = vsel %vm1572_vm11, %v3814_v21, %v3815_v60  ;;  %v1842_v55 = vld [vmem:[%s5365_s5 + $0xa8] sm:$0xff]  ;;  %v1841_v23 = vld [vmem:[%s5365_s5 + $0xa0] sm:$0xff]  ;;  %v1887_v25 = vld [vmem:[%s5366_s6 + $0x30] sm:$0xff]  ;;  %vm2641_vm1 = vcmask 1043456   ;;  %vm2634_vm3 = vcmask 687104   ;;  %vm2881_vm4 = vcmask 9224  }
 0x466   :  { %v3795_v44 = vunpack.i.h.bf16 %v3793_v37  ;;  %v3794_v29 = vunpack.i.l.bf16 %v3793_v37  ;;  %v3818_v38 = vpop.permute.xlu0 %3817  ;;  %v3217_v58 = vpack.c.bf16 %v1576_v8, %v1574_v57  ;;  %v1890_v53 = vld [vmem:[%s5366_s6 + $0x48] sm:$0xff]  ;;  %v1892_v60 = vld [vmem:[%s5366_s6 + $0x58] sm:$0xff]  ;;  %v1849_v37 = vld [vmem:[%s5365_s5 + $0xe0] sm:$0xff]  ;;  %vm2879_vm8 = vcmask 15368  }
 0x467   :  { %v3819_v18 = vunpack.i.l.bf16 %v3818_v38  ;;  %3932 = vrot.lane.b32.xlu1 %v3931_v59, %s4000_s1  ;;  %v3820_v49 = vunpack.i.h.bf16 %v3818_v38  ;;  %v1846_v61 = vld [vmem:[%s5365_s5 + $0xc8] sm:$0xff]  ;;  %v1889_v59 = vld [vmem:[%s5366_s6 + $0x40] sm:$0xff]  ;;  %v2374_v19 = vld [vmem:[%s5367_s8 + $0x30] sm:$0xff] }
 0x468   :  { %v1573_v43 = vsel %vm1572_vm11, %v3794_v29, %v3789_v16  ;;  %v1575_v31 = vsel %vm1572_vm11, %v3795_v44, %v3814_v21  ;;  %3902 = vrot.lane.b32.xlu0 %v3901_v2, %s4000_s1  ;;  %3216 = vmatpush1.bf16.msra.mxu0 %v3215_v42  ;;  %v1885_v16 = vld [vmem:[%s5366_s6 + $0x20] sm:$0xff]  ;;  %v1850_v57 = vld [vmem:[%s5365_s5 + $0xe8] sm:$0xff]  ;;  %v1891_v42 = vld [vmem:[%s5366_s6 + $0x50] sm:$0xff] }
 0x469   :  { %v3219_v0 = vpack.c.bf16 %v1575_v31, %v1573_v43  ;;  %v1638_v20 = vsel %vm1444_vm12, %v4807_v12, %v3819_v18  ;;  %3218 = vmatprep.subr.bf16.mxu0 %v3217_v58  ;;  %v3823_v54 = vpop.permute.xlu1 %3822  ;;  %v1639_v26 = vsel %vm1444_vm12, %v4824_v62, %v3820_v49  ;;  %v1834_v62 = vld [vmem:[%s5365_s5 + $0x68] sm:$0xff]  ;;  %v1845_v21 = vld [vmem:[%s5365_s5 + $0xc0] sm:$0xff]  ;;  %v1895_v31 = vld [vmem:[%s5366_s6 + $0x70] sm:$0xff] }
 0x46a   :  { %v3936_v48 = vpack.i.bf16 %v3819_v18, %v1638_v20  ;;  %v3825_v28 = vunpack.i.h.bf16 %v3823_v54  ;;  %v3824_v17 = vunpack.i.l.bf16 %v3823_v54  ;;  %v3833_v34 = vpop.permute.xlu0 %3832  ;;  %v3946_v10 = vpack.i.bf16 %v3820_v49, %v1639_v26  ;;  %v1894_v2 = vld [vmem:[%s5366_s6 + $0x68] sm:$0xff]  ;;  %v2368_v44 = vld [vmem:[%s5367_s8] sm:$0xff]  ;;  %v2370_v18 = vld [vmem:[%s5367_s8 + $0x10] sm:$0xff] }
 0x46b   :  { %v3835_v32 = vunpack.i.h.bf16 %v3833_v34  ;;  %v3834_v9 = vunpack.i.l.bf16 %v3833_v34  ;;  %v1854_v8 = vld [vmem:[%s5365_s5 + $0x108] sm:$0xff]  ;;  %v1853_v29 = vld [vmem:[%s5365_s5 + $0x100] sm:$0xff] }
 0x46c   :  { %3917 = vrot.lane.b32.xlu0 %v3916_v45, %s4000_s1  ;;  %3937 = vrot.lane.b32.xlu1 %v3936_v48, %s4000_s1  ;;  %v1750_v4 = vsel %vm1748_vm13, %v3824_v17, %v3825_v28  ;;  %v1858_v38 = vld [vmem:[%s5365_s5 + $0x128] sm:$0xff]  ;;  %v1893_v58 = vld [vmem:[%s5366_s6 + $0x60] sm:$0xff] }
 0x46d   :  { %3220 = vmatpush1.bf16.msra.mxu0 %v3219_v0  ;;  %v3828_v12 = vpop.permute.xlu1 %3827  ;;  %v1752_v41 = vsel %vm1748_vm13, %v3834_v9, %v3835_v32  ;;  %v1857_v40 = vld [vmem:[%s5365_s5 + $0x120] sm:$0xff]  ;;  %v1862_v43 = vld [vmem:[%s5365_s5 + $0x148] sm:$0xff] }
 0x46e   :  { %v3830_v51 = vunpack.i.h.bf16 %v3828_v12  ;;  %v3829_v1 = vunpack.i.l.bf16 %v3828_v12  ;;  %v3221_v36 = vpack.c.bf16 %v1752_v41, %v1750_v4  ;;  %v2372_v45 = vld [vmem:[%s5367_s8 + $0x20] sm:$0xff]  ;;  %v1866_v20 = vld [vmem:[%s5365_s5 + $0x168] sm:$0xff] }
 0x46f   :  { %v1861_v0 = vld [vmem:[%s5365_s5 + $0x140] sm:$0xff]  ;;  %v2369_v54 = vld [vmem:[%s5367_s8 + $0x8] sm:$0xff] }
 0x470   :  { %v1749_v22 = vsel %vm1748_vm13, %v3829_v1, %v3824_v17  ;;  %v1751_v63 = vsel %vm1748_vm13, %v3830_v51, %v3834_v9  ;;  %3922 = vrot.lane.b32.xlu0 %v3921_v15, %s4000_s1  ;;  %3952 = vrot.lane.b32.xlu1 %v3951_v35, %s4000_s1  ;;  %v1865_v48 = vld [vmem:[%s5365_s5 + $0x160] sm:$0xff]  ;;  %v1870_v28 = vld [vmem:[%s5365_s5 + $0x188] sm:$0xff] }
 0x471   :  { %v3223_v14 = vpack.c.bf16 %v1751_v63, %v1749_v22  ;;  %3222 = vmatprep.subr.bf16.mxu0 %v3221_v36  ;;  %2082 = vmatmul.mubr.f32.vlgmr.msra.gmra.mrb[8].mxu0 %v1821_v46  ;;  %v2371_v17 = vld [vmem:[%s5367_s8 + $0x18] sm:$0xff]  ;;  %v2376_v34 = vld [vmem:[%s5367_s8 + $0x40] sm:$0xff]  ;;  %v1874_v9 = vld [vmem:[%s5365_s5 + $0x1a8] sm:$0xff] }
 0x472   :  { %2087 = vmatprep.mubr.f32.mxu0 %v1826_v11  ;;  %v1869_v32 = vld [vmem:[%s5365_s5 + $0x180] sm:$0xff]  ;;  %v2373_v4 = vld [vmem:[%s5367_s8 + $0x28] sm:$0xff]  ;;  %v2378_v15 = vld [vmem:[%s5367_s8 + $0x50] sm:$0xf] }
 0x473   :  { %3224 = vmatpush1.bf16.msra.mxu0 %v3223_v14  ;;  %v1873_v12 = vld [vmem:[%s5365_s5 + $0x1a0] sm:$0xff]  ;;  %v1878_v41 = vld [vmem:[%s5365_s5 + $0x1c8] sm:$0xff]  ;;  %v2375_v35 = vld [vmem:[%s5367_s8 + $0x38] sm:$0xff] }
 0x474   :  { %3942 = vrot.lane.b32.xlu0 %v3941_v7, %s4000_s1  ;;  %1903 = vperm.xlu1 %3555, %v1882_v24   ;;  %v2623_v51 = vld [vmem:[%s5368_s10 + $0x8] sm:$0x3]  ;;  %v1877_v1 = vld [vmem:[%s5365_s5 + $0x1c0] sm:$0xff]  ;;  %v1824_v36 = vld [vmem:[%s5365_s5 + $0x18] sm:$0xff] }
 0x475   :  { %2088 = vmatmul.mubr.f32.gmra.mrb[10].mxu0 %v1825_v52  ;;  %v2377_v46 = vld [vmem:[%s5367_s8 + $0x48] sm:$0xff]  ;;  %v2622_v49 = vld [vmem:[%s5368_s10] sm:$0xff] }
 0x476   :  { %2093 = vmatprep.mubr.f32.mxu0 %v1830_v47 }
 0x478   :  { %3947 = vrot.lane.b32.xlu0 %v3946_v10, %s4000_s1  ;;  %1913 = vperm.xlu1 %3555, %v1884_v6  }
 0x479   :  { %2094 = vmatmul.mubr.f32.gmra.mrb[12].mxu0 %v1829_v13 }
 0x47a   :  { %2099 = vmatprep.mubr.f32.mxu0 %v1834_v62 }
 0x47c   :  { %1898 = vperm.xlu0 %3399, %v1881_v50   ;;  %1923 = vperm.xlu1 %3555, %v1886_v39  }
 0x47d   :  { %2100 = vmatmul.mubr.f32.gmra.mrb[14].mxu0 %v1833_v27 }
 0x47e   :  { %2105 = vmatprep.mubr.f32.mxu0 %v1838_v5 }
 0x480   :  { %1908 = vperm.xlu0 %3399, %v1883_v56   ;;  %1933 = vperm.xlu1 %3555, %v1888_v30  }
 0x481   :  { %2106 = vmatmul.mubr.f32.gmra.mrb[16].mxu0 %v1837_v33 }
 0x482   :  { %2111 = vmatprep.mubr.f32.mxu0 %v1842_v55 }
 0x484   :  { %1918 = vperm.xlu0 %3399, %v1885_v16   ;;  %1943 = vperm.xlu1 %3555, %v1890_v53  }
 0x485   :  { %2112 = vmatmul.mubr.f32.gmra.mrb[18].mxu0 %v1841_v23 }
 0x486   :  { %2117 = vmatprep.mubr.f32.mxu0 %v1846_v61 }
 0x488   :  { %1928 = vperm.xlu0 %3399, %v1887_v25   ;;  %1953 = vperm.xlu1 %3555, %v1892_v60  }
 0x489   :  { %2118 = vmatmul.mubr.f32.gmra.mrb[20].mxu0 %v1845_v21 }
 0x48a   :  { %2123 = vmatprep.mubr.f32.mxu0 %v1850_v57 }
 0x48c   :  { %1938 = vperm.xlu0 %3399, %v1889_v59   ;;  %1963 = vperm.xlu1 %3555, %v1894_v2  }
 0x48d   :  { %2124 = vmatmul.mubr.f32.gmra.mrb[22].mxu0 %v1849_v37 }
 0x48e   :  { %2129 = vmatprep.mubr.f32.mxu0 %v1854_v8 }
 0x490   :  { %1948 = vperm.xlu0 %3399, %v1891_v42   ;;  %2381 = vperm.xlu1 %3555, %v2368_v44  }
 0x491   :  { %2130 = vmatmul.mubr.f32.gmra.mrb[24].mxu0 %v1853_v29 }
 0x492   :  { %2135 = vmatprep.mubr.f32.mxu0 %v1858_v38 }
 0x494   :  { %1958 = vperm.xlu0 %3399, %v1893_v58   ;;  %2391 = vperm.xlu1 %3555, %v2370_v18  }
 0x495   :  { %2136 = vmatmul.mubr.f32.gmra.mrb[26].mxu0 %v1857_v40 }
 0x496   :  { %2141 = vmatprep.mubr.f32.mxu0 %v1862_v43 }
 0x498   :  { %1968 = vperm.xlu0 %3399, %v1895_v31   ;;  %2401 = vperm.xlu1 %3555, %v2372_v45  }
 0x499   :  { %2142 = vmatmul.mubr.f32.gmra.mrb[28].mxu0 %v1861_v0 }
 0x49a   :  { %2147 = vmatprep.mubr.f32.mxu0 %v1866_v20  ;;  %v3843_v11 = vpop.permute.xlu1 %3842 }
 0x49b   :  { %v3845_v16 = vunpack.i.h.bf16 %v3843_v11  ;;  %v3844_v53 = vunpack.i.l.bf16 %v3843_v11 }
 0x49c   :  { %2386 = vperm.xlu0 %3399, %v2369_v54   ;;  %2411 = vperm.xlu1 %3555, %v2374_v19  }
 0x49d   :  { %2148 = vmatmul.mubr.f32.gmra.mrb[30].mxu0 %v1865_v48  ;;  %v1758_v38 = vsel %vm1748_vm13, %v3844_v53, %v3845_v16 }
 0x49e   :  { %2153 = vmatprep.mubr.f32.mxu0 %v1870_v28  ;;  %v5129_v22 = vpop.permute.xlu1 %3852 }
 0x49f   :  { %v3855_v28 = vunpack.i.h.bf16 %v5129_v22 }
 0x4a0   :  { %2396 = vperm.xlu0 %3399, %v2371_v17   ;;  %2421 = vperm.xlu1 %3555, %v2376_v34   ;;  %v3854_v17 = vunpack.i.l.bf16 %v5129_v22 }
 0x4a1   :  { %2154 = vmatmul.mubr.f32.gmra.mrb[32].mxu0 %v1869_v32 }
 0x4a2   :  { %2159 = vmatprep.mubr.f32.mxu0 %v1874_v9  ;;  %v1766_v22 = vsel %vm1748_vm13, %v3854_v17, %v3855_v28 }
 0x4a4   :  { %2406 = vperm.xlu0 %3399, %v2373_v4   ;;  %2431 = vperm.xlu1 %3555, %v2378_v15  }
 0x4a5   :  { %2160 = vmatmul.mubr.f32.gmra.mrb[34].mxu0 %v1873_v12  ;;  %v5131_v63 = vpop.permute.xlu1 %3862 }
 0x4a6   :  { %2165 = vmatprep.mubr.f32.mxu0 %v1878_v41 }
 0x4a8   :  { %2416 = vperm.xlu0 %3399, %v2375_v35   ;;  %2631 = vperm.xlu1 %3555, %v2623_v51  }
 0x4a9   :  { %2166 = vmatmul.mubr.f32.gmra.mrb[36].mxu0 %v1877_v1 }
 0x4aa   :  { %2963 = vmatprep.mubr.msk.f32.mxu0 %vm1971_vm15, %v1824_v36 }
 0x4ac   :  { %2426 = vperm.xlu0 %3399, %v2377_v46  }
 0x4b0   :  { %2626 = vperm.xlu0 %3399, %v2622_v49  }
 0x4bd   :  { %v3873_v14 = vpop.permute.xlu1 %3872 }
 0x4be   :  { %v3838_v24 = vpop.permute.xlu0 %3837  ;;  %v3875_v7 = vunpack.i.h.bf16 %v3873_v14  ;;  %v3874_v52 = vunpack.i.l.bf16 %v3873_v14 }
 0x4bf   :  { %v3840_v26 = vunpack.i.h.bf16 %v3838_v24  ;;  %v3839_v47 = vunpack.i.l.bf16 %v3838_v24 }
 0x4c0   :  { %v1756_v6 = vsel %vm1748_vm13, %v3874_v52, %v3875_v7 }
 0x4c1   :  { %v1754_v10 = vsel %vm1748_vm13, %v3839_v47, %v3840_v26  ;;  %v3888_v50 = vpop.permute.xlu1 %3887 }
 0x4c2   :  { %v3848_v13 = vpop.permute.xlu0 %3847  ;;  %v3225_v62 = vpack.c.bf16 %v1756_v6, %v1754_v10  ;;  %v3889_v23 = vunpack.i.l.bf16 %v3888_v50  ;;  %v3890_v59 = vunpack.i.h.bf16 %v3888_v50  ;;  %v3865_v50 = vunpack.i.h.bf16 %v5131_v63 }
 0x4c3   :  { %v3850_v8 = vunpack.i.h.bf16 %v3848_v13  ;;  %v3849_v42 = vunpack.i.l.bf16 %v3848_v13 }
 0x4c4   :  { %3226 = vmatprep.subr.bf16.mxu0 %v3225_v62  ;;  %v1757_v58 = vsel %vm1748_vm13, %v3889_v23, %v3844_v53 }
 0x4c5   :  { %v3893_v27 = vpop.permute.xlu1 %3892  ;;  %v1762_v48 = vsel %vm1748_vm13, %v3849_v42, %v3850_v8 }
 0x4c6   :  { %v5135_v39 = vpop.permute.xlu0 %3857  ;;  %v3895_v61 = vunpack.i.h.bf16 %v3893_v27  ;;  %v3894_v25 = vunpack.i.l.bf16 %v3893_v27 }
 0x4c7   :  { %v3860_v41 = vunpack.i.h.bf16 %v5135_v39  ;;  %v3859_v36 = vunpack.i.l.bf16 %v5135_v39  ;;  %v3864_v39 = vunpack.i.l.bf16 %v5131_v63 }
 0x4c8   :  { %v1764_v31 = vsel %vm1748_vm13, %v3894_v25, %v3895_v61 }
 0x4c9   :  { %v3233_v32 = vpack.c.bf16 %v1764_v31, %v1762_v48  ;;  %v1770_v62 = vsel %vm1748_vm13, %v3859_v36, %v3860_v41 }
 0x4ca   :  { %v5137_v5 = vpop.permute.xlu0 %3867 }
 0x4cb   :  { %v3870_v23 = vunpack.i.h.bf16 %v5137_v5 }
 0x4cd   :  { %v3908_v56 = vpop.permute.xlu1 %3907 }
 0x4ce   :  { %v3878_v30 = vpop.permute.xlu0 %3877  ;;  %v3909_v34 = vunpack.i.l.bf16 %v3908_v56  ;;  %v3910_v46 = vunpack.i.h.bf16 %v3908_v56 }
 0x4cf   :  { %v3880_v33 = vunpack.i.h.bf16 %v3878_v30  ;;  %v3879_v55 = vunpack.i.l.bf16 %v3878_v30 }
 0x4d0   :  { %v1765_v14 = vsel %vm1748_vm13, %v3909_v34, %v3854_v17 }
 0x4d1   :  { %v1753_v60 = vsel %vm1748_vm13, %v3879_v55, %v3839_v47  ;;  %v1755_v21 = vsel %vm1748_vm13, %v3880_v33, %v3874_v52  ;;  %v5141_v57 = vpop.permute.xlu1 %3912 }
 0x4d2   :  { %v3227_v2 = vpack.c.bf16 %v1755_v21, %v1753_v60  ;;  %v3883_v37 = vpop.permute.xlu0 %3882  ;;  %v3915_v9 = vunpack.i.h.bf16 %v5141_v57  ;;  %v3914_v4 = vunpack.i.l.bf16 %v5141_v57  ;;  %v3869_v60 = vunpack.i.l.bf16 %v5137_v5 }
 0x4d3   :  { %v3885_v44 = vunpack.i.h.bf16 %v3883_v37  ;;  %v3884_v29 = vunpack.i.l.bf16 %v3883_v37 }
 0x4d4   :  { %3228 = vmatpush1.bf16.msra.mxu0 %v3227_v2  ;;  %v1772_v52 = vsel %vm1748_vm13, %v3914_v4, %v3915_v9 }
 0x4d5   :  { %v1759_v18 = vsel %vm1748_vm13, %v3890_v59, %v3884_v29  ;;  %v5146_v40 = vpop.permute.xlu1 %3927  ;;  %v1760_v43 = vsel %vm1748_vm13, %v3884_v29, %v3885_v44  ;;  %v3241_v30 = vpack.c.bf16 %v1772_v52, %v1770_v62  ;;  %v1774_v59 = vsel %vm1748_vm13, %v3864_v39, %v3865_v50  ;;  %v1848_v52 = vld [vmem:[%s5365_s5 + $0xd8] sm:$0xff]  ;;  %v1859_v50 = vld [vmem:[%s5365_s5 + $0x130] sm:$0xff] }
 0x4d6   :  { %v3231_v45 = vpack.c.bf16 %v1759_v18, %v1757_v58  ;;  %v3898_v0 = vpop.permute.xlu0 %3897  ;;  %v3229_v20 = vpack.c.bf16 %v1760_v43, %v1758_v38  ;;  %v3929_v27 = vunpack.i.l.bf16 %v5146_v40  ;;  %v3930_v63 = vunpack.i.h.bf16 %v5146_v40  ;;  %v1860_v62 = vld [vmem:[%s5365_s5 + $0x138] sm:$0xff] }
 0x4d7   :  { %v3900_v54 = vunpack.i.h.bf16 %v3898_v0  ;;  %v3899_v19 = vunpack.i.l.bf16 %v3898_v0  ;;  %v1778_v40 = vsel %vm1748_vm13, %v3869_v60, %v3870_v23  ;;  %v1880_v23 = vld [vmem:[%s5365_s5 + $0x1d8] sm:$0xff] }
 0x4d8   :  { %3230 = vmatprep.subr.bf16.mxu0 %v3229_v20  ;;  %v1773_v2 = vsel %vm1748_vm13, %v3929_v27, %v3864_v39  ;;  %v1864_v39 = vld [vmem:[%s5365_s5 + $0x158] sm:$0xff]  ;;  %v1863_v27 = vld [vmem:[%s5365_s5 + $0x150] sm:$0xff] }
 0x4d9   :  { %v1761_v15 = vsel %vm1748_vm13, %v3899_v19, %v3849_v42  ;;  %v1763_v12 = vsel %vm1748_vm13, %v3900_v54, %v3894_v25  ;;  %3232 = vmatpush1.bf16.msra.mxu0 %v3231_v45  ;;  %v3933_v1 = vpop.permute.xlu1 %3932 }
 0x4da   :  { %v3235_v35 = vpack.c.bf16 %v1763_v12, %v1761_v15  ;;  %v3903_v51 = vpop.permute.xlu0 %3902  ;;  %3234 = vmatprep.subr.bf16.mxu0 %v3233_v32  ;;  %v3935_v33 = vunpack.i.h.bf16 %v3933_v1  ;;  %v3934_v55 = vunpack.i.l.bf16 %v3933_v1  ;;  %v1827_v1 = vld [vmem:[%s5365_s5 + $0x30] sm:$0xff] }
 0x4db   :  { %v3905_v49 = vunpack.i.h.bf16 %v3903_v51  ;;  %v3904_v11 = vunpack.i.l.bf16 %v3903_v51  ;;  %v1828_v51 = vld [vmem:[%s5365_s5 + $0x38] sm:$0xff] }
 0x4dc   :  { %v1780_v42 = vsel %vm1748_vm13, %v3934_v55, %v3935_v33  ;;  %v1872_v33 = vld [vmem:[%s5365_s5 + $0x198] sm:$0xff] }
 0x4dd   :  { %v1767_v24 = vsel %vm1748_vm13, %v3910_v46, %v3904_v11  ;;  %3236 = vmatpush1.bf16.msra.mxu0 %v3235_v35  ;;  %v1768_v7 = vsel %vm1748_vm13, %v3904_v11, %v3905_v49  ;;  %v3249_v31 = vpack.c.bf16 %v1780_v42, %v1778_v40  ;;  %v1823_v35 = vld [vmem:[%s5365_s5 + $0x10] sm:$0xff]  ;;  %v1836_v49 = vld [vmem:[%s5365_s5 + $0x78] sm:$0xff] }
 0x4de   :  { %v3239_v26 = vpack.c.bf16 %v1767_v24, %v1765_v14  ;;  %v3918_v47 = vpop.permute.xlu0 %3917  ;;  %v3237_v6 = vpack.c.bf16 %v1768_v7, %v1766_v22  ;;  %v3938_v56 = vpop.permute.xlu1 %3937  ;;  %v1831_v46 = vld [vmem:[%s5365_s5 + $0x50] sm:$0xff]  ;;  %v1840_v22 = vld [vmem:[%s5365_s5 + $0x98] sm:$0xff] }
 0x4df   :  { %v3920_v10 = vunpack.i.h.bf16 %v3918_v47  ;;  %v3919_v13 = vunpack.i.l.bf16 %v3918_v47  ;;  %v3940_v43 = vunpack.i.h.bf16 %v3938_v56  ;;  %v3939_v45 = vunpack.i.l.bf16 %v3938_v56  ;;  %v1835_v11 = vld [vmem:[%s5365_s5 + $0x70] sm:$0xff]  ;;  %v1844_v24 = vld [vmem:[%s5365_s5 + $0xb8] sm:$0xff] }
 0x4e0   :  { %3238 = vmatprep.subr.bf16.mxu0 %v3237_v6  ;;  %v1839_v14 = vld [vmem:[%s5365_s5 + $0x90] sm:$0xff]  ;;  %v1852_v47 = vld [vmem:[%s5365_s5 + $0xf8] sm:$0xff] }
 0x4e1   :  { %v1769_v16 = vsel %vm1748_vm13, %v3919_v13, %v3859_v36  ;;  %v1771_v53 = vsel %vm1748_vm13, %v3920_v10, %v3914_v4  ;;  %3240 = vmatpush1.bf16.msra.mxu0 %v3239_v26  ;;  %v1782_v4 = vsel %vm1748_vm13, %v3939_v45, %v3940_v43  ;;  %v1832_v36 = vld [vmem:[%s5365_s5 + $0x58] sm:$0xff]  ;;  %v1843_v7 = vld [vmem:[%s5365_s5 + $0xb0] sm:$0xff] }
 0x4e2   :  { %v3243_v61 = vpack.c.bf16 %v1771_v53, %v1769_v16  ;;  %v3923_v25 = vpop.permute.xlu0 %3922  ;;  %3242 = vmatprep.subr.bf16.mxu0 %v3241_v30  ;;  %v3953_v29 = vpop.permute.xlu1 %3952  ;;  %v1847_v26 = vld [vmem:[%s5365_s5 + $0xd0] sm:$0xff]  ;;  %v1856_v10 = vld [vmem:[%s5365_s5 + $0x118] sm:$0xff] }
 0x4e3   :  { %v3925_v21 = vunpack.i.h.bf16 %v3923_v25  ;;  %v3924_v57 = vunpack.i.l.bf16 %v3923_v25  ;;  %v3954_v0 = vunpack.i.l.bf16 %v3953_v29  ;;  %v3955_v28 = vunpack.i.h.bf16 %v3953_v29  ;;  %v1851_v6 = vld [vmem:[%s5365_s5 + $0xf0] sm:$0xff]  ;;  %v1868_v56 = vld [vmem:[%s5365_s5 + $0x178] sm:$0xff] }
 0x4e4   :  { %v1855_v13 = vld [vmem:[%s5365_s5 + $0x110] sm:$0xff]  ;;  %v1876_v16 = vld [vmem:[%s5365_s5 + $0x1b8] sm:$0xff] }
 0x4e5   :  { %v1775_v37 = vsel %vm1748_vm13, %v3930_v63, %v3924_v57  ;;  %3244 = vmatpush1.bf16.msra.mxu0 %v3243_v61  ;;  %v1776_v8 = vsel %vm1748_vm13, %v3924_v57, %v3925_v21  ;;  %v1781_v32 = vsel %vm1748_vm13, %v3954_v0, %v3939_v45  ;;  %v1867_v30 = vld [vmem:[%s5365_s5 + $0x170] sm:$0xff] }
 0x4e6   :  { %v3247_v44 = vpack.c.bf16 %v1775_v37, %v1773_v2  ;;  %v3943_v38 = vpop.permute.xlu0 %3942  ;;  %v3245_v58 = vpack.c.bf16 %v1776_v8, %v1774_v59  ;;  %v1875_v53 = vld [vmem:[%s5365_s5 + $0x1b0] sm:$0xff] }
 0x4e7   :  { %v3945_v5 = vunpack.i.h.bf16 %v3943_v38  ;;  %v3944_v18 = vunpack.i.l.bf16 %v3943_v38  ;;  %v1879_v61 = vld [vmem:[%s5365_s5 + $0x1d0] sm:$0xff] }
 0x4e8   :  { %3246 = vmatprep.subr.bf16.mxu0 %v3245_v58 }
 0x4e9   :  { %v1777_v20 = vsel %vm1748_vm13, %v3944_v18, %v3869_v60  ;;  %v1779_v54 = vsel %vm1748_vm13, %v3945_v5, %v3934_v55  ;;  %3248 = vmatpush1.bf16.msra.mxu0 %v3247_v44  ;;  %v1871_v55 = vld [vmem:[%s5365_s5 + $0x190] sm:$0xff]  ;;  %s4001_s5 = smov 61  }
 0x4ea   :  { %v3251_v19 = vpack.c.bf16 %v1779_v54, %v1777_v20  ;;  %v3948_v48 = vpop.permute.xlu0 %3947  ;;  %3250 = vmatprep.subr.bf16.mxu0 %v3249_v31 }
 0x4eb   :  { %v3950_v17 = vunpack.i.h.bf16 %v3948_v48  ;;  %v3949_v34 = vunpack.i.l.bf16 %v3948_v48 }
 0x4ed   :  { %v1783_v9 = vsel %vm1748_vm13, %v3955_v28, %v3949_v34  ;;  %3252 = vmatpush1.bf16.msra.mxu0 %v3251_v19  ;;  %v1784_v15 = vsel %vm1748_vm13, %v3949_v34, %v3950_v17 }
 0x4ee   :  { %v3255_v12 = vpack.c.bf16 %v1783_v9, %v1781_v32  ;;  %v3253_v41 = vpack.c.bf16 %v1784_v15, %v1782_v4 }
 0x4f0   :  { %3254 = vmatprep.subr.bf16.mxu0 %v3253_v41 }
 0x4f1   :  { %3256 = vmatpush1.bf16.msra.mxu0 %v3255_v12 }
 0x4f3   :  { %v1904_v57 = vpop.permute.xlu1 %1903 }
 0x4f4   :  { %2237 = vmatmul.mubr.f32.vlgmr.msra.gmra.mrb[8].mxu0 %v1823_v35 }
 0x4f5   :  { %2964 = vmatprep.mubr.msk.f32.mxu0 %vm1971_vm15, %v1828_v51 }
 0x4f7   :  { %v1914_v0 = vpop.permute.xlu1 %1913 }
 0x4f8   :  { %2243 = vmatmul.mubr.f32.gmra.mrb[10].mxu0 %v1827_v1 }
 0x4f9   :  { %2965 = vmatprep.mubr.msk.f32.mxu0 %vm1971_vm15, %v1832_v36 }
 0x4fb   :  { %v1899_v63 = vpop.permute.xlu0 %1898  ;;  %v1924_v1 = vpop.permute.xlu1 %1923 }
 0x4fc   :  { %2249 = vmatmul.mubr.f32.gmra.mrb[12].mxu0 %v1831_v46 }
 0x4fd   :  { %2966 = vmatprep.mubr.msk.f32.mxu0 %vm1971_vm15, %v1836_v49 }
 0x4ff   :  { %v1909_v43 = vpop.permute.xlu0 %1908 }
 0x500   :  { %2255 = vmatmul.mubr.f32.gmra.mrb[14].mxu0 %v1835_v11 }
 0x501   :  { %2967 = vmatprep.mubr.msk.f32.mxu0 %vm1971_vm15, %v1840_v22 }
 0x503   :  { %v1919_v41 = vpop.permute.xlu0 %1918 }
 0x504   :  { %2261 = vmatmul.mubr.f32.gmra.mrb[16].mxu0 %v1839_v14 }
 0x505   :  { %2968 = vmatprep.mubr.msk.f32.mxu0 %vm1971_vm15, %v1844_v24 }
 0x508   :  { %2267 = vmatmul.mubr.f32.gmra.mrb[18].mxu0 %v1843_v7 }
 0x509   :  { %2969 = vmatprep.mubr.msk.f32.mxu0 %vm1971_vm15, %v1848_v52 }
 0x50c   :  { %2273 = vmatmul.mubr.f32.gmra.mrb[20].mxu0 %v1847_v26 }
 0x50d   :  { %2970 = vmatprep.mubr.msk.f32.mxu0 %vm1971_vm15, %v1852_v47 }
 0x510   :  { %2279 = vmatmul.mubr.f32.gmra.mrb[22].mxu0 %v1851_v6 }
 0x511   :  { %2971 = vmatprep.mubr.msk.f32.mxu0 %vm1971_vm15, %v1856_v10  ;;  %v1929_v10 = vpop.permute.xlu0 %1928 }
 0x514   :  { %2285 = vmatmul.mubr.f32.gmra.mrb[24].mxu0 %v1855_v13 }
 0x515   :  { %2972 = vmatprep.mubr.msk.f32.mxu0 %vm1971_vm15, %v1860_v62 }
 0x518   :  { %2291 = vmatmul.mubr.f32.gmra.mrb[26].mxu0 %v1859_v50  ;;  %v1934_v50 = vpop.permute.xlu1 %1933 }
 0x519   :  { %2973 = vmatprep.mubr.msk.f32.mxu0 %vm1971_vm15, %v1864_v39 }
 0x51c   :  { %2297 = vmatmul.mubr.f32.gmra.mrb[28].mxu0 %v1863_v27 }
 0x51d   :  { %2974 = vmatprep.mubr.msk.f32.mxu0 %vm1971_vm15, %v1868_v56 }
 0x520   :  { %2303 = vmatmul.mubr.f32.gmra.mrb[30].mxu0 %v1867_v30 }
 0x521   :  { %2975 = vmatprep.mubr.msk.f32.mxu0 %vm1971_vm15, %v1872_v33 }
 0x524   :  { %2309 = vmatmul.mubr.f32.gmra.mrb[32].mxu0 %v1871_v55 }
 0x525   :  { %2976 = vmatprep.mubr.msk.f32.mxu0 %vm1971_vm15, %v1876_v16 }
 0x528   :  { %2315 = vmatmul.mubr.f32.gmra.mrb[34].mxu0 %v1875_v53 }
 0x529   :  { %2977 = vmatprep.mubr.msk.f32.mxu0 %vm1971_vm15, %v1880_v23 }
 0x52c   :  { %2321 = vmatmul.mubr.f32.gmra.mrb[36].mxu0 %v1879_v61 }
 0x5c7   :  { %v2238_v25 = vpop.f32.mrb[8].mxu0 }
 0x5c8   :  { %v2240_v60 = vpop.f32.mrb[9].mxu0  ;;  %v3305_v21 = vadd.f32 %v2238_v25, %v1899_v63 }
 0x5c9   :  { %v3306_v59 = vadd.f32 %v2240_v60, %v1899_v63  ;;  %v1939_v63 = vpop.permute.xlu0 %1938 }
 0x5ca   :  { %v2327_v44 = vmax.f32 %v3305_v21, 0.0 }
 0x5cb   :  { %v2244_v2 = vpop.f32.mrb[10].mxu0  ;;  %v2328_v38 = vmax.f32 %v3306_v59, 0.0  ;;  %v1944_v59 = vpop.permute.xlu1 %1943 }
 0x5cc   :  { %v3307_v37 = vadd.f32 %v2244_v2, %v1904_v57  ;;  %v2246_v8 = vpop.f32.mrb[11].mxu0 }
 0x5cd   :  { %v3308_v42 = vadd.f32 %v2246_v8, %v1904_v57 }
 0x5ce   :  { %v2329_v29 = vmax.f32 %v3307_v37, 0.0 }
 0x5cf   :  { %v2330_v58 = vmax.f32 %v3308_v42, 0.0  ;;  %v2250_v5 = vpop.f32.mrb[12].mxu0 }
 0x5d0   :  { %v3259_v18 = vpack.c.bf16 %v2329_v29, %v2327_v44  ;;  %v2252_v40 = vpop.f32.mrb[13].mxu0  ;;  %v3309_v45 = vadd.f32 %v2250_v5, %v1909_v43 }
 0x5d1   :  { %v3257_v31 = vpack.c.bf16 %v2330_v58, %v2328_v38  ;;  %v3310_v20 = vadd.f32 %v2252_v40, %v1909_v43 }
 0x5d2   :  { %v2331_v17 = vmax.f32 %v3309_v45, 0.0 }
 0x5d3   :  { %v2256_v54 = vpop.f32.mrb[14].mxu0  ;;  %3258 = vmatprep.subr.bf16.mxu1 %v3257_v31  ;;  %v2332_v32 = vmax.f32 %v3310_v20, 0.0  ;;  %v1949_v31 = vpop.permute.xlu0 %1948 }
 0x5d4   :  { %v3311_v19 = vadd.f32 %v2256_v54, %v1914_v0  ;;  %v2258_v48 = vpop.f32.mrb[15].mxu0  ;;  %3260 = vmatpush1.bf16.msra.mxu1 %v3259_v18  ;;  %v1954_v20 = vpop.permute.xlu1 %1953 }
 0x5d5   :  { %v3312_v28 = vadd.f32 %v2258_v48, %v1914_v0 }
 0x5d6   :  { %v2333_v34 = vmax.f32 %v3311_v19, 0.0 }
 0x5d7   :  { %v2334_v9 = vmax.f32 %v3312_v28, 0.0  ;;  %v2262_v4 = vpop.f32.mrb[16].mxu0 }
 0x5d8   :  { %v3263_v15 = vpack.c.bf16 %v2333_v34, %v2331_v17  ;;  %v2264_v12 = vpop.f32.mrb[17].mxu0  ;;  %v3313_v51 = vadd.f32 %v2262_v4, %v1919_v41 }
 0x5d9   :  { %v3261_v35 = vpack.c.bf16 %v2334_v9, %v2332_v32  ;;  %v3314_v36 = vadd.f32 %v2264_v12, %v1919_v41 }
 0x5da   :  { %v2335_v14 = vmax.f32 %v3313_v51, 0.0 }
 0x5db   :  { %v2268_v46 = vpop.f32.mrb[18].mxu0  ;;  %3262 = vmatprep.subr.bf16.mxu1 %v3261_v35  ;;  %v2336_v7 = vmax.f32 %v3314_v36, 0.0  ;;  %v1959_v35 = vpop.permute.xlu0 %1958 }
 0x5dc   :  { %v3315_v49 = vadd.f32 %v2268_v46, %v1924_v1  ;;  %v2270_v11 = vpop.f32.mrb[19].mxu0  ;;  %3264 = vmatpush1.bf16.msra.mxu1 %v3263_v15  ;;  %v1964_v36 = vpop.permute.xlu1 %1963 }
 0x5dd   :  { %v3316_v22 = vadd.f32 %v2270_v11, %v1924_v1 }
 0x5de   :  { %v2337_v24 = vmax.f32 %v3315_v49, 0.0 }
 0x5df   :  { %v2338_v52 = vmax.f32 %v3316_v22, 0.0  ;;  %v2274_v26 = vpop.f32.mrb[20].mxu0 }
 0x5e0   :  { %v3267_v47 = vpack.c.bf16 %v2337_v24, %v2335_v14  ;;  %v2276_v6 = vpop.f32.mrb[21].mxu0  ;;  %v3317_v62 = vadd.f32 %v2274_v26, %v1929_v10 }
 0x5e1   :  { %v3265_v13 = vpack.c.bf16 %v2338_v52, %v2336_v7  ;;  %v3318_v39 = vadd.f32 %v2276_v6, %v1929_v10  ;;  %v1969_v6 = vpop.permute.xlu0 %1968 }
 0x5e2   :  { %v2339_v55 = vmax.f32 %v3317_v62, 0.0 }
 0x5e3   :  { %v2280_v27 = vpop.f32.mrb[22].mxu0  ;;  %3266 = vmatprep.subr.bf16.mxu1 %v3265_v13  ;;  %v2340_v53 = vmax.f32 %v3318_v39, 0.0 }
 0x5e4   :  { %v3319_v56 = vadd.f32 %v2280_v27, %v1934_v50  ;;  %v2282_v30 = vpop.f32.mrb[23].mxu0  ;;  %3268 = vmatpush1.bf16.msra.mxu1 %v3267_v47 }
 0x5e5   :  { %v3320_v33 = vadd.f32 %v2282_v30, %v1934_v50  ;;  %v2357_v30 = vld [vmem:[%s5369_s7] sm:$0xff] }
 0x5e6   :  { %v2341_v16 = vmax.f32 %v3319_v56, 0.0 }
 0x5e7   :  { %v2342_v23 = vmax.f32 %v3320_v33, 0.0  ;;  %v2286_v61 = vpop.f32.mrb[24].mxu0  ;;  %v2358_v33 = vld [vmem:[%s5369_s7 + $0x8] sm:$0xff] }
 0x5e8   :  { %v3271_v25 = vpack.c.bf16 %v2341_v16, %v2339_v55  ;;  %v2288_v60 = vpop.f32.mrb[25].mxu0  ;;  %v3321_v57 = vadd.f32 %v2286_v61, %v1939_v63  ;;  %v2359_v55 = vld [vmem:[%s5369_s7 + $0x10] sm:$0xff]  ;;  %v2360_v16 = vld [vmem:[%s5369_s7 + $0x18] sm:$0xff] }
 0x5e9   :  { %v3269_v21 = vpack.c.bf16 %v2342_v23, %v2340_v53  ;;  %v3322_v2 = vadd.f32 %v2288_v60, %v1939_v63  ;;  %v2361_v53 = vld [vmem:[%s5369_s7 + $0x20] sm:$0xff]  ;;  %v2362_v23 = vld [vmem:[%s5369_s7 + $0x28] sm:$0xff]  ;;  %v2363_v61 = vld [vmem:[%s5369_s7 + $0x30] sm:$0xff] }
 0x5ea   :  { %v2343_v29 = vmax.f32 %v3321_v57, 0.0  ;;  %v2365_v60 = vld [vmem:[%s5369_s7 + $0x40] sm:$0xff]  ;;  %v2366_v63 = vld [vmem:[%s5369_s7 + $0x48] sm:$0xff] }
 0x5eb   :  { %v2292_v37 = vpop.f32.mrb[26].mxu0  ;;  %3270 = vmatprep.subr.bf16.mxu1 %v3269_v21  ;;  %v2344_v58 = vmax.f32 %v3322_v2, 0.0  ;;  %v2367_v21 = vld [vmem:[%s5369_s7 + $0x50] sm:$0xf]  ;;  %v2382_v2 = vpop.permute.xlu1 %2381 }
 0x5ec   :  { %v3323_v8 = vadd.f32 %v2292_v37, %v1944_v59  ;;  %v2294_v42 = vpop.f32.mrb[27].mxu0  ;;  %3272 = vmatpush1.bf16.msra.mxu1 %v3271_v25  ;;  %v2364_v25 = vld [vmem:[%s5369_s7 + $0x38] sm:$0xff] }
 0x5ed   :  { %v3324_v44 = vadd.f32 %v2294_v42, %v1944_v59 }
 0x5ee   :  { %v2345_v38 = vmax.f32 %v3323_v8, 0.0  ;;  %v2387_v8 = vpop.permute.xlu0 %2386 }
 0x5ef   :  { %v2346_v5 = vmax.f32 %v3324_v44, 0.0  ;;  %v2298_v18 = vpop.f32.mrb[28].mxu0 }
 0x5f0   :  { %v3275_v40 = vpack.c.bf16 %v2345_v38, %v2343_v29  ;;  %v2300_v43 = vpop.f32.mrb[29].mxu0  ;;  %v3325_v0 = vadd.f32 %v2298_v18, %v1949_v31 }
 0x5f1   :  { %v3273_v45 = vpack.c.bf16 %v2346_v5, %v2344_v58  ;;  %v3326_v54 = vadd.f32 %v2300_v43, %v1949_v31 }
 0x5f2   :  { %v2347_v34 = vmax.f32 %v3325_v0, 0.0 }
 0x5f3   :  { %v2304_v19 = vpop.f32.mrb[30].mxu0  ;;  %3274 = vmatprep.subr.bf16.mxu1 %v3273_v45  ;;  %v2348_v9 = vmax.f32 %v3326_v54, 0.0 }
 0x5f4   :  { %v3327_v48 = vadd.f32 %v2304_v19, %v1954_v20  ;;  %v2306_v28 = vpop.f32.mrb[31].mxu0  ;;  %3276 = vmatpush1.bf16.msra.mxu1 %v3275_v40 }
 0x5f5   :  { %v3328_v17 = vadd.f32 %v2306_v28, %v1954_v20  ;;  %v2392_v20 = vpop.permute.xlu1 %2391 }
 0x5f6   :  { %v2349_v32 = vmax.f32 %v3327_v48, 0.0  ;;  %v2397_v48 = vpop.permute.xlu0 %2396 }
 0x5f7   :  { %v2350_v4 = vmax.f32 %v3328_v17, 0.0  ;;  %v2310_v15 = vpop.f32.mrb[32].mxu0 }
 0x5f8   :  { %v3279_v12 = vpack.c.bf16 %v2349_v32, %v2347_v34  ;;  %v2312_v41 = vpop.f32.mrb[33].mxu0  ;;  %v3329_v1 = vadd.f32 %v2310_v15, %v1959_v35 }
 0x5f9   :  { %v3277_v51 = vpack.c.bf16 %v2350_v4, %v2348_v9  ;;  %v3330_v46 = vadd.f32 %v2312_v41, %v1959_v35 }
 0x5fa   :  { %v2351_v24 = vmax.f32 %v3329_v1, 0.0 }
 0x5fb   :  { %v2316_v49 = vpop.f32.mrb[34].mxu0  ;;  %3278 = vmatprep.subr.bf16.mxu1 %v3277_v51  ;;  %v2352_v52 = vmax.f32 %v3330_v46, 0.0 }
 0x5fc   :  { %v3331_v11 = vadd.f32 %v2316_v49, %v1964_v36  ;;  %v2318_v22 = vpop.f32.mrb[35].mxu0  ;;  %3280 = vmatpush1.bf16.msra.mxu1 %v3279_v12 }
 0x5fd   :  { %v3332_v14 = vadd.f32 %v2318_v22, %v1964_v36  ;;  %v2402_v36 = vpop.permute.xlu1 %2401 }
 0x5fe   :  { %v2353_v7 = vmax.f32 %v3331_v11, 0.0  ;;  %v2407_v11 = vpop.permute.xlu0 %2406 }
 0x5ff   :  { %v2354_v26 = vmax.f32 %v3332_v14, 0.0  ;;  %v2322_v47 = vpop.f32.mrb[36].mxu0 }
 0x600   :  { %v3283_v10 = vpack.c.bf16 %v2353_v7, %v2351_v24  ;;  %v2324_v13 = vpop.f32.mrb[37].mxu0  ;;  %v3333_v39 = vadd.f32 %v2322_v47, %v1969_v6 }
 0x601   :  { %v3281_v62 = vpack.c.bf16 %v2354_v26, %v2352_v52  ;;  %v3334_v50 = vadd.f32 %v2324_v13, %v1969_v6 }
 0x602   :  { %v2355_v56 = vmax.f32 %v3333_v39, 0.0  ;;  %v2412_v39 = vpop.permute.xlu1 %2411 }
 0x603   :  { %v2356_v27 = vmax.f32 %v3334_v50, 0.0  ;;  %3282 = vmatprep.subr.bf16.mxu1 %v3281_v62 }
 0x604   :  { %3284 = vmatpush1.bf16.msra.mxu1 %v3283_v10 }
 0x605   :  { %2495 = vmatprep.subr.mxu1 %v2356_v27 }
 0x608   :  { %2496 = vmatpush1.msra.mxu1 %v2355_v56 }
 0x609   :  { %2978 = vmatmul.mubr.msk.f32.vlgmr.msra.gmra.mrb[16].mxu1 %vm1387_vm9, %v2357_v30  ;;  %v2417_v30 = vpop.permute.xlu0 %2416 }
 0x60a   :  { %2537 = vmatprep.mubr.f32.mxu1 %v3968_v3 }
 0x60d   :  { %2979 = vmatmul.mubr.msk.f32.gmra.mrb[18].mxu1 %vm1387_vm9, %v2358_v33 }
 0x60e   :  { %2543 = vmatprep.mubr.f32.mxu1 %v3968_v3 }
 0x611   :  { %2980 = vmatmul.mubr.msk.f32.gmra.mrb[20].mxu1 %vm1387_vm9, %v2359_v55 }
 0x612   :  { %2549 = vmatprep.mubr.f32.mxu1 %v3968_v3 }
 0x615   :  { %2981 = vmatmul.mubr.msk.f32.gmra.mrb[22].mxu1 %vm1387_vm9, %v2360_v16 }
 0x616   :  { %2555 = vmatprep.mubr.f32.mxu1 %v3968_v3 }
 0x619   :  { %2982 = vmatmul.mubr.msk.f32.gmra.mrb[24].mxu1 %vm1387_vm9, %v2361_v53 }
 0x61a   :  { %2561 = vmatprep.mubr.f32.mxu1 %v3968_v3 }
 0x61d   :  { %2983 = vmatmul.mubr.msk.f32.gmra.mrb[26].mxu1 %vm1387_vm9, %v2362_v23 }
 0x61e   :  { %2567 = vmatprep.mubr.f32.mxu1 %v3968_v3 }
 0x621   :  { %2984 = vmatmul.mubr.msk.f32.gmra.mrb[28].mxu1 %vm1387_vm9, %v2363_v61 }
 0x622   :  { %2573 = vmatprep.mubr.f32.mxu1 %v3968_v3 }
 0x625   :  { %2985 = vmatmul.mubr.msk.f32.gmra.mrb[30].mxu1 %vm1387_vm9, %v2364_v25 }
 0x626   :  { %2579 = vmatprep.mubr.f32.mxu1 %v3968_v3 }
 0x629   :  { %2986 = vmatmul.mubr.msk.f32.gmra.mrb[32].mxu1 %vm1387_vm9, %v2365_v60 }
 0x62a   :  { %2585 = vmatprep.mubr.f32.mxu1 %v3968_v3 }
 0x62d   :  { %2987 = vmatmul.mubr.msk.f32.gmra.mrb[34].mxu1 %vm1387_vm9, %v2366_v63 }
 0x62e   :  { %2591 = vmatprep.mubr.f32.mxu1 %v3968_v3 }
 0x631   :  { %2988 = vmatmul.mubr.msk.f32.gmra.mrb[36].mxu1 %vm1387_vm9, %v2367_v21 }
 0x632   :  { %2712 = vmatprep.mubr.f32.mxu1 %v3968_v3 }
 0x6dc   :  { %v2533_v57 = vpop.f32.mrb[16].mxu1 }
 0x6dd   :  { %v2535_v59 = vpop.f32.mrb[17].mxu1  ;;  %v2534_v37 = vadd.f32 %v2533_v57, %v2382_v2 }
 0x6de   :  { %v2536_v42 = vadd.f32 %v2535_v59, %v2382_v2  ;;  %v2422_v2 = vpop.permute.xlu1 %2421 }
 0x6df   :  { %v2598_v5 = vmax.f32 %v2534_v37, 0.0 }
 0x6e0   :  { %v2539_v44 = vpop.f32.mrb[18].mxu1  ;;  %v2599_v40 = vmax.f32 %v2536_v42, 0.0  ;;  %v2427_v42 = vpop.permute.xlu0 %2426 }
 0x6e1   :  { %v2540_v29 = vadd.f32 %v2539_v44, %v2387_v8  ;;  %v2541_v38 = vpop.f32.mrb[19].mxu1 }
 0x6e2   :  { %v2542_v58 = vadd.f32 %v2541_v38, %v2387_v8 }
 0x6e3   :  { %v2600_v18 = vmax.f32 %v2540_v29, 0.0 }
 0x6e4   :  { %v2601_v43 = vmax.f32 %v2542_v58, 0.0  ;;  %v2545_v31 = vpop.f32.mrb[20].mxu1 }
 0x6e5   :  { %v3287_v45 = vpack.c.bf16 %v2600_v18, %v2598_v5  ;;  %v2547_v0 = vpop.f32.mrb[21].mxu1  ;;  %v2546_v19 = vadd.f32 %v2545_v31, %v2392_v20 }
 0x6e6   :  { %v3285_v54 = vpack.c.bf16 %v2601_v43, %v2599_v40  ;;  %v2548_v28 = vadd.f32 %v2547_v0, %v2392_v20  ;;  %v2432_v0 = vpop.permute.xlu1 %2431 }
 0x6e7   :  { %v2602_v4 = vmax.f32 %v2546_v19, 0.0 }
 0x6e8   :  { %v2551_v17 = vpop.f32.mrb[22].mxu1  ;;  %3286 = vmatprep.subr.bf16.mxu1 %v3285_v54  ;;  %v2603_v12 = vmax.f32 %v2548_v28, 0.0 }
 0x6e9   :  { %v2552_v34 = vadd.f32 %v2551_v17, %v2397_v48  ;;  %v2553_v32 = vpop.f32.mrb[23].mxu1  ;;  %3288 = vmatpush1.bf16.msra.mxu1 %v3287_v45 }
 0x6ea   :  { %v2554_v9 = vadd.f32 %v2553_v32, %v2397_v48  ;;  %v2620_v32 = vld [vmem:[%s5370_s9] sm:$0xff] }
 0x6eb   :  { %v2604_v15 = vmax.f32 %v2552_v34, 0.0 }
 0x6ec   :  { %v2605_v41 = vmax.f32 %v2554_v9, 0.0  ;;  %v2557_v35 = vpop.f32.mrb[24].mxu1  ;;  %v2621_v9 = vld [vmem:[%s5370_s9 + $0x8] sm:$0x3] }
 0x6ed   :  { %v3291_v51 = vpack.c.bf16 %v2604_v15, %v2602_v4  ;;  %v2559_v1 = vpop.f32.mrb[25].mxu1  ;;  %v2558_v49 = vadd.f32 %v2557_v35, %v2402_v36  ;;  %v2627_v4 = vpop.permute.xlu0 %2626 }
 0x6ee   :  { %v3289_v46 = vpack.c.bf16 %v2605_v41, %v2603_v12  ;;  %v2560_v22 = vadd.f32 %v2559_v1, %v2402_v36 }
 0x6ef   :  { %v2606_v26 = vmax.f32 %v2558_v49, 0.0 }
 0x6f0   :  { %v2563_v14 = vpop.f32.mrb[26].mxu1  ;;  %3290 = vmatprep.subr.bf16.mxu1 %v3289_v46  ;;  %v2607_v6 = vmax.f32 %v2560_v22, 0.0 }
 0x6f1   :  { %v2564_v24 = vadd.f32 %v2563_v14, %v2407_v11  ;;  %v2565_v7 = vpop.f32.mrb[27].mxu1  ;;  %3292 = vmatpush1.bf16.msra.mxu1 %v3291_v51 }
 0x6f2   :  { %v2566_v52 = vadd.f32 %v2565_v7, %v2407_v11 }
 0x6f3   :  { %v2608_v47 = vmax.f32 %v2564_v24, 0.0 }
 0x6f4   :  { %v2609_v10 = vmax.f32 %v2566_v52, 0.0  ;;  %v2569_v13 = vpop.f32.mrb[28].mxu1 }
 0x6f5   :  { %v3295_v62 = vpack.c.bf16 %v2608_v47, %v2606_v26  ;;  %v2571_v50 = vpop.f32.mrb[29].mxu1  ;;  %v2570_v56 = vadd.f32 %v2569_v13, %v2412_v39 }
 0x6f6   :  { %v3293_v27 = vpack.c.bf16 %v2609_v10, %v2607_v6  ;;  %v2572_v33 = vadd.f32 %v2571_v50, %v2412_v39  ;;  %v2779_v50 = vlaneseq }
 0x6f7   :  { %v2610_v61 = vmax.f32 %v2570_v56, 0.0 }
 0x6f8   :  { %v2575_v55 = vpop.f32.mrb[30].mxu1  ;;  %3294 = vmatprep.subr.bf16.mxu1 %v3293_v27  ;;  %v2611_v60 = vmax.f32 %v2572_v33, 0.0  ;;  %v2632_v33 = vpop.permute.xlu1 %2631 }
 0x6f9   :  { %v2576_v16 = vadd.f32 %v2575_v55, %v2417_v30  ;;  %v2577_v53 = vpop.f32.mrb[31].mxu1  ;;  %3296 = vmatpush1.bf16.msra.mxu1 %v3295_v62 }
 0x6fa   :  { %v2578_v23 = vadd.f32 %v2577_v53, %v2417_v30 }
 0x6fb   :  { %v2612_v25 = vmax.f32 %v2576_v16, 0.0 }
 0x6fc   :  { %v2613_v63 = vmax.f32 %v2578_v23, 0.0  ;;  %v2581_v21 = vpop.f32.mrb[32].mxu1 }
 0x6fd   :  { %v3299_v57 = vpack.c.bf16 %v2612_v25, %v2610_v61  ;;  %v2583_v59 = vpop.f32.mrb[33].mxu1  ;;  %v2582_v8 = vadd.f32 %v2581_v21, %v2422_v2  ;;  %v2780_v25 = vshrl.u32 %v2779_v50, 7 }
 0x6fe   :  { %v3297_v37 = vpack.c.bf16 %v2613_v63, %v2611_v60  ;;  %v2584_v44 = vadd.f32 %v2583_v59, %v2422_v2 }
 0x6ff   :  { %v2614_v18 = vmax.f32 %v2582_v8, 0.0  ;;  %v2781_v8 = vsub.s32 0, %v2780_v25 }
 0x700   :  { %v2587_v29 = vpop.f32.mrb[34].mxu1  ;;  %3298 = vmatprep.subr.bf16.mxu1 %v3297_v37  ;;  %v2615_v43 = vmax.f32 %v2584_v44, 0.0 }
 0x701   :  { %v2588_v38 = vadd.f32 %v2587_v29, %v2427_v42  ;;  %v2589_v58 = vpop.f32.mrb[35].mxu1  ;;  %3300 = vmatpush1.bf16.msra.mxu1 %v3299_v57 }
 0x702   :  { %v2590_v5 = vadd.f32 %v2589_v58, %v2427_v42 }
 0x703   :  { %v2616_v40 = vmax.f32 %v2588_v38, 0.0 }
 0x704   :  { %v2617_v31 = vmax.f32 %v2590_v5, 0.0  ;;  %v2593_v45 = vpop.f32.mrb[36].mxu1 }
 0x705   :  { %v3303_v20 = vpack.c.bf16 %v2616_v40, %v2614_v18  ;;  %v2595_v54 = vpop.f32.mrb[37].mxu1  ;;  %v2594_v28 = vadd.f32 %v2593_v45, %v2432_v0 }
 0x706   :  { %v3301_v19 = vpack.c.bf16 %v2617_v31, %v2615_v43  ;;  %v2596_v48 = vadd.f32 %v2595_v54, %v2432_v0 }
 0x707   :  { %v2618_v34 = vmax.f32 %v2594_v28, 0.0 }
 0x708   :  { %v2619_v17 = vmax.f32 %v2596_v48, 0.0  ;;  %3302 = vmatprep.subr.bf16.mxu1 %v3301_v19 }
 0x709   :  { %3304 = vmatpush1.bf16.msra.mxu1 %v3303_v20 }
 0x70a   :  { %2989 = vmatprep.subr.msk.mxu1 %vm2641_vm1, %v2619_v17 }
 0x70d   :  { %2990 = vmatpush1.msk.msra.mxu1 %vm2641_vm1, %v2618_v34 }
 0x70e   :  { %2991 = vmatmul.mubr.msk.f32.vlgmr.msra.gmra.mrb[38].mxu1 %vm2634_vm3, %v2620_v32 }
 0x70f   :  { %2718 = vmatprep.mubr.f32.mxu1 %v3968_v3 }
 0x712   :  { %2992 = vmatmul.mubr.msk.f32.gmra.mrb[40].mxu1 %vm2634_vm3, %v2621_v9 }
 0x7e1   :  { %v2714_v15 = vpop.f32.mrb[38].mxu1 }
 0x7e2   :  { %v2715_v12 = vadd.f32 %v2714_v15, %v2627_v4  ;;  %v2716_v41 = vpop.f32.mrb[39].mxu1 }
 0x7e3   :  { %v2717_v35 = vadd.f32 %v2716_v41, %v2627_v4 }
 0x7e4   :  { %v2727_v51 = vrot.slane %v2715_v12, 1  ;;  %v2733_v49 = vrot.slane %v2715_v12, 2  ;;  %v2739_v3 = vrot.slane %v2715_v12, 3  ;;  %v2745_v47 = vrot.slane %v2715_v12, 4 }
 0x7e5   :  { %v2720_v1 = vpop.f32.mrb[40].mxu1  ;;  %v2728_v36 = vrot.slane %v2717_v35, 1  ;;  %v2734_v14 = vrot.slane %v2717_v35, 2  ;;  %v2740_v52 = vrot.slane %v2717_v35, 3  ;;  %v2746_v10 = vrot.slane %v2717_v35, 4 }
 0x7e6   :  { %v2731_v46 = vmax.f32 %v2715_v12, %v2727_v51  ;;  %v2722_v11 = vpop.f32.mrb[41].mxu1  ;;  %v2751_v62 = vrot.slane %v2715_v12, 5  ;;  %v2752_v27 = vrot.slane %v2717_v35, 5  ;;  %v2757_v30 = vrot.slane %v2715_v12, 6 }
 0x7e7   :  { %v2732_v22 = vmax.f32 %v2717_v35, %v2728_v36  ;;  %v2758_v16 = vrot.slane %v2717_v35, 6  ;;  %v2721_v53 = vadd.f32 %v2720_v1, %v2632_v33  ;;  %v2763_v61 = vrot.slane %v2715_v12, 7 }
 0x7e8   :  { %v2737_v24 = vmax.f32 %v2731_v46, %v2733_v49  ;;  %v2723_v60 = vadd.f32 %v2722_v11, %v2632_v33  ;;  %v2764_v21 = vrot.slane %v2717_v35, 7 }
 0x7e9   :  { %v2738_v7 = vmax.f32 %v2732_v22, %v2734_v14  ;;  %v2773_v37 = vrot.slane %v2721_v53, 1 }
 0x7ea   :  { %v2743_v26 = vmax.f32 %v2737_v24, %v2739_v3  ;;  %v2774_v44 = vrot.slane %v2723_v60, 1 }
 0x7eb   :  { %v2744_v6 = vmax.f32 %v2738_v7, %v2740_v52 }
 0x7ec   :  { %v2749_v13 = vmax.f32 %v2743_v26, %v2745_v47 }
 0x7ed   :  { %v2750_v39 = vmax.f32 %v2744_v6, %v2746_v10 }
 0x7ee   :  { %v2755_v56 = vmax.f32 %v2749_v13, %v2751_v62 }
 0x7ef   :  { %v2756_v55 = vmax.f32 %v2750_v39, %v2752_v27 }
 0x7f0   :  { %v2761_v23 = vmax.f32 %v2755_v56, %v2757_v30 }
 0x7f1   :  { %v2762_v63 = vmax.f32 %v2756_v55, %v2758_v16 }
 0x7f2   :  { %v2767_v57 = vmax.f32 %v2761_v23, %v2763_v61 }
 0x7f3   :  { %v2768_v59 = vmax.f32 %v2762_v63, %v2764_v21 }
 0x7f4   :  { %v2769_v2 = vmax.f32 %v2767_v57, %v2721_v53 }
 0x7f5   :  { %v2770_v42 = vmax.f32 %v2768_v59, %v2723_v60 }
 0x7f6   :  { %v2777_v29 = vmax.f32 %v2769_v2, %v2773_v37 }
 0x7f7   :  { %v2778_v38 = vmax.f32 %v2770_v42, %v2774_v44 }
 0x7f8   :  { %v2782_v58 = vrot.slane %v2777_v29, %v2781_v8 }
 0x7f9   :  { %v2786_v5 = vrot.slane %v2778_v38, %v2781_v8 }
 0x7fa   :  { %v2787_v18 = vsub.f32 %v2715_v12, %v2782_v58  ;;  %v2789_v40 = vsub.f32 %v2721_v53, %v2782_v58 }
 0x7fb   :  { %v2788_v43 = vsub.f32 %v2717_v35, %v2786_v5  ;;  %v2790_v31 = vsub.f32 %v2723_v60, %v2786_v5 }
 0x7fc   :  { %v2791_v45 = vmul.f32 1.442695, %v2787_v18  ;;  %v2795_v54 = vmul.f32 1.442695, %v2789_v40 }
 0x7fd   :  { %v2793_v0 = vmul.f32 1.442695, %v2788_v43  ;;  %v2797_v28 = vmul.f32 1.442695, %v2790_v31 }
 0x7fe   :  { %3956 = vpow2.f32 %v2791_v45 }
 0x7ff   :  { %3958 = vpow2.f32 %v2793_v0 }
 0x800   :  { %3960 = vpow2.f32 %v2795_v54 }
 0x801   :  { %3962 = vpow2.f32 %v2797_v28 }
 0x808   :  { %v3957_v20 = vpop.eup %3956 }
 0x809   :  { %v2801_v19 = vrot.slane %v3957_v20, 1  ;;  %v3959_v48 = vpop.eup %3958  ;;  %v2807_v34 = vrot.slane %v3957_v20, 2  ;;  %v2813_v4 = vrot.slane %v3957_v20, 3  ;;  %v2819_v35 = vrot.slane %v3957_v20, 4 }
 0x80a   :  { %v2802_v32 = vrot.slane %v3959_v48, 1  ;;  %v2808_v12 = vrot.slane %v3959_v48, 2  ;;  %v2814_v1 = vrot.slane %v3959_v48, 3  ;;  %v2825_v46 = vrot.slane %v3957_v20, 5  ;;  %v3961_v6 = vpop.eup %3960 }
 0x80b   :  { %v2805_v17 = vadd.f32 %v3957_v20, %v2801_v19  ;;  %v2820_v11 = vrot.slane %v3959_v48, 4  ;;  %v2831_v14 = vrot.slane %v3957_v20, 6  ;;  %v2826_v3 = vrot.slane %v3959_v48, 5  ;;  %v3963_v50 = vpop.eup %3962 }
 0x80c   :  { %v2806_v15 = vadd.f32 %v3959_v48, %v2802_v32  ;;  %v2837_v52 = vrot.slane %v3957_v20, 7  ;;  %v2832_v47 = vrot.slane %v3959_v48, 6  ;;  %v2838_v62 = vrot.slane %v3959_v48, 7 }
 0x80d   :  { %v2811_v9 = vadd.f32 %v2807_v34, %v2805_v17  ;;  %v2847_v27 = vrot.slane %v3961_v6, 1  ;;  %v2848_v55 = vrot.slane %v3963_v50, 1 }
 0x80e   :  { %v2812_v51 = vadd.f32 %v2808_v12, %v2806_v15 }
 0x80f   :  { %v2817_v41 = vadd.f32 %v2813_v4, %v2811_v9 }
 0x810   :  { %v2818_v49 = vadd.f32 %v2814_v1, %v2812_v51 }
 0x811   :  { %v2823_v36 = vadd.f32 %v2819_v35, %v2817_v41 }
 0x812   :  { %v2824_v24 = vadd.f32 %v2820_v11, %v2818_v49 }
 0x813   :  { %v2829_v22 = vadd.f32 %v2825_v46, %v2823_v36 }
 0x814   :  { %v2830_v26 = vadd.f32 %v2826_v3, %v2824_v24 }
 0x815   :  { %v2835_v7 = vadd.f32 %v2831_v14, %v2829_v22 }
 0x816   :  { %v2836_v13 = vadd.f32 %v2832_v47, %v2830_v26 }
 0x817   :  { %v2841_v10 = vadd.f32 %v2837_v52, %v2835_v7 }
 0x818   :  { %v2842_v56 = vadd.f32 %v2838_v62, %v2836_v13 }
 0x819   :  { %v2843_v39 = vadd.f32 %v3961_v6, %v2841_v10 }
 0x81a   :  { %v2844_v33 = vadd.f32 %v3963_v50, %v2842_v56 }
 0x81b   :  { %v2851_v30 = vadd.f32 %v2847_v27, %v2843_v39 }
 0x81c   :  { %v2852_v53 = vadd.f32 %v2848_v55, %v2844_v33 }
 0x81d   :  { %v2856_v16 = vrot.slane %v2851_v30, %v2781_v8 }
 0x81e   :  { %v2860_v23 = vrot.slane %v2852_v53, %v2781_v8 }
 0x81f   :  { %3964 = vrcp.f32 %v2856_v16 }
 0x820   :  { %3966 = vrcp.f32 %v2860_v23 }
 0x829   :  { %v3965_v61 = vpop.eup %3964 }
 0x82a   :  { %v2865_v25 = vmul.f32 %v3965_v61, %v3961_v6  ;;  %v2862_v60 = vmul.f32 %v3965_v61, %v3957_v20  ;;  %v3967_v63 = vpop.eup %3966 }
 0x82b   :  { %v2866_v21 = vmul.f32 %v3967_v63, %v3963_v50  ;;  %v2864_v57 = vmul.f32 %v3967_v63, %v3959_v48 }
 0x82c   :  { %2870 = vst.msk [vmem:[%s5371_s11 + $0x8] sm:$0x3] %vm2869_vm6, %v2865_v25 }
 0x82d   :  { %2868 = vst.msk [vmem:[%s5371_s11] sm:$0xff] %vm2867_vm7, %v2862_v60  ;;  %2875 = vrot.lane.b32.xlu1 %v2866_v21, %s4001_s5  ;;  %2873 = vrot.lane.b32.xlu0 %v2864_v57, %s4001_s5 }
 0x89f   :  { %v2876_v59 = vpop.permute.xlu1 %2875  ;;  %v2874_v2 = vpop.permute.xlu0 %2873 }
 0x8a0   :  { %2882 = vst.msk [vmem:[%s5371_s11 + $0x8] sm:$0x3] %vm2881_vm4, %v2876_v59 }
 0x8a1   :  { %2880 = vst.msk [vmem:[%s5371_s11] sm:$0xff] %vm2879_vm8, %v2874_v2 }

</bundles_post_ra>
